<compile_context>
chip_gen: v6e
topology: v6e:2x2x1
jax: 0.10.0
libtpu: 0.0.40
codegen_flags: <defaults>
</compile_context>

<pallas_src>
import functools
import math

import jax
import jax.numpy as jnp
from jax import lax
from jax.experimental import pallas as pl
from jax.experimental.pallas import tpu as pltpu

# ----- tiny BERT config (small synthetic shapes) -----
VOCAB = 100
MAX_POS = 16
TYPE_VOCAB = 2
HIDDEN = 32
NUM_HEADS = 4
HEAD_DIM = HIDDEN // NUM_HEADS
INTERMEDIATE = 64
NUM_LAYERS = 2
NUM_CLASSES = 2
LN_EPS = 1e-12
FC_PAD = 128          # lane-dense padded logits width

BATCH = 2
SEQ = 8


# ---------------- in-kernel helpers ----------------
def _layernorm(x, g, b):
    mean = jnp.mean(x, axis=-1, keepdims=True)
    var = jnp.mean(jnp.square(x - mean), axis=-1, keepdims=True)
    return (x - mean) * lax.rsqrt(var + LN_EPS) * g + b


def _bmm(a, b, *, contract):
    """Batched (single leading batch dim) MXU matmul: bf16 in, f32 accumulate."""
    return lax.dot_general(a.astype(jnp.bfloat16), b.astype(jnp.bfloat16),
                           dimension_numbers=(contract, ((0,), (0,))),
                           preferred_element_type=jnp.float32)


def _gelu(x):
    # TODO(synk): HF BERT uses erf GELU; tanh approximation differs by ~1e-3.
    c = math.sqrt(2.0 / math.pi)
    return 0.5 * x * (1.0 + jnp.tanh(c * (x + 0.044715 * x * x * x)))


# ---------------- fused whole-forward kernel ----------------
def _bert_fwd_kernel(x_ref, bias_ref,
                     emb_g_ref, emb_b_ref,
                     wqkv_ref, bqkv_ref, wo_ref, bo_ref,
                     ln1_g_ref, ln1_b_ref,
                     w1_ref, b1_ref, w2_ref, b2_ref,
                     ln2_g_ref, ln2_b_ref,
                     fcw_ref, fcb_ref,
                     out_ref,
                     *, batch, seq):
    gb = NUM_HEADS * batch                        # (head, batch) attention groups
    scale = 1.0 / math.sqrt(HEAD_DIM)

    # Embedding LayerNorm (embeddings already summed by the wrapper).
    x = _layernorm(x_ref[...], emb_g_ref[...], emb_b_ref[...])      # (B, S, H) f32
    bias = bias_ref[...]                                            # (NH*B, 1, S), hoisted

    for l in range(NUM_LAYERS):
        # ---- head-batched QKV projection: one batched MXU dot per layer ----
        xb = x.astype(jnp.bfloat16)                                  # (B, S, H)
        xg = jnp.broadcast_to(xb[None], (3 * NUM_HEADS,) + xb.shape)
        xg = xg.reshape(3 * gb, seq, HIDDEN)                         # leading-dim merge only
        qkv = _bmm(xg, wqkv_ref[l], contract=((2,), (1,))) + bqkv_ref[l]  # (3*GB, S, HD) f32
        q = qkv[0 * gb:1 * gb].astype(jnp.bfloat16)                  # (GB, S, HD)
        k = qkv[1 * gb:2 * gb].astype(jnp.bfloat16)
        v = qkv[2 * gb:3 * gb].astype(jnp.bfloat16)

        # ---- attention batched over (head, batch): single softmax pass ----
        s = _bmm(q, k, contract=((2,), (2,))) * scale + bias          # (GB, S, S) f32, no k.T
        s = s - jnp.max(s, axis=-1, keepdims=True)
        p = jnp.exp(s)
        p = p * pl.reciprocal(jnp.sum(p, axis=-1, keepdims=True), approx=True)
        ctx = _bmm(p, v, contract=((2,), (1,)))                       # (GB, S, HD) f32

        # ---- output projection: batched per head, summed over heads ----
        attn = _bmm(ctx, wo_ref[l], contract=((2,), (1,)))            # (GB, S, H) f32
        attn = jnp.sum(attn.reshape(NUM_HEADS, batch, seq, HIDDEN), axis=0) + bo_ref[l]
        x = _layernorm(x + attn, ln1_g_ref[l], ln1_b_ref[l])

        # ---- feed-forward (weights carry a batch axis; rank-3 batched dots) ----
        h1 = _gelu(_bmm(x, w1_ref[l], contract=((2,), (1,))) + b1_ref[l])
        h2 = _bmm(h1, w2_ref[l], contract=((2,), (1,))) + b2_ref[l]
        x = _layernorm(x + h2, ln2_g_ref[l], ln2_b_ref[l])

    # ---- classifier on the CLS rows only; lane-dense (B, 1, 128) output ----
    cls = x[:, 0:1, :]                                                # (B, 1, H)
    out_ref[...] = (_bmm(cls, fcw_ref[...], contract=((2,), (1,)))
                    + fcb_ref[...]).astype(out_ref.dtype)


# ---------------- parameters (deterministic, synthetic) ----------------
def make_params(key):
    keys = jax.random.split(key, 3 + 6 * NUM_LAYERS + 1)
    ki = iter(keys)

    def nrm(shape):
        return 0.02 * jax.random.normal(next(ki), shape, jnp.float32)

    params = {
        "word_emb": nrm((VOCAB, HIDDEN)),
        "pos_emb": nrm((MAX_POS, HIDDEN)),
        "type_emb": nrm((TYPE_VOCAB, HIDDEN)),
        "emb_ln_g": jnp.ones((HIDDEN,), jnp.float32),
        "emb_ln_b": jnp.zeros((HIDDEN,), jnp.float32),
        "layers": [],
    }
    for _ in range(NUM_LAYERS):
        params["layers"].append({
            "wq": nrm((HIDDEN, HIDDEN)), "bq": jnp.zeros((HIDDEN,), jnp.float32),
            "wk": nrm((HIDDEN, HIDDEN)), "bk": jnp.zeros((HIDDEN,), jnp.float32),
            "wv": nrm((HIDDEN, HIDDEN)), "bv": jnp.zeros((HIDDEN,), jnp.float32),
            "wo": nrm((HIDDEN, HIDDEN)), "bo": jnp.zeros((HIDDEN,), jnp.float32),
            "ln1_g": jnp.ones((HIDDEN,), jnp.float32), "ln1_b": jnp.zeros((HIDDEN,), jnp.float32),
            "w1": nrm((HIDDEN, INTERMEDIATE)), "b1": jnp.zeros((INTERMEDIATE,), jnp.float32),
            "w2": nrm((INTERMEDIATE, HIDDEN)), "b2": jnp.zeros((HIDDEN,), jnp.float32),
            "ln2_g": jnp.ones((HIDDEN,), jnp.float32), "ln2_b": jnp.zeros((HIDDEN,), jnp.float32),
        })
    params["fc_w"] = nrm((HIDDEN, NUM_CLASSES))
    params["fc_b"] = jnp.zeros((NUM_CLASSES,), jnp.float32)
    return params


# ---------------- one-time weight packing (hoisted out of the jitted forward) ----------------
def prepare_params(params, batch=BATCH):
    """Pack weights into the head/batch-batched bf16 layouts the kernel consumes."""
    bf16 = jnp.bfloat16

    def cols_per_head(w):   # (H, H) -> (NH, H, HD)   output columns grouped per head
        return jnp.transpose(w.reshape(HIDDEN, NUM_HEADS, HEAD_DIM), (1, 0, 2))

    def rows_per_head(w):   # (H, H) -> (NH, HD, H)   input rows grouped per head
        return w.reshape(NUM_HEADS, HEAD_DIM, HIDDEN)

    wqkv, bqkv, wo, bo = [], [], [], []
    ln1g, ln1b, ln2g, ln2b = [], [], [], []
    w1, b1, w2, b2 = [], [], [], []
    for lyr in params["layers"]:
        w_g = jnp.concatenate([cols_per_head(lyr["wq"]),
                               cols_per_head(lyr["wk"]),
                               cols_per_head(lyr["wv"])], axis=0)        # (3NH, H, HD)
        b_g = jnp.concatenate([lyr["bq"], lyr["bk"], lyr["bv"]]
                              ).reshape(3 * NUM_HEADS, 1, HEAD_DIM)      # (3NH, 1, HD)
        # repeat over batch so the kernel's (g, b) -> g*B + b indexing holds
        wqkv.append(jnp.repeat(w_g, batch, axis=0).astype(bf16))         # (3NH*B, H, HD)
        bqkv.append(jnp.repeat(b_g, batch, axis=0))                      # (3NH*B, 1, HD)
        wo.append(jnp.repeat(rows_per_head(lyr["wo"]), batch, axis=0).astype(bf16))  # (NH*B, HD, H)
        bo.append(lyr["bo"].reshape(1, 1, HIDDEN))
        ln1g.append(lyr["ln1_g"].reshape(1, 1, HIDDEN))
        ln1b.append(lyr["ln1_b"].reshape(1, 1, HIDDEN))
        w1.append(jnp.broadcast_to(lyr["w1"][None], (batch, HIDDEN, INTERMEDIATE)).astype(bf16))
        b1.append(lyr["b1"].reshape(1, 1, INTERMEDIATE))
        w2.append(jnp.broadcast_to(lyr["w2"][None], (batch, INTERMEDIATE, HIDDEN)).astype(bf16))
        b2.append(lyr["b2"].reshape(1, 1, HIDDEN))
        ln2g.append(lyr["ln2_g"].reshape(1, 1, HIDDEN))
        ln2b.append(lyr["ln2_b"].reshape(1, 1, HIDDEN))

    fcw = jnp.zeros((HIDDEN, FC_PAD), jnp.float32).at[:, :NUM_CLASSES].set(params["fc_w"])
    fcw_b = jnp.broadcast_to(fcw[None], (batch, HIDDEN, FC_PAD)).astype(bf16)
    fcb = jnp.zeros((1, 1, FC_PAD), jnp.float32).at[0, 0, :NUM_CLASSES].set(params["fc_b"])

    return {
        "word_emb": params["word_emb"], "pos_emb": params["pos_emb"], "type_emb": params["type_emb"],
        "emb_ln_g": params["emb_ln_g"].reshape(1, 1, HIDDEN),
        "emb_ln_b": params["emb_ln_b"].reshape(1, 1, HIDDEN),
        "wqkv": jnp.stack(wqkv), "bqkv": jnp.stack(bqkv),
        "wo": jnp.stack(wo), "bo": jnp.stack(bo),
        "ln1_g": jnp.stack(ln1g), "ln1_b": jnp.stack(ln1b),
        "w1": jnp.stack(w1), "b1": jnp.stack(b1),
        "w2": jnp.stack(w2), "b2": jnp.stack(b2),
        "ln2_g": jnp.stack(ln2g), "ln2_b": jnp.stack(ln2b),
        "fcw": fcw_b, "fcb": fcb,
    }


# ---------------- forward (mirrors BertClassificationModel.forward) ----------------
def bert_classifier_forward(packed, input_ids, attention_mask):
    bsz, seq = input_ids.shape
    positions = jnp.arange(seq)

    # embedding gathers + sums are glue (plain JAX); shape (B, S, H)
    # TODO(synk): could be pulled in-kernel via scalar prefetch of input_ids.
    x = (packed["word_emb"][input_ids]
         + packed["pos_emb"][positions][None, :, :]
         + packed["type_emb"][0][None, None, :]).astype(jnp.float32)

    # additive attention-mask bias, broadcast once to the (head, batch) groups
    mb = (1.0 - attention_mask.astype(jnp.float32)) * (-1e9)             # (B, S)
    bias_g = jnp.broadcast_to(mb[:, None, :][None],
                              (NUM_HEADS, bsz, 1, seq)).reshape(NUM_HEADS * bsz, 1, seq)

    args = [x, bias_g,
            packed["emb_ln_g"], packed["emb_ln_b"],
            packed["wqkv"], packed["bqkv"], packed["wo"], packed["bo"],
            packed["ln1_g"], packed["ln1_b"],
            packed["w1"], packed["b1"], packed["w2"], packed["b2"],
            packed["ln2_g"], packed["ln2_b"],
            packed["fcw"], packed["fcb"]]

    in_specs = [pl.BlockSpec(a.shape, lambda *_, nd=a.ndim: (0,) * nd) for a in args]

    out = pl.pallas_call(
        functools.partial(_bert_fwd_kernel, batch=bsz, seq=seq),
        out_shape=jax.ShapeDtypeStruct((bsz, 1, FC_PAD), jnp.float32),
        grid=(1,),
        in_specs=in_specs,
        out_specs=pl.BlockSpec((bsz, 1, FC_PAD), lambda i: (0, 0, 0)),
        compiler_params=pltpu.CompilerParams(dimension_semantics=("arbitrary",)),
    )(*args)

    # self.dropout(...) with inplace=True is identity in eval mode.
    return out[:, 0, :NUM_CLASSES]


if __name__ == "__main__":
    key = jax.random.PRNGKey(0)
    pkey, ids_key = jax.random.split(key)
    params = make_params(pkey)
    packed = prepare_params(params)          # one-time weight packing, outside jit

    bsz, seq = BATCH, SEQ
    input_ids = jax.random.randint(ids_key, (bsz, seq), 0, VOCAB, dtype=jnp.int32)
    attention_mask = jnp.ones((bsz, seq), jnp.int32).at[1, 6:].set(0)  # pad last 2 tokens of sample 1

    batch_sentences = {"input_ids": input_ids, "attention_mask": attention_mask}

    forward = jax.jit(bert_classifier_forward)
    logits = forward(packed, batch_sentences["input_ids"],
                     batch_sentences["attention_mask"])
    logits = jax.block_until_ready(logits)
    assert logits.shape == (bsz, NUM_CLASSES)
    assert bool(jnp.all(jnp.isfinite(logits)))
    print("KERNEL_OK")
</pallas_src>

<mosaic_0001>
module attributes {stable_mosaic.version = 11 : i64} {
  func.func @_bert_fwd_kernel(%arg0: i32, %arg1: memref<2x8x32xf32, #tpu.memory_space<vmem>>, %arg2: memref<8x1x8xf32, #tpu.memory_space<vmem>>, %arg3: memref<1x1x32xf32, #tpu.memory_space<vmem>>, %arg4: memref<1x1x32xf32, #tpu.memory_space<vmem>>, %arg5: memref<2x24x32x8xbf16, #tpu.memory_space<vmem>>, %arg6: memref<2x24x1x8xf32, #tpu.memory_space<vmem>>, %arg7: memref<2x8x8x32xbf16, #tpu.memory_space<vmem>>, %arg8: memref<2x1x1x32xf32, #tpu.memory_space<vmem>>, %arg9: memref<2x1x1x32xf32, #tpu.memory_space<vmem>>, %arg10: memref<2x1x1x32xf32, #tpu.memory_space<vmem>>, %arg11: memref<2x2x32x64xbf16, #tpu.memory_space<vmem>>, %arg12: memref<2x1x1x64xf32, #tpu.memory_space<vmem>>, %arg13: memref<2x2x64x32xbf16, #tpu.memory_space<vmem>>, %arg14: memref<2x1x1x32xf32, #tpu.memory_space<vmem>>, %arg15: memref<2x1x1x32xf32, #tpu.memory_space<vmem>>, %arg16: memref<2x1x1x32xf32, #tpu.memory_space<vmem>>, %arg17: memref<2x32x128xbf16, #tpu.memory_space<vmem>>, %arg18: memref<1x1x128xf32, #tpu.memory_space<vmem>>, %arg19: memref<2x1x128xf32, #tpu.memory_space<vmem>>) attributes {dimension_semantics = [#tpu.dimension_semantics<arbitrary>], iteration_bounds = array<i64: 1>, scalar_prefetch = 0 : i64, scratch_operands = 0 : i64, tpu.core_type = #tpu.core_type<tc>, window_params = [{pipeline_mode = #tpu.pipeline_mode<synchronous>, transform_indices = @transform_0, window_bounds = array<i64: 2, 8, 32>}, {pipeline_mode = #tpu.pipeline_mode<synchronous>, transform_indices = @transform_1, window_bounds = array<i64: 8, 1, 8>}, {pipeline_mode = #tpu.pipeline_mode<synchronous>, transform_indices = @transform_2, window_bounds = array<i64: 1, 1, 32>}, {pipeline_mode = #tpu.pipeline_mode<synchronous>, transform_indices = @transform_3, window_bounds = array<i64: 1, 1, 32>}, {pipeline_mode = #tpu.pipeline_mode<synchronous>, transform_indices = @transform_4, window_bounds = array<i64: 2, 24, 32, 8>}, {pipeline_mode = #tpu.pipeline_mode<synchronous>, transform_indices = @transform_5, window_bounds = array<i64: 2, 24, 1, 8>}, {pipeline_mode = #tpu.pipeline_mode<synchronous>, transform_indices = @transform_6, window_bounds = array<i64: 2, 8, 8, 32>}, {pipeline_mode = #tpu.pipeline_mode<synchronous>, transform_indices = @transform_7, window_bounds = array<i64: 2, 1, 1, 32>}, {pipeline_mode = #tpu.pipeline_mode<synchronous>, transform_indices = @transform_8, window_bounds = array<i64: 2, 1, 1, 32>}, {pipeline_mode = #tpu.pipeline_mode<synchronous>, transform_indices = @transform_9, window_bounds = array<i64: 2, 1, 1, 32>}, {pipeline_mode = #tpu.pipeline_mode<synchronous>, transform_indices = @transform_10, window_bounds = array<i64: 2, 2, 32, 64>}, {pipeline_mode = #tpu.pipeline_mode<synchronous>, transform_indices = @transform_11, window_bounds = array<i64: 2, 1, 1, 64>}, {pipeline_mode = #tpu.pipeline_mode<synchronous>, transform_indices = @transform_12, window_bounds = array<i64: 2, 2, 64, 32>}, {pipeline_mode = #tpu.pipeline_mode<synchronous>, transform_indices = @transform_13, window_bounds = array<i64: 2, 1, 1, 32>}, {pipeline_mode = #tpu.pipeline_mode<synchronous>, transform_indices = @transform_14, window_bounds = array<i64: 2, 1, 1, 32>}, {pipeline_mode = #tpu.pipeline_mode<synchronous>, transform_indices = @transform_15, window_bounds = array<i64: 2, 1, 1, 32>}, {pipeline_mode = #tpu.pipeline_mode<synchronous>, transform_indices = @transform_16, window_bounds = array<i64: 2, 32, 128>}, {pipeline_mode = #tpu.pipeline_mode<synchronous>, transform_indices = @transform_17, window_bounds = array<i64: 1, 1, 128>}, {pipeline_mode = #tpu.pipeline_mode<synchronous>, transform_indices = @transform_18, window_bounds = array<i64: 2, 1, 128>}]} {
    %c0 = arith.constant 0 : index
    %c0_0 = arith.constant 0 : index
    %c0_1 = arith.constant 0 : index
    %0 = vector.load %arg1[%c0, %c0_0, %c0_1] : memref<2x8x32xf32, #tpu.memory_space<vmem>>, vector<2x8x32xf32>
    %c0_2 = arith.constant 0 : index
    %c0_3 = arith.constant 0 : index
    %c0_4 = arith.constant 0 : index
    %1 = vector.load %arg3[%c0_2, %c0_3, %c0_4] : memref<1x1x32xf32, #tpu.memory_space<vmem>>, vector<1x1x32xf32>
    %c0_5 = arith.constant 0 : index
    %c0_6 = arith.constant 0 : index
    %c0_7 = arith.constant 0 : index
    %2 = vector.load %arg4[%c0_5, %c0_6, %c0_7] : memref<1x1x32xf32, #tpu.memory_space<vmem>>, vector<1x1x32xf32>
    %cst = arith.constant dense<0.000000e+00> : vector<2x8xf32>
    %3 = vector.multi_reduction <add>, %0, %cst [2] : vector<2x8x32xf32> to vector<2x8xf32>
    %4 = vector.shape_cast %3 : vector<2x8xf32> to vector<2x8x1xf32>
    %cst_8 = arith.constant 3.200000e+01 : f32
    %5 = vector.broadcast %cst_8 : f32 to vector<2x8x1xf32>
    %6 = arith.divf %4, %5 : vector<2x8x1xf32>
    %7 = vector.broadcast %6 : vector<2x8x1xf32> to vector<2x8x32xf32>
    %8 = arith.subf %0, %7 : vector<2x8x32xf32>
    %9 = arith.mulf %8, %8 : vector<2x8x32xf32>
    %cst_9 = arith.constant dense<0.000000e+00> : vector<2x8xf32>
    %10 = vector.multi_reduction <add>, %9, %cst_9 [2] : vector<2x8x32xf32> to vector<2x8xf32>
    %11 = vector.shape_cast %10 : vector<2x8xf32> to vector<2x8x1xf32>
    %cst_10 = arith.constant 3.200000e+01 : f32
    %12 = vector.broadcast %cst_10 : f32 to vector<2x8x1xf32>
    %13 = arith.divf %11, %12 : vector<2x8x1xf32>
    %14 = vector.broadcast %6 : vector<2x8x1xf32> to vector<2x8x32xf32>
    %15 = arith.subf %0, %14 : vector<2x8x32xf32>
    %cst_11 = arith.constant 9.99999996E-13 : f32
    %16 = vector.broadcast %cst_11 : f32 to vector<2x8x1xf32>
    %17 = arith.addf %13, %16 : vector<2x8x1xf32>
    %18 = math.rsqrt %17 : vector<2x8x1xf32>
    %19 = vector.broadcast %18 : vector<2x8x1xf32> to vector<2x8x32xf32>
    %20 = arith.mulf %15, %19 : vector<2x8x32xf32>
    %21 = vector.broadcast %1 : vector<1x1x32xf32> to vector<2x8x32xf32>
    %22 = arith.mulf %20, %21 : vector<2x8x32xf32>
    %23 = vector.broadcast %2 : vector<1x1x32xf32> to vector<2x8x32xf32>
    %24 = arith.addf %22, %23 : vector<2x8x32xf32>
    %c0_12 = arith.constant 0 : index
    %c0_13 = arith.constant 0 : index
    %c0_14 = arith.constant 0 : index
    %25 = vector.load %arg2[%c0_12, %c0_13, %c0_14] : memref<8x1x8xf32, #tpu.memory_space<vmem>>, vector<8x1x8xf32>
    %26 = arith.truncf %24 : vector<2x8x32xf32> to vector<2x8x32xbf16>
    %27 = vector.shape_cast %26 : vector<2x8x32xbf16> to vector<1x2x8x32xbf16>
    %28 = vector.shape_cast %27 : vector<1x2x8x32xbf16> to vector<1x2x8x32xbf16>
    %29 = vector.broadcast %28 : vector<1x2x8x32xbf16> to vector<12x2x8x32xbf16>
    %30 = vector.shape_cast %29 : vector<12x2x8x32xbf16> to vector<24x8x32xbf16>
    %c0_15 = arith.constant 0 : index
    %c0_16 = arith.constant 0 : index
    %c0_17 = arith.constant 0 : index
    %c0_18 = arith.constant 0 : index
    %31 = vector.load %arg5[%c0_15, %c0_16, %c0_17, %c0_18] : memref<2x24x32x8xbf16, #tpu.memory_space<vmem>>, vector<1x24x32x8xbf16>
    %32 = vector.shape_cast %31 : vector<1x24x32x8xbf16> to vector<24x32x8xbf16>
    %cst_19 = arith.constant dense<0.000000e+00> : vector<24x8x8xf32>
    %33 = tpu.matmul %30, %32, %cst_19 {dimension_numbers = #tpu.dot_dimension_numbers<[2], [1], [1], [2], [0, 0, 0, 1, 1, 2], [0], [0]>} : vector<24x8x32xbf16>, vector<24x32x8xbf16>, vector<24x8x8xf32> -> vector<24x8x8xf32>
    %c0_20 = arith.constant 0 : index
    %c0_21 = arith.constant 0 : index
    %c0_22 = arith.constant 0 : index
    %c0_23 = arith.constant 0 : index
    %34 = vector.load %arg6[%c0_20, %c0_21, %c0_22, %c0_23] : memref<2x24x1x8xf32, #tpu.memory_space<vmem>>, vector<1x24x1x8xf32>
    %35 = vector.shape_cast %34 : vector<1x24x1x8xf32> to vector<24x1x8xf32>
    %36 = vector.broadcast %35 : vector<24x1x8xf32> to vector<24x8x8xf32>
    %37 = arith.addf %33, %36 : vector<24x8x8xf32>
    %38 = vector.extract_strided_slice %37 {offsets = [0, 0, 0], sizes = [8, 8, 8], strides = [1, 1, 1]} : vector<24x8x8xf32> to vector<8x8x8xf32>
    %39 = arith.truncf %38 : vector<8x8x8xf32> to vector<8x8x8xbf16>
    %40 = vector.extract_strided_slice %37 {offsets = [8, 0, 0], sizes = [8, 8, 8], strides = [1, 1, 1]} : vector<24x8x8xf32> to vector<8x8x8xf32>
    %41 = arith.truncf %40 : vector<8x8x8xf32> to vector<8x8x8xbf16>
    %42 = vector.extract_strided_slice %37 {offsets = [16, 0, 0], sizes = [8, 8, 8], strides = [1, 1, 1]} : vector<24x8x8xf32> to vector<8x8x8xf32>
    %43 = arith.truncf %42 : vector<8x8x8xf32> to vector<8x8x8xbf16>
    %cst_24 = arith.constant dense<0.000000e+00> : vector<8x8x8xf32>
    %44 = tpu.matmul %39, %41, %cst_24 {dimension_numbers = #tpu.dot_dimension_numbers<[2], [2], [1], [1], [0, 0, 0, 1, 1, 1], [0], [0]>} : vector<8x8x8xbf16>, vector<8x8x8xbf16>, vector<8x8x8xf32> -> vector<8x8x8xf32>
    %cst_25 = arith.constant 0.353553385 : f32
    %45 = vector.broadcast %cst_25 : f32 to vector<8x8x8xf32>
    %46 = arith.mulf %44, %45 : vector<8x8x8xf32>
    %47 = vector.broadcast %25 : vector<8x1x8xf32> to vector<8x8x8xf32>
    %48 = arith.addf %46, %47 : vector<8x8x8xf32>
    %cst_26 = arith.constant dense<0xFF800000> : vector<8x8xf32>
    %49 = vector.multi_reduction <maximumf>, %48, %cst_26 [2] : vector<8x8x8xf32> to vector<8x8xf32>
    %50 = vector.shape_cast %49 : vector<8x8xf32> to vector<8x8x1xf32>
    %51 = vector.broadcast %50 : vector<8x8x1xf32> to vector<8x8x8xf32>
    %52 = arith.subf %48, %51 : vector<8x8x8xf32>
    %53 = math.exp %52 : vector<8x8x8xf32>
    %cst_27 = arith.constant dense<0.000000e+00> : vector<8x8xf32>
    %54 = vector.multi_reduction <add>, %53, %cst_27 [2] : vector<8x8x8xf32> to vector<8x8xf32>
    %55 = vector.shape_cast %54 : vector<8x8xf32> to vector<8x8x1xf32>
    %56 = tpu.reciprocal %55 {approx = true} : vector<8x8x1xf32> -> vector<8x8x1xf32>
    %57 = vector.broadcast %56 : vector<8x8x1xf32> to vector<8x8x8xf32>
    %58 = arith.mulf %53, %57 : vector<8x8x8xf32>
    %59 = arith.truncf %58 : vector<8x8x8xf32> to vector<8x8x8xbf16>
    %cst_28 = arith.constant dense<0.000000e+00> : vector<8x8x8xf32>
    %60 = tpu.matmul %59, %43, %cst_28 {dimension_numbers = #tpu.dot_dimension_numbers<[2], [1], [1], [2], [0, 0, 0, 1, 1, 2], [0], [0]>} : vector<8x8x8xbf16>, vector<8x8x8xbf16>, vector<8x8x8xf32> -> vector<8x8x8xf32>
    %c0_29 = arith.constant 0 : index
    %c0_30 = arith.constant 0 : index
    %c0_31 = arith.constant 0 : index
    %c0_32 = arith.constant 0 : index
    %61 = vector.load %arg7[%c0_29, %c0_30, %c0_31, %c0_32] : memref<2x8x8x32xbf16, #tpu.memory_space<vmem>>, vector<1x8x8x32xbf16>
    %62 = vector.shape_cast %61 : vector<1x8x8x32xbf16> to vector<8x8x32xbf16>
    %63 = arith.truncf %60 : vector<8x8x8xf32> to vector<8x8x8xbf16>
    %cst_33 = arith.constant dense<0.000000e+00> : vector<8x8x32xf32>
    %64 = tpu.matmul %63, %62, %cst_33 {dimension_numbers = #tpu.dot_dimension_numbers<[2], [1], [1], [2], [0, 0, 0, 1, 1, 2], [0], [0]>} : vector<8x8x8xbf16>, vector<8x8x32xbf16>, vector<8x8x32xf32> -> vector<8x8x32xf32>
    %65 = vector.shape_cast %64 : vector<8x8x32xf32> to vector<4x2x8x32xf32>
    %cst_34 = arith.constant dense<0.000000e+00> : vector<2x8x32xf32>
    %66 = vector.multi_reduction <add>, %65, %cst_34 [0] : vector<4x2x8x32xf32> to vector<2x8x32xf32>
    %c0_35 = arith.constant 0 : index
    %c0_36 = arith.constant 0 : index
    %c0_37 = arith.constant 0 : index
    %c0_38 = arith.constant 0 : index
    %67 = vector.load %arg8[%c0_35, %c0_36, %c0_37, %c0_38] : memref<2x1x1x32xf32, #tpu.memory_space<vmem>>, vector<1x1x1x32xf32>
    %68 = vector.shape_cast %67 : vector<1x1x1x32xf32> to vector<1x1x32xf32>
    %69 = vector.broadcast %68 : vector<1x1x32xf32> to vector<2x8x32xf32>
    %70 = arith.addf %66, %69 : vector<2x8x32xf32>
    %71 = arith.addf %24, %70 : vector<2x8x32xf32>
    %c0_39 = arith.constant 0 : index
    %c0_40 = arith.constant 0 : index
    %c0_41 = arith.constant 0 : index
    %c0_42 = arith.constant 0 : index
    %72 = vector.load %arg9[%c0_39, %c0_40, %c0_41, %c0_42] : memref<2x1x1x32xf32, #tpu.memory_space<vmem>>, vector<1x1x1x32xf32>
    %73 = vector.shape_cast %72 : vector<1x1x1x32xf32> to vector<1x1x32xf32>
    %c0_43 = arith.constant 0 : index
    %c0_44 = arith.constant 0 : index
    %c0_45 = arith.constant 0 : index
    %c0_46 = arith.constant 0 : index
    %74 = vector.load %arg10[%c0_43, %c0_44, %c0_45, %c0_46] : memref<2x1x1x32xf32, #tpu.memory_space<vmem>>, vector<1x1x1x32xf32>
    %75 = vector.shape_cast %74 : vector<1x1x1x32xf32> to vector<1x1x32xf32>
    %cst_47 = arith.constant dense<0.000000e+00> : vector<2x8xf32>
    %76 = vector.multi_reduction <add>, %71, %cst_47 [2] : vector<2x8x32xf32> to vector<2x8xf32>
    %77 = vector.shape_cast %76 : vector<2x8xf32> to vector<2x8x1xf32>
    %cst_48 = arith.constant 3.200000e+01 : f32
    %78 = vector.broadcast %cst_48 : f32 to vector<2x8x1xf32>
    %79 = arith.divf %77, %78 : vector<2x8x1xf32>
    %80 = vector.broadcast %79 : vector<2x8x1xf32> to vector<2x8x32xf32>
    %81 = arith.subf %71, %80 : vector<2x8x32xf32>
    %82 = arith.mulf %81, %81 : vector<2x8x32xf32>
    %cst_49 = arith.constant dense<0.000000e+00> : vector<2x8xf32>
    %83 = vector.multi_reduction <add>, %82, %cst_49 [2] : vector<2x8x32xf32> to vector<2x8xf32>
    %84 = vector.shape_cast %83 : vector<2x8xf32> to vector<2x8x1xf32>
    %cst_50 = arith.constant 3.200000e+01 : f32
    %85 = vector.broadcast %cst_50 : f32 to vector<2x8x1xf32>
    %86 = arith.divf %84, %85 : vector<2x8x1xf32>
    %87 = vector.broadcast %79 : vector<2x8x1xf32> to vector<2x8x32xf32>
    %88 = arith.subf %71, %87 : vector<2x8x32xf32>
    %cst_51 = arith.constant 9.99999996E-13 : f32
    %89 = vector.broadcast %cst_51 : f32 to vector<2x8x1xf32>
    %90 = arith.addf %86, %89 : vector<2x8x1xf32>
    %91 = math.rsqrt %90 : vector<2x8x1xf32>
    %92 = vector.broadcast %91 : vector<2x8x1xf32> to vector<2x8x32xf32>
    %93 = arith.mulf %88, %92 : vector<2x8x32xf32>
    %94 = vector.broadcast %73 : vector<1x1x32xf32> to vector<2x8x32xf32>
    %95 = arith.mulf %93, %94 : vector<2x8x32xf32>
    %96 = vector.broadcast %75 : vector<1x1x32xf32> to vector<2x8x32xf32>
    %97 = arith.addf %95, %96 : vector<2x8x32xf32>
    %c0_52 = arith.constant 0 : index
    %c0_53 = arith.constant 0 : index
    %c0_54 = arith.constant 0 : index
    %c0_55 = arith.constant 0 : index
    %98 = vector.load %arg11[%c0_52, %c0_53, %c0_54, %c0_55] : memref<2x2x32x64xbf16, #tpu.memory_space<vmem>>, vector<1x2x32x64xbf16>
    %99 = vector.shape_cast %98 : vector<1x2x32x64xbf16> to vector<2x32x64xbf16>
    %100 = arith.truncf %97 : vector<2x8x32xf32> to vector<2x8x32xbf16>
    %cst_56 = arith.constant dense<0.000000e+00> : vector<2x8x64xf32>
    %101 = tpu.matmul %100, %99, %cst_56 {dimension_numbers = #tpu.dot_dimension_numbers<[2], [1], [1], [2], [0, 0, 0, 1, 1, 2], [0], [0]>} : vector<2x8x32xbf16>, vector<2x32x64xbf16>, vector<2x8x64xf32> -> vector<2x8x64xf32>
    %c0_57 = arith.constant 0 : index
    %c0_58 = arith.constant 0 : index
    %c0_59 = arith.constant 0 : index
    %c0_60 = arith.constant 0 : index
    %102 = vector.load %arg12[%c0_57, %c0_58, %c0_59, %c0_60] : memref<2x1x1x64xf32, #tpu.memory_space<vmem>>, vector<1x1x1x64xf32>
    %103 = vector.shape_cast %102 : vector<1x1x1x64xf32> to vector<1x1x64xf32>
    %104 = vector.broadcast %103 : vector<1x1x64xf32> to vector<2x8x64xf32>
    %105 = arith.addf %101, %104 : vector<2x8x64xf32>
    %cst_61 = arith.constant 5.000000e-01 : f32
    %106 = vector.broadcast %cst_61 : f32 to vector<2x8x64xf32>
    %107 = arith.mulf %106, %105 : vector<2x8x64xf32>
    %cst_62 = arith.constant 4.471500e-02 : f32
    %108 = vector.broadcast %cst_62 : f32 to vector<2x8x64xf32>
    %109 = arith.mulf %108, %105 : vector<2x8x64xf32>
    %110 = arith.mulf %109, %105 : vector<2x8x64xf32>
    %111 = arith.mulf %110, %105 : vector<2x8x64xf32>
    %112 = arith.addf %105, %111 : vector<2x8x64xf32>
    %cst_63 = arith.constant 0.797884583 : f32
    %113 = vector.broadcast %cst_63 : f32 to vector<2x8x64xf32>
    %114 = arith.mulf %113, %112 : vector<2x8x64xf32>
    %115 = math.tanh %114 : vector<2x8x64xf32>
    %cst_64 = arith.constant 1.000000e+00 : f32
    %116 = vector.broadcast %cst_64 : f32 to vector<2x8x64xf32>
    %117 = arith.addf %116, %115 : vector<2x8x64xf32>
    %118 = arith.mulf %107, %117 : vector<2x8x64xf32>
    %c0_65 = arith.constant 0 : index
    %c0_66 = arith.constant 0 : index
    %c0_67 = arith.constant 0 : index
    %c0_68 = arith.constant 0 : index
    %119 = vector.load %arg13[%c0_65, %c0_66, %c0_67, %c0_68] : memref<2x2x64x32xbf16, #tpu.memory_space<vmem>>, vector<1x2x64x32xbf16>
    %120 = vector.shape_cast %119 : vector<1x2x64x32xbf16> to vector<2x64x32xbf16>
    %121 = arith.truncf %118 : vector<2x8x64xf32> to vector<2x8x64xbf16>
    %cst_69 = arith.constant dense<0.000000e+00> : vector<2x8x32xf32>
    %122 = tpu.matmul %121, %120, %cst_69 {dimension_numbers = #tpu.dot_dimension_numbers<[2], [1], [1], [2], [0, 0, 0, 1, 1, 2], [0], [0]>} : vector<2x8x64xbf16>, vector<2x64x32xbf16>, vector<2x8x32xf32> -> vector<2x8x32xf32>
    %c0_70 = arith.constant 0 : index
    %c0_71 = arith.constant 0 : index
    %c0_72 = arith.constant 0 : index
    %c0_73 = arith.constant 0 : index
    %123 = vector.load %arg14[%c0_70, %c0_71, %c0_72, %c0_73] : memref<2x1x1x32xf32, #tpu.memory_space<vmem>>, vector<1x1x1x32xf32>
    %124 = vector.shape_cast %123 : vector<1x1x1x32xf32> to vector<1x1x32xf32>
    %125 = vector.broadcast %124 : vector<1x1x32xf32> to vector<2x8x32xf32>
    %126 = arith.addf %122, %125 : vector<2x8x32xf32>
    %127 = arith.addf %97, %126 : vector<2x8x32xf32>
    %c0_74 = arith.constant 0 : index
    %c0_75 = arith.constant 0 : index
    %c0_76 = arith.constant 0 : index
    %c0_77 = arith.constant 0 : index
    %128 = vector.load %arg15[%c0_74, %c0_75, %c0_76, %c0_77] : memref<2x1x1x32xf32, #tpu.memory_space<vmem>>, vector<1x1x1x32xf32>
    %129 = vector.shape_cast %128 : vector<1x1x1x32xf32> to vector<1x1x32xf32>
    %c0_78 = arith.constant 0 : index
    %c0_79 = arith.constant 0 : index
    %c0_80 = arith.constant 0 : index
    %c0_81 = arith.constant 0 : index
    %130 = vector.load %arg16[%c0_78, %c0_79, %c0_80, %c0_81] : memref<2x1x1x32xf32, #tpu.memory_space<vmem>>, vector<1x1x1x32xf32>
    %131 = vector.shape_cast %130 : vector<1x1x1x32xf32> to vector<1x1x32xf32>
    %cst_82 = arith.constant dense<0.000000e+00> : vector<2x8xf32>
    %132 = vector.multi_reduction <add>, %127, %cst_82 [2] : vector<2x8x32xf32> to vector<2x8xf32>
    %133 = vector.shape_cast %132 : vector<2x8xf32> to vector<2x8x1xf32>
    %cst_83 = arith.constant 3.200000e+01 : f32
    %134 = vector.broadcast %cst_83 : f32 to vector<2x8x1xf32>
    %135 = arith.divf %133, %134 : vector<2x8x1xf32>
    %136 = vector.broadcast %135 : vector<2x8x1xf32> to vector<2x8x32xf32>
    %137 = arith.subf %127, %136 : vector<2x8x32xf32>
    %138 = arith.mulf %137, %137 : vector<2x8x32xf32>
    %cst_84 = arith.constant dense<0.000000e+00> : vector<2x8xf32>
    %139 = vector.multi_reduction <add>, %138, %cst_84 [2] : vector<2x8x32xf32> to vector<2x8xf32>
    %140 = vector.shape_cast %139 : vector<2x8xf32> to vector<2x8x1xf32>
    %cst_85 = arith.constant 3.200000e+01 : f32
    %141 = vector.broadcast %cst_85 : f32 to vector<2x8x1xf32>
    %142 = arith.divf %140, %141 : vector<2x8x1xf32>
    %143 = vector.broadcast %135 : vector<2x8x1xf32> to vector<2x8x32xf32>
    %144 = arith.subf %127, %143 : vector<2x8x32xf32>
    %cst_86 = arith.constant 9.99999996E-13 : f32
    %145 = vector.broadcast %cst_86 : f32 to vector<2x8x1xf32>
    %146 = arith.addf %142, %145 : vector<2x8x1xf32>
    %147 = math.rsqrt %146 : vector<2x8x1xf32>
    %148 = vector.broadcast %147 : vector<2x8x1xf32> to vector<2x8x32xf32>
    %149 = arith.mulf %144, %148 : vector<2x8x32xf32>
    %150 = vector.broadcast %129 : vector<1x1x32xf32> to vector<2x8x32xf32>
    %151 = arith.mulf %149, %150 : vector<2x8x32xf32>
    %152 = vector.broadcast %131 : vector<1x1x32xf32> to vector<2x8x32xf32>
    %153 = arith.addf %151, %152 : vector<2x8x32xf32>
    %154 = arith.truncf %153 : vector<2x8x32xf32> to vector<2x8x32xbf16>
    %155 = vector.shape_cast %154 : vector<2x8x32xbf16> to vector<1x2x8x32xbf16>
    %156 = vector.shape_cast %155 : vector<1x2x8x32xbf16> to vector<1x2x8x32xbf16>
    %157 = vector.broadcast %156 : vector<1x2x8x32xbf16> to vector<12x2x8x32xbf16>
    %158 = vector.shape_cast %157 : vector<12x2x8x32xbf16> to vector<24x8x32xbf16>
    %c1 = arith.constant 1 : index
    %c0_87 = arith.constant 0 : index
    %c0_88 = arith.constant 0 : index
    %c0_89 = arith.constant 0 : index
    %159 = vector.load %arg5[%c1, %c0_87, %c0_88, %c0_89] : memref<2x24x32x8xbf16, #tpu.memory_space<vmem>>, vector<1x24x32x8xbf16>
    %160 = vector.shape_cast %159 : vector<1x24x32x8xbf16> to vector<24x32x8xbf16>
    %cst_90 = arith.constant dense<0.000000e+00> : vector<24x8x8xf32>
    %161 = tpu.matmul %158, %160, %cst_90 {dimension_numbers = #tpu.dot_dimension_numbers<[2], [1], [1], [2], [0, 0, 0, 1, 1, 2], [0], [0]>} : vector<24x8x32xbf16>, vector<24x32x8xbf16>, vector<24x8x8xf32> -> vector<24x8x8xf32>
    %c1_91 = arith.constant 1 : index
    %c0_92 = arith.constant 0 : index
    %c0_93 = arith.constant 0 : index
    %c0_94 = arith.constant 0 : index
    %162 = vector.load %arg6[%c1_91, %c0_92, %c0_93, %c0_94] : memref<2x24x1x8xf32, #tpu.memory_space<vmem>>, vector<1x24x1x8xf32>
    %163 = vector.shape_cast %162 : vector<1x24x1x8xf32> to vector<24x1x8xf32>
    %164 = vector.broadcast %163 : vector<24x1x8xf32> to vector<24x8x8xf32>
    %165 = arith.addf %161, %164 : vector<24x8x8xf32>
    %166 = vector.extract_strided_slice %165 {offsets = [0, 0, 0], sizes = [8, 8, 8], strides = [1, 1, 1]} : vector<24x8x8xf32> to vector<8x8x8xf32>
    %167 = arith.truncf %166 : vector<8x8x8xf32> to vector<8x8x8xbf16>
    %168 = vector.extract_strided_slice %165 {offsets = [8, 0, 0], sizes = [8, 8, 8], strides = [1, 1, 1]} : vector<24x8x8xf32> to vector<8x8x8xf32>
    %169 = arith.truncf %168 : vector<8x8x8xf32> to vector<8x8x8xbf16>
    %170 = vector.extract_strided_slice %165 {offsets = [16, 0, 0], sizes = [8, 8, 8], strides = [1, 1, 1]} : vector<24x8x8xf32> to vector<8x8x8xf32>
    %171 = arith.truncf %170 : vector<8x8x8xf32> to vector<8x8x8xbf16>
    %cst_95 = arith.constant dense<0.000000e+00> : vector<8x8x8xf32>
    %172 = tpu.matmul %167, %169, %cst_95 {dimension_numbers = #tpu.dot_dimension_numbers<[2], [2], [1], [1], [0, 0, 0, 1, 1, 1], [0], [0]>} : vector<8x8x8xbf16>, vector<8x8x8xbf16>, vector<8x8x8xf32> -> vector<8x8x8xf32>
    %cst_96 = arith.constant 0.353553385 : f32
    %173 = vector.broadcast %cst_96 : f32 to vector<8x8x8xf32>
    %174 = arith.mulf %172, %173 : vector<8x8x8xf32>
    %175 = vector.broadcast %25 : vector<8x1x8xf32> to vector<8x8x8xf32>
    %176 = arith.addf %174, %175 : vector<8x8x8xf32>
    %cst_97 = arith.constant dense<0xFF800000> : vector<8x8xf32>
    %177 = vector.multi_reduction <maximumf>, %176, %cst_97 [2] : vector<8x8x8xf32> to vector<8x8xf32>
    %178 = vector.shape_cast %177 : vector<8x8xf32> to vector<8x8x1xf32>
    %179 = vector.broadcast %178 : vector<8x8x1xf32> to vector<8x8x8xf32>
    %180 = arith.subf %176, %179 : vector<8x8x8xf32>
    %181 = math.exp %180 : vector<8x8x8xf32>
    %cst_98 = arith.constant dense<0.000000e+00> : vector<8x8xf32>
    %182 = vector.multi_reduction <add>, %181, %cst_98 [2] : vector<8x8x8xf32> to vector<8x8xf32>
    %183 = vector.shape_cast %182 : vector<8x8xf32> to vector<8x8x1xf32>
    %184 = tpu.reciprocal %183 {approx = true} : vector<8x8x1xf32> -> vector<8x8x1xf32>
    %185 = vector.broadcast %184 : vector<8x8x1xf32> to vector<8x8x8xf32>
    %186 = arith.mulf %181, %185 : vector<8x8x8xf32>
    %187 = arith.truncf %186 : vector<8x8x8xf32> to vector<8x8x8xbf16>
    %cst_99 = arith.constant dense<0.000000e+00> : vector<8x8x8xf32>
    %188 = tpu.matmul %187, %171, %cst_99 {dimension_numbers = #tpu.dot_dimension_numbers<[2], [1], [1], [2], [0, 0, 0, 1, 1, 2], [0], [0]>} : vector<8x8x8xbf16>, vector<8x8x8xbf16>, vector<8x8x8xf32> -> vector<8x8x8xf32>
    %c1_100 = arith.constant 1 : index
    %c0_101 = arith.constant 0 : index
    %c0_102 = arith.constant 0 : index
    %c0_103 = arith.constant 0 : index
    %189 = vector.load %arg7[%c1_100, %c0_101, %c0_102, %c0_103] : memref<2x8x8x32xbf16, #tpu.memory_space<vmem>>, vector<1x8x8x32xbf16>
    %190 = vector.shape_cast %189 : vector<1x8x8x32xbf16> to vector<8x8x32xbf16>
    %191 = arith.truncf %188 : vector<8x8x8xf32> to vector<8x8x8xbf16>
    %cst_104 = arith.constant dense<0.000000e+00> : vector<8x8x32xf32>
    %192 = tpu.matmul %191, %190, %cst_104 {dimension_numbers = #tpu.dot_dimension_numbers<[2], [1], [1], [2], [0, 0, 0, 1, 1, 2], [0], [0]>} : vector<8x8x8xbf16>, vector<8x8x32xbf16>, vector<8x8x32xf32> -> vector<8x8x32xf32>
    %193 = vector.shape_cast %192 : vector<8x8x32xf32> to vector<4x2x8x32xf32>
    %cst_105 = arith.constant dense<0.000000e+00> : vector<2x8x32xf32>
    %194 = vector.multi_reduction <add>, %193, %cst_105 [0] : vector<4x2x8x32xf32> to vector<2x8x32xf32>
    %c1_106 = arith.constant 1 : index
    %c0_107 = arith.constant 0 : index
    %c0_108 = arith.constant 0 : index
    %c0_109 = arith.constant 0 : index
    %195 = vector.load %arg8[%c1_106, %c0_107, %c0_108, %c0_109] : memref<2x1x1x32xf32, #tpu.memory_space<vmem>>, vector<1x1x1x32xf32>
    %196 = vector.shape_cast %195 : vector<1x1x1x32xf32> to vector<1x1x32xf32>
    %197 = vector.broadcast %196 : vector<1x1x32xf32> to vector<2x8x32xf32>
    %198 = arith.addf %194, %197 : vector<2x8x32xf32>
    %199 = arith.addf %153, %198 : vector<2x8x32xf32>
    %c1_110 = arith.constant 1 : index
    %c0_111 = arith.constant 0 : index
    %c0_112 = arith.constant 0 : index
    %c0_113 = arith.constant 0 : index
    %200 = vector.load %arg9[%c1_110, %c0_111, %c0_112, %c0_113] : memref<2x1x1x32xf32, #tpu.memory_space<vmem>>, vector<1x1x1x32xf32>
    %201 = vector.shape_cast %200 : vector<1x1x1x32xf32> to vector<1x1x32xf32>
    %c1_114 = arith.constant 1 : index
    %c0_115 = arith.constant 0 : index
    %c0_116 = arith.constant 0 : index
    %c0_117 = arith.constant 0 : index
    %202 = vector.load %arg10[%c1_114, %c0_115, %c0_116, %c0_117] : memref<2x1x1x32xf32, #tpu.memory_space<vmem>>, vector<1x1x1x32xf32>
    %203 = vector.shape_cast %202 : vector<1x1x1x32xf32> to vector<1x1x32xf32>
    %cst_118 = arith.constant dense<0.000000e+00> : vector<2x8xf32>
    %204 = vector.multi_reduction <add>, %199, %cst_118 [2] : vector<2x8x32xf32> to vector<2x8xf32>
    %205 = vector.shape_cast %204 : vector<2x8xf32> to vector<2x8x1xf32>
    %cst_119 = arith.constant 3.200000e+01 : f32
    %206 = vector.broadcast %cst_119 : f32 to vector<2x8x1xf32>
    %207 = arith.divf %205, %206 : vector<2x8x1xf32>
    %208 = vector.broadcast %207 : vector<2x8x1xf32> to vector<2x8x32xf32>
    %209 = arith.subf %199, %208 : vector<2x8x32xf32>
    %210 = arith.mulf %209, %209 : vector<2x8x32xf32>
    %cst_120 = arith.constant dense<0.000000e+00> : vector<2x8xf32>
    %211 = vector.multi_reduction <add>, %210, %cst_120 [2] : vector<2x8x32xf32> to vector<2x8xf32>
    %212 = vector.shape_cast %211 : vector<2x8xf32> to vector<2x8x1xf32>
    %cst_121 = arith.constant 3.200000e+01 : f32
    %213 = vector.broadcast %cst_121 : f32 to vector<2x8x1xf32>
    %214 = arith.divf %212, %213 : vector<2x8x1xf32>
    %215 = vector.broadcast %207 : vector<2x8x1xf32> to vector<2x8x32xf32>
    %216 = arith.subf %199, %215 : vector<2x8x32xf32>
    %cst_122 = arith.constant 9.99999996E-13 : f32
    %217 = vector.broadcast %cst_122 : f32 to vector<2x8x1xf32>
    %218 = arith.addf %214, %217 : vector<2x8x1xf32>
    %219 = math.rsqrt %218 : vector<2x8x1xf32>
    %220 = vector.broadcast %219 : vector<2x8x1xf32> to vector<2x8x32xf32>
    %221 = arith.mulf %216, %220 : vector<2x8x32xf32>
    %222 = vector.broadcast %201 : vector<1x1x32xf32> to vector<2x8x32xf32>
    %223 = arith.mulf %221, %222 : vector<2x8x32xf32>
    %224 = vector.broadcast %203 : vector<1x1x32xf32> to vector<2x8x32xf32>
    %225 = arith.addf %223, %224 : vector<2x8x32xf32>
    %c1_123 = arith.constant 1 : index
    %c0_124 = arith.constant 0 : index
    %c0_125 = arith.constant 0 : index
    %c0_126 = arith.constant 0 : index
    %226 = vector.load %arg11[%c1_123, %c0_124, %c0_125, %c0_126] : memref<2x2x32x64xbf16, #tpu.memory_space<vmem>>, vector<1x2x32x64xbf16>
    %227 = vector.shape_cast %226 : vector<1x2x32x64xbf16> to vector<2x32x64xbf16>
    %228 = arith.truncf %225 : vector<2x8x32xf32> to vector<2x8x32xbf16>
    %cst_127 = arith.constant dense<0.000000e+00> : vector<2x8x64xf32>
    %229 = tpu.matmul %228, %227, %cst_127 {dimension_numbers = #tpu.dot_dimension_numbers<[2], [1], [1], [2], [0, 0, 0, 1, 1, 2], [0], [0]>} : vector<2x8x32xbf16>, vector<2x32x64xbf16>, vector<2x8x64xf32> -> vector<2x8x64xf32>
    %c1_128 = arith.constant 1 : index
    %c0_129 = arith.constant 0 : index
    %c0_130 = arith.constant 0 : index
    %c0_131 = arith.constant 0 : index
    %230 = vector.load %arg12[%c1_128, %c0_129, %c0_130, %c0_131] : memref<2x1x1x64xf32, #tpu.memory_space<vmem>>, vector<1x1x1x64xf32>
    %231 = vector.shape_cast %230 : vector<1x1x1x64xf32> to vector<1x1x64xf32>
    %232 = vector.broadcast %231 : vector<1x1x64xf32> to vector<2x8x64xf32>
    %233 = arith.addf %229, %232 : vector<2x8x64xf32>
    %cst_132 = arith.constant 5.000000e-01 : f32
    %234 = vector.broadcast %cst_132 : f32 to vector<2x8x64xf32>
    %235 = arith.mulf %234, %233 : vector<2x8x64xf32>
    %cst_133 = arith.constant 4.471500e-02 : f32
    %236 = vector.broadcast %cst_133 : f32 to vector<2x8x64xf32>
    %237 = arith.mulf %236, %233 : vector<2x8x64xf32>
    %238 = arith.mulf %237, %233 : vector<2x8x64xf32>
    %239 = arith.mulf %238, %233 : vector<2x8x64xf32>
    %240 = arith.addf %233, %239 : vector<2x8x64xf32>
    %cst_134 = arith.constant 0.797884583 : f32
    %241 = vector.broadcast %cst_134 : f32 to vector<2x8x64xf32>
    %242 = arith.mulf %241, %240 : vector<2x8x64xf32>
    %243 = math.tanh %242 : vector<2x8x64xf32>
    %cst_135 = arith.constant 1.000000e+00 : f32
    %244 = vector.broadcast %cst_135 : f32 to vector<2x8x64xf32>
    %245 = arith.addf %244, %243 : vector<2x8x64xf32>
    %246 = arith.mulf %235, %245 : vector<2x8x64xf32>
    %c1_136 = arith.constant 1 : index
    %c0_137 = arith.constant 0 : index
    %c0_138 = arith.constant 0 : index
    %c0_139 = arith.constant 0 : index
    %247 = vector.load %arg13[%c1_136, %c0_137, %c0_138, %c0_139] : memref<2x2x64x32xbf16, #tpu.memory_space<vmem>>, vector<1x2x64x32xbf16>
    %248 = vector.shape_cast %247 : vector<1x2x64x32xbf16> to vector<2x64x32xbf16>
    %249 = arith.truncf %246 : vector<2x8x64xf32> to vector<2x8x64xbf16>
    %cst_140 = arith.constant dense<0.000000e+00> : vector<2x8x32xf32>
    %250 = tpu.matmul %249, %248, %cst_140 {dimension_numbers = #tpu.dot_dimension_numbers<[2], [1], [1], [2], [0, 0, 0, 1, 1, 2], [0], [0]>} : vector<2x8x64xbf16>, vector<2x64x32xbf16>, vector<2x8x32xf32> -> vector<2x8x32xf32>
    %c1_141 = arith.constant 1 : index
    %c0_142 = arith.constant 0 : index
    %c0_143 = arith.constant 0 : index
    %c0_144 = arith.constant 0 : index
    %251 = vector.load %arg14[%c1_141, %c0_142, %c0_143, %c0_144] : memref<2x1x1x32xf32, #tpu.memory_space<vmem>>, vector<1x1x1x32xf32>
    %252 = vector.shape_cast %251 : vector<1x1x1x32xf32> to vector<1x1x32xf32>
    %253 = vector.broadcast %252 : vector<1x1x32xf32> to vector<2x8x32xf32>
    %254 = arith.addf %250, %253 : vector<2x8x32xf32>
    %255 = arith.addf %225, %254 : vector<2x8x32xf32>
    %c1_145 = arith.constant 1 : index
    %c0_146 = arith.constant 0 : index
    %c0_147 = arith.constant 0 : index
    %c0_148 = arith.constant 0 : index
    %256 = vector.load %arg15[%c1_145, %c0_146, %c0_147, %c0_148] : memref<2x1x1x32xf32, #tpu.memory_space<vmem>>, vector<1x1x1x32xf32>
    %257 = vector.shape_cast %256 : vector<1x1x1x32xf32> to vector<1x1x32xf32>
    %c1_149 = arith.constant 1 : index
    %c0_150 = arith.constant 0 : index
    %c0_151 = arith.constant 0 : index
    %c0_152 = arith.constant 0 : index
    %258 = vector.load %arg16[%c1_149, %c0_150, %c0_151, %c0_152] : memref<2x1x1x32xf32, #tpu.memory_space<vmem>>, vector<1x1x1x32xf32>
    %259 = vector.shape_cast %258 : vector<1x1x1x32xf32> to vector<1x1x32xf32>
    %cst_153 = arith.constant dense<0.000000e+00> : vector<2x8xf32>
    %260 = vector.multi_reduction <add>, %255, %cst_153 [2] : vector<2x8x32xf32> to vector<2x8xf32>
    %261 = vector.shape_cast %260 : vector<2x8xf32> to vector<2x8x1xf32>
    %cst_154 = arith.constant 3.200000e+01 : f32
    %262 = vector.broadcast %cst_154 : f32 to vector<2x8x1xf32>
    %263 = arith.divf %261, %262 : vector<2x8x1xf32>
    %264 = vector.broadcast %263 : vector<2x8x1xf32> to vector<2x8x32xf32>
    %265 = arith.subf %255, %264 : vector<2x8x32xf32>
    %266 = arith.mulf %265, %265 : vector<2x8x32xf32>
    %cst_155 = arith.constant dense<0.000000e+00> : vector<2x8xf32>
    %267 = vector.multi_reduction <add>, %266, %cst_155 [2] : vector<2x8x32xf32> to vector<2x8xf32>
    %268 = vector.shape_cast %267 : vector<2x8xf32> to vector<2x8x1xf32>
    %cst_156 = arith.constant 3.200000e+01 : f32
    %269 = vector.broadcast %cst_156 : f32 to vector<2x8x1xf32>
    %270 = arith.divf %268, %269 : vector<2x8x1xf32>
    %271 = vector.broadcast %263 : vector<2x8x1xf32> to vector<2x8x32xf32>
    %272 = arith.subf %255, %271 : vector<2x8x32xf32>
    %cst_157 = arith.constant 9.99999996E-13 : f32
    %273 = vector.broadcast %cst_157 : f32 to vector<2x8x1xf32>
    %274 = arith.addf %270, %273 : vector<2x8x1xf32>
    %275 = math.rsqrt %274 : vector<2x8x1xf32>
    %276 = vector.broadcast %275 : vector<2x8x1xf32> to vector<2x8x32xf32>
    %277 = arith.mulf %272, %276 : vector<2x8x32xf32>
    %278 = vector.broadcast %257 : vector<1x1x32xf32> to vector<2x8x32xf32>
    %279 = arith.mulf %277, %278 : vector<2x8x32xf32>
    %280 = vector.broadcast %259 : vector<1x1x32xf32> to vector<2x8x32xf32>
    %281 = arith.addf %279, %280 : vector<2x8x32xf32>
    %282 = vector.extract_strided_slice %281 {offsets = [0, 0, 0], sizes = [2, 1, 32], strides = [1, 1, 1]} : vector<2x8x32xf32> to vector<2x1x32xf32>
    %c0_158 = arith.constant 0 : index
    %c0_159 = arith.constant 0 : index
    %c0_160 = arith.constant 0 : index
    %283 = vector.load %arg17[%c0_158, %c0_159, %c0_160] : memref<2x32x128xbf16, #tpu.memory_space<vmem>>, vector<2x32x128xbf16>
    %284 = arith.truncf %282 : vector<2x1x32xf32> to vector<2x1x32xbf16>
    %cst_161 = arith.constant dense<0.000000e+00> : vector<2x1x128xf32>
    %285 = tpu.matmul %284, %283, %cst_161 {dimension_numbers = #tpu.dot_dimension_numbers<[2], [1], [1], [2], [0, 0, 0, 1, 1, 2], [0], [0]>} : vector<2x1x32xbf16>, vector<2x32x128xbf16>, vector<2x1x128xf32> -> vector<2x1x128xf32>
    %c0_162 = arith.constant 0 : index
    %c0_163 = arith.constant 0 : index
    %c0_164 = arith.constant 0 : index
    %286 = vector.load %arg18[%c0_162, %c0_163, %c0_164] : memref<1x1x128xf32, #tpu.memory_space<vmem>>, vector<1x1x128xf32>
    %287 = vector.broadcast %286 : vector<1x1x128xf32> to vector<2x1x128xf32>
    %288 = arith.addf %285, %287 : vector<2x1x128xf32>
    %c0_165 = arith.constant 0 : index
    %c0_166 = arith.constant 0 : index
    %c0_167 = arith.constant 0 : index
    %289 = vector.load %arg19[%c0_165, %c0_166, %c0_167] : memref<2x1x128xf32, #tpu.memory_space<vmem>>, vector<2x1x128xf32>
    tpu.vector_store %arg19[%c0_165, %c0_166, %c0_167], %288 {strides = array<i32>} : memref<2x1x128xf32, #tpu.memory_space<vmem>>, vector<2x1x128xf32>,
    return
  }
  func.func @transform_0(%arg0: i32) -> (i32, i32, i32) {
    %c0_i32 = arith.constant 0 : i32
    %c0_i32_0 = arith.constant 0 : i32
    %c0_i32_1 = arith.constant 0 : i32
    %c0_i32_2 = arith.constant 0 : i32
    return %c0_i32, %c0_i32_0, %c0_i32_1 : i32, i32, i32
  }
  func.func @transform_1(%arg0: i32) -> (i32, i32, i32) {
    %c0_i32 = arith.constant 0 : i32
    %c0_i32_0 = arith.constant 0 : i32
    %c0_i32_1 = arith.constant 0 : i32
    %c0_i32_2 = arith.constant 0 : i32
    return %c0_i32, %c0_i32_0, %c0_i32_1 : i32, i32, i32
  }
  func.func @transform_2(%arg0: i32) -> (i32, i32, i32) {
    %c0_i32 = arith.constant 0 : i32
    %c0_i32_0 = arith.constant 0 : i32
    %c0_i32_1 = arith.constant 0 : i32
    %c0_i32_2 = arith.constant 0 : i32
    return %c0_i32, %c0_i32_0, %c0_i32_1 : i32, i32, i32
  }
  func.func @transform_3(%arg0: i32) -> (i32, i32, i32) {
    %c0_i32 = arith.constant 0 : i32
    %c0_i32_0 = arith.constant 0 : i32
    %c0_i32_1 = arith.constant 0 : i32
    %c0_i32_2 = arith.constant 0 : i32
    return %c0_i32, %c0_i32_0, %c0_i32_1 : i32, i32, i32
  }
  func.func @transform_4(%arg0: i32) -> (i32, i32, i32, i32) {
    %c0_i32 = arith.constant 0 : i32
    %c0_i32_0 = arith.constant 0 : i32
    %c0_i32_1 = arith.constant 0 : i32
    %c0_i32_2 = arith.constant 0 : i32
    %c0_i32_3 = arith.constant 0 : i32
    return %c0_i32, %c0_i32_0, %c0_i32_1, %c0_i32_2 : i32, i32, i32, i32
  }
  func.func @transform_5(%arg0: i32) -> (i32, i32, i32, i32) {
    %c0_i32 = arith.constant 0 : i32
    %c0_i32_0 = arith.constant 0 : i32
    %c0_i32_1 = arith.constant 0 : i32
    %c0_i32_2 = arith.constant 0 : i32
    %c0_i32_3 = arith.constant 0 : i32
    return %c0_i32, %c0_i32_0, %c0_i32_1, %c0_i32_2 : i32, i32, i32, i32
  }
  func.func @transform_6(%arg0: i32) -> (i32, i32, i32, i32) {
    %c0_i32 = arith.constant 0 : i32
    %c0_i32_0 = arith.constant 0 : i32
    %c0_i32_1 = arith.constant 0 : i32
    %c0_i32_2 = arith.constant 0 : i32
    %c0_i32_3 = arith.constant 0 : i32
    return %c0_i32, %c0_i32_0, %c0_i32_1, %c0_i32_2 : i32, i32, i32, i32
  }
  func.func @transform_7(%arg0: i32) -> (i32, i32, i32, i32) {
    %c0_i32 = arith.constant 0 : i32
    %c0_i32_0 = arith.constant 0 : i32
    %c0_i32_1 = arith.constant 0 : i32
    %c0_i32_2 = arith.constant 0 : i32
    %c0_i32_3 = arith.constant 0 : i32
    return %c0_i32, %c0_i32_0, %c0_i32_1, %c0_i32_2 : i32, i32, i32, i32
  }
  func.func @transform_8(%arg0: i32) -> (i32, i32, i32, i32) {
    %c0_i32 = arith.constant 0 : i32
    %c0_i32_0 = arith.constant 0 : i32
    %c0_i32_1 = arith.constant 0 : i32
    %c0_i32_2 = arith.constant 0 : i32
    %c0_i32_3 = arith.constant 0 : i32
    return %c0_i32, %c0_i32_0, %c0_i32_1, %c0_i32_2 : i32, i32, i32, i32
  }
  func.func @transform_9(%arg0: i32) -> (i32, i32, i32, i32) {
    %c0_i32 = arith.constant 0 : i32
    %c0_i32_0 = arith.constant 0 : i32
    %c0_i32_1 = arith.constant 0 : i32
    %c0_i32_2 = arith.constant 0 : i32
    %c0_i32_3 = arith.constant 0 : i32
    return %c0_i32, %c0_i32_0, %c0_i32_1, %c0_i32_2 : i32, i32, i32, i32
  }
  func.func @transform_10(%arg0: i32) -> (i32, i32, i32, i32) {
    %c0_i32 = arith.constant 0 : i32
    %c0_i32_0 = arith.constant 0 : i32
    %c0_i32_1 = arith.constant 0 : i32
    %c0_i32_2 = arith.constant 0 : i32
    %c0_i32_3 = arith.constant 0 : i32
    return %c0_i32, %c0_i32_0, %c0_i32_1, %c0_i32_2 : i32, i32, i32, i32
  }
  func.func @transform_11(%arg0: i32) -> (i32, i32, i32, i32) {
    %c0_i32 = arith.constant 0 : i32
    %c0_i32_0 = arith.constant 0 : i32
    %c0_i32_1 = arith.constant 0 : i32
    %c0_i32_2 = arith.constant 0 : i32
    %c0_i32_3 = arith.constant 0 : i32
    return %c0_i32, %c0_i32_0, %c0_i32_1, %c0_i32_2 : i32, i32, i32, i32
  }
  func.func @transform_12(%arg0: i32) -> (i32, i32, i32, i32) {
    %c0_i32 = arith.constant 0 : i32
    %c0_i32_0 = arith.constant 0 : i32
    %c0_i32_1 = arith.constant 0 : i32
    %c0_i32_2 = arith.constant 0 : i32
    %c0_i32_3 = arith.constant 0 : i32
    return %c0_i32, %c0_i32_0, %c0_i32_1, %c0_i32_2 : i32, i32, i32, i32
  }
  func.func @transform_13(%arg0: i32) -> (i32, i32, i32, i32) {
    %c0_i32 = arith.constant 0 : i32
    %c0_i32_0 = arith.constant 0 : i32
    %c0_i32_1 = arith.constant 0 : i32
    %c0_i32_2 = arith.constant 0 : i32
    %c0_i32_3 = arith.constant 0 : i32
    return %c0_i32, %c0_i32_0, %c0_i32_1, %c0_i32_2 : i32, i32, i32, i32
  }
  func.func @transform_14(%arg0: i32) -> (i32, i32, i32, i32) {
    %c0_i32 = arith.constant 0 : i32
    %c0_i32_0 = arith.constant 0 : i32
    %c0_i32_1 = arith.constant 0 : i32
    %c0_i32_2 = arith.constant 0 : i32
    %c0_i32_3 = arith.constant 0 : i32
    return %c0_i32, %c0_i32_0, %c0_i32_1, %c0_i32_2 : i32, i32, i32, i32
  }
  func.func @transform_15(%arg0: i32) -> (i32, i32, i32, i32) {
    %c0_i32 = arith.constant 0 : i32
    %c0_i32_0 = arith.constant 0 : i32
    %c0_i32_1 = arith.constant 0 : i32
    %c0_i32_2 = arith.constant 0 : i32
    %c0_i32_3 = arith.constant 0 : i32
    return %c0_i32, %c0_i32_0, %c0_i32_1, %c0_i32_2 : i32, i32, i32, i32
  }
  func.func @transform_16(%arg0: i32) -> (i32, i32, i32) {
    %c0_i32 = arith.constant 0 : i32
    %c0_i32_0 = arith.constant 0 : i32
    %c0_i32_1 = arith.constant 0 : i32
    %c0_i32_2 = arith.constant 0 : i32
    return %c0_i32, %c0_i32_0, %c0_i32_1 : i32, i32, i32
  }
  func.func @transform_17(%arg0: i32) -> (i32, i32, i32) {
    %c0_i32 = arith.constant 0 : i32
    %c0_i32_0 = arith.constant 0 : i32
    %c0_i32_1 = arith.constant 0 : i32
    %c0_i32_2 = arith.constant 0 : i32
    return %c0_i32, %c0_i32_0, %c0_i32_1 : i32, i32, i32
  }
  func.func @transform_18(%arg0: i32) -> (i32, i32, i32) {
    %c0_i32 = arith.constant 0 : i32
    %c0_i32_0 = arith.constant 0 : i32
    %c0_i32_1 = arith.constant 0 : i32
    %c0_i32_2 = arith.constant 0 : i32
    return %c0_i32, %c0_i32_0, %c0_i32_1 : i32, i32, i32
  }
}

</mosaic_0001>

<bundles_post_ra>
// kernel: bert_classifier_forward.1
= control target key start
LH: loop header
LB: loop body
LE: loop exit
PB: predicated region body
PF: predicated region fallthrough
CT: control target
= control target key end

     0   :  { %s10069_s0 = inlined_call_operand.vmem [shape: f32[2,8,32], index: 0, kind: input, shape index: {}]   ;;  %s10070_s1 = inlined_call_operand.vmem [shape: f32[8,1,8], index: 1, kind: input, shape index: {}]   ;;  %s10071_s2 = inlined_call_operand.vmem [shape: f32[1,1,32], index: 2, kind: input, shape index: {}]   ;;  %s10072_s3 = inlined_call_operand.vmem [shape: f32[1,1,32], index: 3, kind: input, shape index: {}]   ;;  %s10073_s4 = inlined_call_operand.vmem [shape: bf16[2,24,32,8], index: 4, kind: input, shape index: {}]   ;;  %s10074_s5 = inlined_call_operand.vmem [shape: f32[2,24,1,8], index: 5, kind: input, shape index: {}]   ;;  %s10075_s6 = inlined_call_operand.vmem [shape: bf16[2,8,8,32], index: 6, kind: input, shape index: {}]   ;;  %s10076_s7 = inlined_call_operand.vmem [shape: f32[2,1,1,32], index: 7, kind: input, shape index: {}]   ;;  %s10077_s8 = inlined_call_operand.vmem [shape: f32[2,1,1,32], index: 8, kind: input, shape index: {}]   ;;  %s10078_s9 = inlined_call_operand.vmem [shape: f32[2,1,1,32], index: 9, kind: input, shape index: {}]   ;;  %s10079_s10 = inlined_call_operand.vmem [shape: bf16[2,2,32,64], index: 10, kind: input, shape index: {}]   ;;  %s10080_s11 = inlined_call_operand.vmem [shape: f32[2,1,1,64], index: 11, kind: input, shape index: {}]   ;;  %s10081_s12 = inlined_call_operand.vmem [shape: bf16[2,2,64,32], index: 12, kind: input, shape index: {}]   ;;  %s10082_s13 = inlined_call_operand.vmem [shape: f32[2,1,1,32], index: 13, kind: input, shape index: {}]   ;;  %s10083_s14 = inlined_call_operand.vmem [shape: f32[2,1,1,32], index: 14, kind: input, shape index: {}]   ;;  %s10084_s15 = inlined_call_operand.vmem [shape: f32[2,1,1,32], index: 15, kind: input, shape index: {}]   ;;  %s10085_s16 = inlined_call_operand.vmem [shape: bf16[2,32,128], index: 16, kind: input, shape index: {}]   ;;  %s10086_s17 = inlined_call_operand.vmem [shape: f32[1,1,128], index: 17, kind: input, shape index: {}]   ;;  %s10087_s18 = inlined_call_operand.hbm [shape: f32[2,1,128], index: 18, kind: output, shape index: {}]  }
   0x1   :  { %10090 = sst [smem:[#allocation5_spill]] %s10069_s0 }
   0x2   :  { %10091 = sst [smem:[#allocation6_spill]] %s10070_s1 }
   0x3   :  { %10092 = sst [smem:[#allocation7_spill]] %s10071_s2 }
   0x4   :  { %s10093_s29 = sld [smem:[#allocation5_spill]]  ;;  %vm65_vm0 = vcmask 261120  }
   0xa   :  { %v61_v0 = vld [vmem:[%s10093_s29] sm:$0xff]  ;;  %v62_v1 = vld [vmem:[%s10093_s29 + $0x8] sm:$0xff] }
   0xb   :  { %v66_v2 = vsel %vm65_vm0, %v61_v0, 0.0  ;;  %v69_v3 = vsel %vm65_vm0, %v62_v1, 0.0 }
   0xc   :  { %67 = vadd.xlane.f32.xlu0 %v66_v2 }
  0x10   :  { %70 = vadd.xlane.f32.xlu0 %v69_v3 }
  0x11   :  { %23 = vsyncpa [#allocation3], 0  ;;  %v8221_v14 = vld [vmem:[%s10073_s4 + $0x8] sm:$0xff]   ;;  %v8467_v15 = vmov 0.0   ;;  %v8222_v16 = vld [vmem:[%s10073_s4] sm:$0xff]   ;;  %vm8468_vm1 = vmmov 0  }
  0x12   :  { %7448 = vmatprep.subr.bf16.mxu0 %v8467_v15  ;;  %7456 = vmatprep.subr.bf16.mxu1 %v8467_v15  ;;  %v8223_v17 = vld [vmem:[%s10073_s4 + $0x18] sm:$0xff]   ;;  %v8224_v18 = vld [vmem:[%s10073_s4 + $0x10] sm:$0xff]   ;;  %s10094_s27 = sld [smem:[#allocation7_spill]]  ;;  %v6710_v28 = vld [vmem:[%s10072_s3] ss:$0 sm:$0xff]  ;;  %vm1661_vm2 = vcmask 64512  }
  0x13   :  { %7449 = vmatpush3.bf16.msra.mxu0 %v8221_v14  ;;  %7457 = vmatpush3.bf16.msra.mxu1 %v8223_v17  ;;  %v8225_v33 = vld [vmem:[%s10073_s4 + $0x28] sm:$0xff]   ;;  %v8226_v37 = vld [vmem:[%s10073_s4 + $0x20] sm:$0xff]   ;;  %v8227_v38 = vld [vmem:[%s10073_s4 + $0x38] sm:$0xff]   ;;  %vm2193_vm3 = vcmask 1043456   ;;  %s10095_s28 = sld [smem:[#allocation6_spill]]  ;;  %vm3206_vm4 = vcmask 523264  }
  0x14   :  { %7450 = vmatprep.subr.bf16.mxu0 %v8467_v15  ;;  %7458 = vmatprep.subr.bf16.mxu1 %v8467_v15  ;;  %v8228_v40 = vld [vmem:[%s10073_s4 + $0x30] sm:$0xff]   ;;  %v8229_v41 = vld [vmem:[%s10073_s4 + $0x48] sm:$0xff]   ;;  %v8230_v42 = vld [vmem:[%s10073_s4 + $0x40] sm:$0xff]  }
  0x15   :  { %7452 = vmatprep.mubr.msk.bf16.mxu0 %vm8468_vm1, %v8467_v15  ;;  %7460 = vmatprep.mubr.msk.bf16.mxu1 %vm8468_vm1, %v8467_v15  ;;  %v8231_v43 = vld [vmem:[%s10073_s4 + $0x58] sm:$0xff]   ;;  %v8232_v44 = vld [vmem:[%s10073_s4 + $0x50] sm:$0xff]   ;;  %v8233_v45 = vld [vmem:[%s10073_s4 + $0x68] sm:$0xff]  }
  0x16   :  { %v8234_v46 = vld [vmem:[%s10073_s4 + $0x60] sm:$0xff]   ;;  %v8235_v47 = vld [vmem:[%s10073_s4 + $0x78] sm:$0xff]   ;;  %v8236_v48 = vld [vmem:[%s10073_s4 + $0x70] sm:$0xff]  }
  0x17   :  { %7451 = vmatpush3.bf16.msra.mxu0 %v8222_v16  ;;  %7459 = vmatpush3.bf16.msra.mxu1 %v8224_v18  ;;  %v8237_v49 = vld [vmem:[%s10073_s4 + $0x88] sm:$0xff]   ;;  %v8238_v50 = vld [vmem:[%s10073_s4 + $0x80] sm:$0xff]   ;;  %v8239_v51 = vld [vmem:[%s10073_s4 + $0x98] sm:$0xff]  }
  0x18   :  { %7464 = vmatprep.subr.bf16.mxu0 %v8467_v15  ;;  %7472 = vmatprep.subr.bf16.mxu1 %v8467_v15  ;;  %v6709_v26 = vld [vmem:[%s10094_s27] ss:$0 sm:$0xff]  ;;  %v8240_v52 = vld [vmem:[%s10073_s4 + $0x90] sm:$0xff]   ;;  %v8241_v53 = vld [vmem:[%s10073_s4 + $0xa8] sm:$0xff]  }
  0x19   :  { %v8242_v54 = vld [vmem:[%s10073_s4 + $0xa0] sm:$0xff]   ;;  %v8243_v55 = vld [vmem:[%s10073_s4 + $0xb8] sm:$0xff]   ;;  %v8244_v56 = vld [vmem:[%s10073_s4 + $0xb0] sm:$0xff]  }
  0x1a   :  { %v8245_v57 = vld [vmem:[%s10073_s4 + $0xc8] sm:$0xff]   ;;  %v8246_v58 = vld [vmem:[%s10073_s4 + $0xc0] sm:$0xff]   ;;  %v8247_v59 = vld [vmem:[%s10073_s4 + $0xd8] sm:$0xff]  }
  0x1b   :  { %v8248_v60 = vld [vmem:[%s10073_s4 + $0xd0] sm:$0xff]   ;;  %v8249_v61 = vld [vmem:[%s10073_s4 + $0xe8] sm:$0xff]   ;;  %v8250_v62 = vld [vmem:[%s10073_s4 + $0xe0] sm:$0xff]  }
  0x1c   :  { %v8251_v63 = vld [vmem:[%s10073_s4 + $0xf8] sm:$0xff]   ;;  %v8254_v2 = vld [vmem:[%s10073_s4 + $0x100] sm:$0xff]   ;;  %v8268_v17 = vld [vmem:[%s10073_s4 + $0x170] sm:$0xff]  }
  0x1d   :  { %v8255_v3 = vld [vmem:[%s10073_s4 + $0x118] sm:$0xff]   ;;  %v8266_v14 = vld [vmem:[%s10073_s4 + $0x160] sm:$0xff]  }
  0x1e   :  { %v8267_v16 = vld [vmem:[%s10073_s4 + $0x178] sm:$0xff]  }
  0x95   :  { %v68_v4 = vpop.xlane.xlu0 %67 }
  0x96   :  { %v73_v5 = vmul.f32 0.03125, %v68_v4  ;;  %v8256_v4 = vld [vmem:[%s10073_s4 + $0x110] sm:$0xff]  }
  0x98   :  { %v75_v6 = vsub.f32 %v61_v0, %v73_v5  ;;  %v8252_v0 = vld [vmem:[%s10073_s4 + $0xf0] sm:$0xff]   ;;  %v8257_v5 = vld [vmem:[%s10073_s4 + $0x128] sm:$0xff]  }
  0x99   :  { %v71_v7 = vpop.xlane.xlu0 %70 }
  0x9a   :  { %v74_v8 = vmul.f32 0.03125, %v71_v7  ;;  %v77_v9 = vmul.f32 %v75_v6, %v75_v6  ;;  %v8259_v7 = vld [vmem:[%s10073_s4 + $0x138] sm:$0xff]  }
  0x9c   :  { %v76_v10 = vsub.f32 %v62_v1, %v74_v8  ;;  %v79_v11 = vsel %vm65_vm0, %v77_v9, 0.0  ;;  %v8253_v1 = vld [vmem:[%s10073_s4 + $0x108] sm:$0xff]   ;;  %v8260_v8 = vld [vmem:[%s10073_s4 + $0x130] sm:$0xff]  }
  0x9d   :  { %80 = vadd.xlane.f32.xlu1 %v79_v11  ;;  %v8261_v9 = vld [vmem:[%s10073_s4 + $0x148] sm:$0xff]   ;;  %v8263_v11 = vld [vmem:[%s10073_s4 + $0x158] sm:$0xff]  }
  0x9e   :  { %v78_v12 = vmul.f32 %v76_v10, %v76_v10 }
  0xa0   :  { %v82_v13 = vsel %vm65_vm0, %v78_v12, 0.0  ;;  %v8264_v12 = vld [vmem:[%s10073_s4 + $0x150] sm:$0xff]  }
  0xa1   :  { %83 = vadd.xlane.f32.xlu1 %v82_v13  ;;  %v8265_v13 = vld [vmem:[%s10073_s4 + $0x168] sm:$0xff]  }
 0x126   :  { %v81_v19 = vpop.xlane.xlu1 %80 }
 0x127   :  { %v85_v20 = vmul.f32 0.03125, %v81_v19 }
 0x129   :  { %v87_v21 = vadd.f32 1e-12, %v85_v20 }
 0x12a   :  { %v84_v22 = vpop.xlane.xlu1 %83 }
 0x12b   :  { %8345 = vrsqrt.f32 %v87_v21  ;;  %v86_v23 = vmul.f32 0.03125, %v84_v22 }
 0x12d   :  { %v88_v24 = vadd.f32 1e-12, %v86_v23 }
 0x12f   :  { %8347 = vrsqrt.f32 %v88_v24 }
 0x138   :  { %v8346_v25 = vpop.eup %8345 }
 0x139   :  { %v91_v27 = vmul.f32 %v8346_v25, %v75_v6  ;;  %v8258_v6 = vld [vmem:[%s10073_s4 + $0x120] sm:$0xff]  }
 0x13b   :  { %v99_v29 = vmul.f32 %v6709_v26, %v91_v27 }
 0x13c   :  { %v8348_v30 = vpop.eup %8347 }
 0x13d   :  { %v8605_v31 = vadd.f32 %v6710_v28, %v99_v29  ;;  %v92_v32 = vmul.f32 %v8348_v30, %v76_v10  ;;  %v8262_v10 = vld [vmem:[%s10073_s4 + $0x140] sm:$0xff]  }
 0x13f   :  { %v8612_v34 = vpack.c.bf16 %v8605_v31, %v8605_v31  ;;  %v100_v35 = vmul.f32 %v6709_v26, %v92_v32 }
 0x141   :  { %v8614_v36 = vadd.f32 %v6710_v28, %v100_v35  ;;  %7453 = vmatmul.mubr.msk.bf16.vlgmr.msra.gmra.mxu0 %vm65_vm0, %v8612_v34 }
 0x142   :  { %7465 = vmatpush3.bf16.msra.mxu0 %v8225_v33  ;;  %7468 = vmatprep.mubr.msk.bf16.mxu0 %vm8468_vm1, %v8467_v15 }
 0x143   :  { %v8628_v39 = vpack.c.bf16 %v8614_v36, %v8614_v36  ;;  %7466 = vmatprep.subr.bf16.mxu0 %v8467_v15 }
 0x145   :  { %7461 = vmatmul.mubr.msk.bf16.vlgmr.msra.gmra.mxu1 %vm65_vm0, %v8628_v39 }
 0x146   :  { %7467 = vmatpush3.bf16.msra.mxu0 %v8226_v37  ;;  %7473 = vmatpush3.bf16.msra.mxu1 %v8227_v38 }
 0x147   :  { %7474 = vmatprep.subr.bf16.mxu1 %v8467_v15  ;;  %7480 = vmatprep.subr.bf16.mxu0 %v8467_v15 }
 0x148   :  { %7476 = vmatprep.mubr.msk.bf16.mxu1 %vm8468_vm1, %v8467_v15 }
 0x149   :  { %7469 = vmatmul.mubr.msk.bf16.vlgmr.msra.gmra.mxu0 %vm65_vm0, %v8612_v34 }
 0x14a   :  { %7475 = vmatpush3.bf16.msra.mxu1 %v8228_v40  ;;  %7481 = vmatpush3.bf16.msra.mxu0 %v8229_v41 }
 0x14b   :  { %7482 = vmatprep.subr.bf16.mxu0 %v8467_v15  ;;  %7488 = vmatprep.subr.bf16.mxu1 %v8467_v15 }
 0x14c   :  { %7484 = vmatprep.mubr.msk.bf16.mxu0 %vm8468_vm1, %v8467_v15 }
 0x14d   :  { %7477 = vmatmul.mubr.msk.bf16.vlgmr.msra.gmra.mxu1 %vm65_vm0, %v8628_v39 }
 0x14e   :  { %7483 = vmatpush3.bf16.msra.mxu0 %v8230_v42  ;;  %7489 = vmatpush3.bf16.msra.mxu1 %v8231_v43 }
 0x14f   :  { %7490 = vmatprep.subr.bf16.mxu1 %v8467_v15  ;;  %7496 = vmatprep.subr.bf16.mxu0 %v8467_v15 }
 0x150   :  { %7492 = vmatprep.mubr.msk.bf16.mxu1 %vm8468_vm1, %v8467_v15 }
 0x151   :  { %7485 = vmatmul.mubr.msk.bf16.vlgmr.msra.gmra.mxu0 %vm65_vm0, %v8612_v34 }
 0x152   :  { %7491 = vmatpush3.bf16.msra.mxu1 %v8232_v44  ;;  %7497 = vmatpush3.bf16.msra.mxu0 %v8233_v45 }
 0x153   :  { %7498 = vmatprep.subr.bf16.mxu0 %v8467_v15  ;;  %7504 = vmatprep.subr.bf16.mxu1 %v8467_v15 }
 0x154   :  { %7500 = vmatprep.mubr.msk.bf16.mxu0 %vm8468_vm1, %v8467_v15 }
 0x155   :  { %7493 = vmatmul.mubr.msk.bf16.vlgmr.msra.gmra.mxu1 %vm65_vm0, %v8628_v39 }
 0x156   :  { %7499 = vmatpush3.bf16.msra.mxu0 %v8234_v46  ;;  %7505 = vmatpush3.bf16.msra.mxu1 %v8235_v47 }
 0x157   :  { %7506 = vmatprep.subr.bf16.mxu1 %v8467_v15  ;;  %7512 = vmatprep.subr.bf16.mxu0 %v8467_v15 }
 0x158   :  { %7508 = vmatprep.mubr.msk.bf16.mxu1 %vm8468_vm1, %v8467_v15 }
 0x159   :  { %7501 = vmatmul.mubr.msk.bf16.vlgmr.msra.gmra.mxu0 %vm65_vm0, %v8612_v34 }
 0x15a   :  { %7507 = vmatpush3.bf16.msra.mxu1 %v8236_v48  ;;  %7513 = vmatpush3.bf16.msra.mxu0 %v8237_v49 }
 0x15b   :  { %7514 = vmatprep.subr.bf16.mxu0 %v8467_v15  ;;  %7520 = vmatprep.subr.bf16.mxu1 %v8467_v15 }
 0x15c   :  { %7516 = vmatprep.mubr.msk.bf16.mxu0 %vm8468_vm1, %v8467_v15 }
 0x15d   :  { %7509 = vmatmul.mubr.msk.bf16.vlgmr.msra.gmra.mxu1 %vm65_vm0, %v8628_v39 }
 0x15e   :  { %7515 = vmatpush3.bf16.msra.mxu0 %v8238_v50  ;;  %7521 = vmatpush3.bf16.msra.mxu1 %v8239_v51  ;;  %v6719_v50 = vld [vmem:[%s10074_s5 + $0x8] ss:$0 sm:$0xff] }
 0x15f   :  { %7522 = vmatprep.subr.bf16.mxu1 %v8467_v15  ;;  %7528 = vmatprep.subr.bf16.mxu0 %v8467_v15 }
 0x160   :  { %7524 = vmatprep.mubr.msk.bf16.mxu1 %vm8468_vm1, %v8467_v15 }
 0x161   :  { %7517 = vmatmul.mubr.msk.bf16.vlgmr.msra.gmra.mxu0 %vm65_vm0, %v8612_v34 }
 0x162   :  { %7523 = vmatpush3.bf16.msra.mxu1 %v8240_v52  ;;  %7529 = vmatpush3.bf16.msra.mxu0 %v8241_v53 }
 0x163   :  { %7530 = vmatprep.subr.bf16.mxu0 %v8467_v15  ;;  %7536 = vmatprep.subr.bf16.mxu1 %v8467_v15 }
 0x164   :  { %7532 = vmatprep.mubr.msk.bf16.mxu0 %vm8468_vm1, %v8467_v15 }
 0x165   :  { %7525 = vmatmul.mubr.msk.bf16.vlgmr.msra.gmra.mxu1 %vm65_vm0, %v8628_v39 }
 0x166   :  { %7531 = vmatpush3.bf16.msra.mxu0 %v8242_v54  ;;  %7537 = vmatpush3.bf16.msra.mxu1 %v8243_v55 }
 0x167   :  { %7538 = vmatprep.subr.bf16.mxu1 %v8467_v15  ;;  %7544 = vmatprep.subr.bf16.mxu0 %v8467_v15 }
 0x168   :  { %7540 = vmatprep.mubr.msk.bf16.mxu1 %vm8468_vm1, %v8467_v15 }
 0x169   :  { %7533 = vmatmul.mubr.msk.bf16.vlgmr.msra.gmra.mxu0 %vm65_vm0, %v8612_v34 }
 0x16a   :  { %7539 = vmatpush3.bf16.msra.mxu1 %v8244_v56  ;;  %7545 = vmatpush3.bf16.msra.mxu0 %v8245_v57  ;;  %v6720_v56 = vld [vmem:[%s10074_s5 + $0x9] ss:$0 sm:$0xff] }
 0x16b   :  { %7546 = vmatprep.subr.bf16.mxu0 %v8467_v15  ;;  %7552 = vmatprep.subr.bf16.mxu1 %v8467_v15 }
 0x16c   :  { %7548 = vmatprep.mubr.msk.bf16.mxu0 %vm8468_vm1, %v8467_v15 }
 0x16d   :  { %7541 = vmatmul.mubr.msk.bf16.vlgmr.msra.gmra.mxu1 %vm65_vm0, %v8628_v39 }
 0x16e   :  { %7547 = vmatpush3.bf16.msra.mxu0 %v8246_v58  ;;  %7553 = vmatpush3.bf16.msra.mxu1 %v8247_v59  ;;  %v6711_v58 = vld [vmem:[%s10074_s5] ss:$0 sm:$0xff] }
 0x16f   :  { %7554 = vmatprep.subr.bf16.mxu1 %v8467_v15  ;;  %7560 = vmatprep.subr.bf16.mxu0 %v8467_v15 }
 0x170   :  { %7556 = vmatprep.mubr.msk.bf16.mxu1 %vm8468_vm1, %v8467_v15 }
 0x171   :  { %7549 = vmatmul.mubr.msk.bf16.vlgmr.msra.gmra.mxu0 %vm65_vm0, %v8612_v34 }
 0x172   :  { %7555 = vmatpush3.bf16.msra.mxu1 %v8248_v60  ;;  %7561 = vmatpush3.bf16.msra.mxu0 %v8249_v61 }
 0x173   :  { %7562 = vmatprep.subr.bf16.mxu0 %v8467_v15  ;;  %7568 = vmatprep.subr.bf16.mxu1 %v8467_v15 }
 0x174   :  { %7564 = vmatprep.mubr.msk.bf16.mxu0 %vm8468_vm1, %v8467_v15 }
 0x175   :  { %7557 = vmatmul.mubr.msk.bf16.vlgmr.msra.gmra.mxu1 %vm65_vm0, %v8628_v39 }
 0x176   :  { %7563 = vmatpush3.bf16.msra.mxu0 %v8250_v62  ;;  %7569 = vmatpush3.bf16.msra.mxu1 %v8251_v63 }
 0x177   :  { %7570 = vmatprep.subr.bf16.mxu1 %v8467_v15  ;;  %7576 = vmatprep.subr.bf16.mxu0 %v8467_v15 }
 0x178   :  { %7572 = vmatprep.mubr.msk.bf16.mxu1 %vm8468_vm1, %v8467_v15 }
 0x179   :  { %7565 = vmatmul.mubr.msk.bf16.vlgmr.msra.gmra.mxu0 %vm65_vm0, %v8612_v34 }
 0x17a   :  { %7571 = vmatpush3.bf16.msra.mxu1 %v8252_v0  ;;  %7577 = vmatpush3.bf16.msra.mxu0 %v8253_v1  ;;  %v6721_v1 = vld [vmem:[%s10074_s5 + $0xa] ss:$0 sm:$0xff] }
 0x17b   :  { %7578 = vmatprep.subr.bf16.mxu0 %v8467_v15  ;;  %7584 = vmatprep.subr.bf16.mxu1 %v8467_v15 }
 0x17c   :  { %7580 = vmatprep.mubr.msk.bf16.mxu0 %vm8468_vm1, %v8467_v15 }
 0x17d   :  { %7573 = vmatmul.mubr.msk.bf16.vlgmr.msra.gmra.mxu1 %vm65_vm0, %v8628_v39 }
 0x17e   :  { %7579 = vmatpush3.bf16.msra.mxu0 %v8254_v2  ;;  %7585 = vmatpush3.bf16.msra.mxu1 %v8255_v3 }
 0x17f   :  { %7586 = vmatprep.subr.bf16.mxu1 %v8467_v15  ;;  %7592 = vmatprep.subr.bf16.mxu0 %v8467_v15 }
 0x180   :  { %7588 = vmatprep.mubr.msk.bf16.mxu1 %vm8468_vm1, %v8467_v15 }
 0x181   :  { %7581 = vmatmul.mubr.msk.bf16.vlgmr.msra.gmra.mxu0 %vm65_vm0, %v8612_v34 }
 0x182   :  { %7587 = vmatpush3.bf16.msra.mxu1 %v8256_v4  ;;  %7593 = vmatpush3.bf16.msra.mxu0 %v8257_v5  ;;  %v6712_v4 = vld [vmem:[%s10074_s5 + $0x1] ss:$0 sm:$0xff] }
 0x183   :  { %7594 = vmatprep.subr.bf16.mxu0 %v8467_v15  ;;  %7600 = vmatprep.subr.bf16.mxu1 %v8467_v15 }
 0x184   :  { %7596 = vmatprep.mubr.msk.bf16.mxu0 %vm8468_vm1, %v8467_v15 }
 0x185   :  { %7589 = vmatmul.mubr.msk.bf16.vlgmr.msra.gmra.mxu1 %vm65_vm0, %v8628_v39 }
 0x186   :  { %7595 = vmatpush3.bf16.msra.mxu0 %v8258_v6  ;;  %7601 = vmatpush3.bf16.msra.mxu1 %v8259_v7 }
 0x187   :  { %7602 = vmatprep.subr.bf16.mxu1 %v8467_v15  ;;  %7608 = vmatprep.subr.bf16.mxu0 %v8467_v15 }
 0x188   :  { %7604 = vmatprep.mubr.msk.bf16.mxu1 %vm8468_vm1, %v8467_v15 }
 0x189   :  { %7597 = vmatmul.mubr.msk.bf16.vlgmr.msra.gmra.mxu0 %vm65_vm0, %v8612_v34 }
 0x18a   :  { %7603 = vmatpush3.bf16.msra.mxu1 %v8260_v8  ;;  %7609 = vmatpush3.bf16.msra.mxu0 %v8261_v9 }
 0x18b   :  { %7610 = vmatprep.subr.bf16.mxu0 %v8467_v15  ;;  %7616 = vmatprep.subr.bf16.mxu1 %v8467_v15 }
 0x18c   :  { %7612 = vmatprep.mubr.msk.bf16.mxu0 %vm8468_vm1, %v8467_v15 }
 0x18d   :  { %7605 = vmatmul.mubr.msk.bf16.vlgmr.msra.gmra.mxu1 %vm65_vm0, %v8628_v39 }
 0x18e   :  { %7611 = vmatpush3.bf16.msra.mxu0 %v8262_v10  ;;  %7617 = vmatpush3.bf16.msra.mxu1 %v8263_v11  ;;  %v6722_v11 = vld [vmem:[%s10074_s5 + $0xb] ss:$0 sm:$0xff] }
 0x18f   :  { %7618 = vmatprep.subr.bf16.mxu1 %v8467_v15  ;;  %7624 = vmatprep.subr.bf16.mxu0 %v8467_v15 }
 0x190   :  { %7620 = vmatprep.mubr.msk.bf16.mxu1 %vm8468_vm1, %v8467_v15 }
 0x191   :  { %7613 = vmatmul.mubr.msk.bf16.vlgmr.msra.gmra.mxu0 %vm65_vm0, %v8612_v34 }
 0x192   :  { %7619 = vmatpush3.bf16.msra.mxu1 %v8264_v12  ;;  %7625 = vmatpush3.bf16.msra.mxu0 %v8265_v13 }
 0x193   :  { %7626 = vmatprep.subr.bf16.mxu0 %v8467_v15  ;;  %7632 = vmatprep.subr.bf16.mxu1 %v8467_v15 }
 0x194   :  { %7628 = vmatprep.mubr.msk.bf16.mxu0 %vm8468_vm1, %v8467_v15 }
 0x195   :  { %7621 = vmatmul.mubr.msk.bf16.vlgmr.msra.gmra.mxu1 %vm65_vm0, %v8628_v39 }
 0x196   :  { %7627 = vmatpush3.bf16.msra.mxu0 %v8266_v14  ;;  %7633 = vmatpush3.bf16.msra.mxu1 %v8267_v16  ;;  %v6713_v16 = vld [vmem:[%s10074_s5 + $0x2] ss:$0 sm:$0xff] }
 0x197   :  { %7634 = vmatprep.subr.bf16.mxu1 %v8467_v15  ;;  %7636 = vmatprep.mubr.msk.bf16.mxu1 %vm8468_vm1, %v8467_v15 }
 0x198   :  { %7640 = vmatprep.subr.bf16.mxu0 %v8467_v15 }
 0x199   :  { %7629 = vmatmul.mubr.msk.bf16.vlgmr.msra.gmra.mxu0 %vm65_vm0, %v8612_v34 }
 0x19a   :  { %7635 = vmatpush3.bf16.msra.mxu1 %v8268_v17  ;;  %7642 = vmatprep.mubr.msk.bf16.mxu0 %vm8468_vm1, %v8467_v15 }
 0x19b   :  { %7646 = vmatprep.subr.bf16.mxu1 %v8467_v15 }
 0x19d   :  { %7637 = vmatmul.mubr.msk.bf16.vlgmr.msra.gmra.mxu1 %vm65_vm0, %v8628_v39 }
 0x19e   :  { %7648 = vmatprep.mubr.msk.bf16.mxu1 %vm8468_vm1, %v8467_v15 }
 0x201   :  { %v432_v18 = vpop.f32.mrf.mxu0 }
 0x202   :  { %v433_v2 = vadd.f32 %v6711_v58, %v432_v18 }
 0x203   :  { %v7454_v19 = vpop.f32.mrf.mxu0 }
 0x204   :  { %v1637_v12 = vpack.c.bf16 %v433_v2, %v433_v2 }
 0x205   :  { %v435_v20 = vpop.f32.mrf.mxu0  ;;  %v487_v21 = vpop.f32.mrf.mxu1 }
 0x206   :  { %v488_v13 = vadd.f32 %v6712_v4, %v487_v21  ;;  %v6723_v21 = vld [vmem:[%s10074_s5 + $0xc] ss:$0 sm:$0xff] }
 0x207   :  { %v7455_v22 = vpop.f32.mrf.mxu0  ;;  %v7462_v23 = vpop.f32.mrf.mxu1 }
 0x209   :  { %v490_v24 = vpop.f32.mrf.mxu1  ;;  %v8889_v25 = vpop.f32.mrf.mxu0 }
 0x20a   :  { %v1638_v24 = vpack.c.bf16 %v488_v13, %v488_v13 }
 0x20b   :  { %v7463_v26 = vpop.f32.mrf.mxu1  ;;  %v7470_v27 = vpop.f32.mrf.mxu0 }
 0x20c   :  { %v540_v26 = vadd.f32 %v6713_v16, %v8889_v25  ;;  %v6724_v25 = vld [vmem:[%s10074_s5 + $0xd] ss:$0 sm:$0xff] }
 0x20d   :  { %v542_v28 = vpop.f32.mrf.mxu0  ;;  %v8891_v29 = vpop.f32.mrf.mxu1 }
 0x20e   :  { %v6714_v28 = vld [vmem:[%s10074_s5 + $0x3] ss:$0 sm:$0xff] }
 0x20f   :  { %v7471_v30 = vpop.f32.mrf.mxu0  ;;  %v7478_v32 = vpop.f32.mrf.mxu1 }
 0x211   :  { %v594_v33 = vpop.f32.mrf.mxu1  ;;  %v8893_v34 = vpop.f32.mrf.mxu0 }
 0x213   :  { %v7479_v35 = vpop.f32.mrf.mxu1  ;;  %v7486_v37 = vpop.f32.mrf.mxu0 }
 0x215   :  { %v646_v38 = vpop.f32.mrf.mxu0  ;;  %v8895_v39 = vpop.f32.mrf.mxu1 }
 0x217   :  { %v7487_v40 = vpop.f32.mrf.mxu0  ;;  %v7494_v41 = vpop.f32.mrf.mxu1 }
 0x218   :  { %v1639_v40 = vpack.c.bf16 %v540_v26, %v540_v26  ;;  %v592_v41 = vadd.f32 %v6714_v28, %v8891_v29  ;;  %v6725_v29 = vld [vmem:[%s10074_s5 + $0xe] ss:$0 sm:$0xff] }
 0x219   :  { %v698_v42 = vpop.f32.mrf.mxu1  ;;  %v8897_v43 = vpop.f32.mrf.mxu0 }
 0x21b   :  { %v7495_v44 = vpop.f32.mrf.mxu1  ;;  %v7502_v45 = vpop.f32.mrf.mxu0 }
 0x21c   :  { %v6715_v44 = vld [vmem:[%s10074_s5 + $0x4] ss:$0 sm:$0xff] }
 0x21d   :  { %v750_v46 = vpop.f32.mrf.mxu0  ;;  %v8899_v47 = vpop.f32.mrf.mxu1 }
 0x21f   :  { %v7503_v48 = vpop.f32.mrf.mxu0  ;;  %v7510_v49 = vpop.f32.mrf.mxu1 }
 0x221   :  { %v802_v51 = vpop.f32.mrf.mxu1  ;;  %v851_v52 = vpop.f32.mrf.mxu0 }
 0x222   :  { %v852_v53 = vadd.f32 %v6719_v50, %v851_v52  ;;  %v1640_v52 = vpack.c.bf16 %v592_v41, %v592_v41 }
 0x223   :  { %v7511_v54 = vpop.f32.mrf.mxu1  ;;  %v7518_v55 = vpop.f32.mrf.mxu0 }
 0x224   :  { %v1645_v57 = vpack.c.bf16 %v852_v53, %v852_v53  ;;  %v644_v53 = vadd.f32 %v6715_v44, %v8893_v34  ;;  %v6716_v55 = vld [vmem:[%s10074_s5 + $0x5] ss:$0 sm:$0xff]  ;;  %v6726_v34 = vld [vmem:[%s10074_s5 + $0xf] ss:$0 sm:$0xff] }
 0x225   :  { %v854_v59 = vpop.f32.mrf.mxu0  ;;  %v903_v60 = vpop.f32.mrf.mxu1 }
 0x226   :  { %v1666_v61 = vsel %vm1661_vm2, %v1645_v57, 0  ;;  %v904_v62 = vadd.f32 %v6720_v56, %v903_v60 }
 0x227   :  { %v7519_v63 = vpop.f32.mrf.mxu0  ;;  %v7526_v0 = vpop.f32.mrf.mxu1  ;;  %7641 = vmatpush3.bf16.xpose.msra.mxu0 %v1666_v61 }
 0x228   :  { %v1646_v3 = vpack.c.bf16 %v904_v62, %v904_v62  ;;  %7652 = vmatprep.subr.bf16.mxu0 %v8467_v15  ;;  %v1641_v62 = vpack.c.bf16 %v644_v53, %v644_v53  ;;  %v696_v63 = vadd.f32 %v6716_v55, %v8895_v39  ;;  %v6727_v39 = vld [vmem:[%s10074_s5 + $0x10] ss:$0 sm:$0xff] }
 0x229   :  { %v906_v5 = vpop.f32.mrf.mxu1  ;;  %v955_v6 = vpop.f32.mrf.mxu0 }
 0x22a   :  { %v1712_v7 = vsel %vm1661_vm2, %v1646_v3, 0  ;;  %v956_v8 = vadd.f32 %v6721_v1, %v955_v6  ;;  %v6717_v1 = vld [vmem:[%s10074_s5 + $0x6] ss:$0 sm:$0xff] }
 0x22b   :  { %v7527_v9 = vpop.f32.mrf.mxu1  ;;  %v7534_v10 = vpop.f32.mrf.mxu0  ;;  %7647 = vmatpush3.bf16.xpose.msra.mxu1 %v1712_v7 }
 0x22c   :  { %v1647_v14 = vpack.c.bf16 %v956_v8, %v956_v8  ;;  %7658 = vmatprep.subr.bf16.mxu1 %v8467_v15  ;;  %v1642_v8 = vpack.c.bf16 %v696_v63, %v696_v63  ;;  %v748_v9 = vadd.f32 %v6717_v1, %v8897_v43  ;;  %v6728_v43 = vld [vmem:[%s10074_s5 + $0x11] ss:$0 sm:$0xff] }
 0x22d   :  { %v958_v17 = vpop.f32.mrf.mxu0  ;;  %v1007_v18 = vpop.f32.mrf.mxu1 }
 0x22e   :  { %v1758_v19 = vsel %vm1661_vm2, %v1647_v14, 0  ;;  %v1008_v20 = vadd.f32 %v6722_v11, %v1007_v18  ;;  %7643 = vmatmul.mubr.msk.bf16.vlgmr.msra.gmra.mxu0 %vm1661_vm2, %v1637_v12  ;;  %v6718_v11 = vld [vmem:[%s10074_s5 + $0x7] ss:$0 sm:$0xff] }
 0x22f   :  { %v7535_v22 = vpop.f32.mrf.mxu0  ;;  %v7542_v23 = vpop.f32.mrf.mxu1  ;;  %7653 = vmatpush3.bf16.xpose.msra.mxu0 %v1758_v19  ;;  %7654 = vmatprep.mubr.msk.bf16.mxu0 %vm8468_vm1, %v8467_v15  ;;  %v1643_v19 = vpack.c.bf16 %v748_v9, %v748_v9 }
 0x230   :  { %v1648_v27 = vpack.c.bf16 %v1008_v20, %v1008_v20  ;;  %7664 = vmatprep.subr.bf16.mxu0 %v8467_v15  ;;  %v800_v20 = vadd.f32 %v6718_v11, %v8899_v47  ;;  %v6817_v11 = vld [vmem:[%s10095_s28 + $0x2] ss:$0 sm:$0xff] }
 0x231   :  { %v1010_v30 = vpop.f32.mrf.mxu1  ;;  %v1059_v32 = vpop.f32.mrf.mxu0 }
 0x232   :  { %v1804_v33 = vsel %vm1661_vm2, %v1648_v27, 0  ;;  %v1060_v35 = vadd.f32 %v6723_v21, %v1059_v32  ;;  %7649 = vmatmul.mubr.msk.bf16.vlgmr.msra.gmra.mxu1 %vm1661_vm2, %v1638_v24  ;;  %v1644_v30 = vpack.c.bf16 %v800_v20, %v800_v20 }
 0x233   :  { %v7543_v37 = vpop.f32.mrf.mxu1  ;;  %v7550_v38 = vpop.f32.mrf.mxu0  ;;  %7659 = vmatpush3.bf16.xpose.msra.mxu1 %v1804_v33  ;;  %7660 = vmatprep.mubr.msk.bf16.mxu1 %vm8468_vm1, %v8467_v15 }
 0x234   :  { %v1649_v42 = vpack.c.bf16 %v1060_v35, %v1060_v35  ;;  %7670 = vmatprep.subr.bf16.mxu1 %v8467_v15 }
 0x235   :  { %v1062_v45 = vpop.f32.mrf.mxu0  ;;  %v1111_v46 = vpop.f32.mrf.mxu1 }
 0x236   :  { %v1850_v48 = vsel %vm1661_vm2, %v1649_v42, 0  ;;  %v1112_v49 = vadd.f32 %v6724_v25, %v1111_v46  ;;  %7655 = vmatmul.mubr.msk.bf16.vlgmr.msra.gmra.mxu0 %vm1661_vm2, %v1639_v40 }
 0x237   :  { %v7551_v50 = vpop.f32.mrf.mxu0  ;;  %v7558_v51 = vpop.f32.mrf.mxu1  ;;  %7665 = vmatpush3.bf16.xpose.msra.mxu0 %v1850_v48  ;;  %7666 = vmatprep.mubr.msk.bf16.mxu0 %vm8468_vm1, %v8467_v15 }
 0x238   :  { %v1650_v54 = vpack.c.bf16 %v1112_v49, %v1112_v49  ;;  %7676 = vmatprep.subr.bf16.mxu0 %v8467_v15 }
 0x239   :  { %v1114_v56 = vpop.f32.mrf.mxu1  ;;  %v1163_v57 = vpop.f32.mrf.mxu0 }
 0x23a   :  { %v1896_v58 = vsel %vm1661_vm2, %v1650_v54, 0  ;;  %v1164_v59 = vadd.f32 %v6725_v29, %v1163_v57  ;;  %7661 = vmatmul.mubr.msk.bf16.vlgmr.msra.gmra.mxu1 %vm1661_vm2, %v1640_v52 }
 0x23b   :  { %v7559_v60 = vpop.f32.mrf.mxu1  ;;  %v7566_v61 = vpop.f32.mrf.mxu0  ;;  %7671 = vmatpush3.bf16.xpose.msra.mxu1 %v1896_v58  ;;  %7672 = vmatprep.mubr.msk.bf16.mxu1 %vm8468_vm1, %v8467_v15 }
 0x23c   :  { %v1651_v0 = vpack.c.bf16 %v1164_v59, %v1164_v59  ;;  %7682 = vmatprep.subr.bf16.mxu1 %v8467_v15 }
 0x23d   :  { %v1166_v2 = vpop.f32.mrf.mxu0  ;;  %v1215_v3 = vpop.f32.mrf.mxu1 }
 0x23e   :  { %v1942_v4 = vsel %vm1661_vm2, %v1651_v0, 0  ;;  %v1216_v5 = vadd.f32 %v6726_v34, %v1215_v3  ;;  %7667 = vmatmul.mubr.msk.bf16.vlgmr.msra.gmra.mxu0 %vm1661_vm2, %v1641_v62  ;;  %v6815_v62 = vld [vmem:[%s10095_s28] ss:$0 sm:$0xff] }
 0x23f   :  { %v7567_v6 = vpop.f32.mrf.mxu0  ;;  %v7574_v7 = vpop.f32.mrf.mxu1  ;;  %7677 = vmatpush3.bf16.xpose.msra.mxu0 %v1942_v4  ;;  %7678 = vmatprep.mubr.msk.bf16.mxu0 %vm8468_vm1, %v8467_v15  ;;  %v6816_v4 = vld [vmem:[%s10095_s28 + $0x1] ss:$0 sm:$0xff] }
 0x240   :  { %v1652_v10 = vpack.c.bf16 %v1216_v5, %v1216_v5  ;;  %7688 = vmatprep.subr.bf16.mxu0 %v8467_v15 }
 0x241   :  { %v1218_v12 = vpop.f32.mrf.mxu1  ;;  %v1267_v13 = vpop.f32.mrf.mxu0 }
 0x242   :  { %v1988_v14 = vsel %vm1661_vm2, %v1652_v10, 0  ;;  %v1268_v16 = vadd.f32 %v6727_v39, %v1267_v13  ;;  %7673 = vmatmul.mubr.msk.bf16.vlgmr.msra.gmra.mxu1 %vm1661_vm2, %v1642_v8 }
 0x243   :  { %v7575_v17 = vpop.f32.mrf.mxu1  ;;  %v7582_v18 = vpop.f32.mrf.mxu0  ;;  %7683 = vmatpush3.bf16.xpose.msra.mxu1 %v1988_v14  ;;  %7684 = vmatprep.mubr.msk.bf16.mxu1 %vm8468_vm1, %v8467_v15 }
 0x244   :  { %v1653_v22 = vpack.c.bf16 %v1268_v16, %v1268_v16  ;;  %7694 = vmatprep.subr.bf16.mxu1 %v8467_v15 }
 0x245   :  { %v1270_v23 = vpop.f32.mrf.mxu0  ;;  %v1319_v21 = vpop.f32.mrf.mxu1 }
 0x246   :  { %v2195_v24 = vsel %vm2193_vm3, %v1653_v22, 0  ;;  %v1320_v26 = vadd.f32 %v6728_v43, %v1319_v21  ;;  %7679 = vmatmul.mubr.msk.bf16.vlgmr.msra.gmra.mxu0 %vm1661_vm2, %v1643_v19  ;;  %v6818_v19 = vld [vmem:[%s10095_s28 + $0x3] ss:$0 sm:$0xff] }
 0x247   :  { %v7583_v27 = vpop.f32.mrf.mxu0  ;;  %v7590_v28 = vpop.f32.mrf.mxu1  ;;  %7689 = vmatpush3.bf16.msra.mxu0 %v2195_v24  ;;  %7690 = vmatprep.mubr.msk.bf16.mxu0 %vm8468_vm1, %v8467_v15 }
 0x248   :  { %v1654_v32 = vpack.c.bf16 %v1320_v26, %v1320_v26  ;;  %7700 = vmatprep.subr.bf16.mxu0 %v8467_v15  ;;  %v6819_v28 = vld [vmem:[%s10095_s28 + $0x4] ss:$0 sm:$0xff] }
 0x249   :  { %v1322_v47 = vpop.f32.mrf.mxu1  ;;  %v9000_v33 = vpop.f32.mrf.mxu0 }
 0x24a   :  { %v2241_v35 = vsel %vm2193_vm3, %v1654_v32, 0  ;;  %7685 = vmatmul.mubr.msk.bf16.vlgmr.msra.gmra.mxu1 %vm1661_vm2, %v1644_v30 }
 0x24b   :  { %v7591_v37 = vpop.f32.mrf.mxu1  ;;  %v7598_v38 = vpop.f32.mrf.mxu0  ;;  %7695 = vmatpush3.bf16.msra.mxu1 %v2241_v35  ;;  %7696 = vmatprep.mubr.msk.bf16.mxu1 %vm8468_vm1, %v8467_v15 }
 0x24c   :  { %7706 = vmatprep.subr.bf16.mxu1 %v8467_v15 }
 0x24d   :  { %v1374_v25 = vpop.f32.mrf.mxu0  ;;  %v9007_v40 = vpop.f32.mrf.mxu1 }
 0x24f   :  { %v7599_v41 = vpop.f32.mrf.mxu0  ;;  %v7606_v42 = vpop.f32.mrf.mxu1 }
 0x250   :  { %v6820_v41 = vld [vmem:[%s10095_s28 + $0x5] ss:$0 sm:$0xff] }
 0x251   :  { %v1426_v44 = vpop.f32.mrf.mxu1  ;;  %v9009_v45 = vpop.f32.mrf.mxu0 }
 0x253   :  { %v7607_v46 = vpop.f32.mrf.mxu1  ;;  %v7614_v48 = vpop.f32.mrf.mxu0 }
 0x255   :  { %v1478_v49 = vpop.f32.mrf.mxu0  ;;  %v9011_v50 = vpop.f32.mrf.mxu1 }
 0x257   :  { %v7615_v51 = vpop.f32.mrf.mxu0  ;;  %v7622_v29 = vpop.f32.mrf.mxu1 }
 0x259   :  { %v1530_v52 = vpop.f32.mrf.mxu1  ;;  %v9013_v53 = vpop.f32.mrf.mxu0 }
 0x25a   :  { %v6821_v52 = vld [vmem:[%s10095_s28 + $0x6] ss:$0 sm:$0xff] }
 0x25b   :  { %v7623_v54 = vpop.f32.mrf.mxu1  ;;  %v7630_v55 = vpop.f32.mrf.mxu0 }
 0x25d   :  { %v1582_v56 = vpop.f32.mrf.mxu0  ;;  %v9015_v57 = vpop.f32.mrf.mxu1 }
 0x25f   :  { %v7631_v58 = vpop.f32.mrf.mxu0  ;;  %v7638_v59 = vpop.f32.mrf.mxu1 }
 0x261   :  { %v1634_v60 = vpop.f32.mrf.mxu1 }
 0x263   :  { %v7639_v61 = vpop.f32.mrf.mxu1 }
 0x2ee   :  { %v1702_v34 = vpop.f32.mrf.mxu0 }
 0x2ef   :  { %v2030_v63 = vmul.f32 0.35355338, %v1702_v34  ;;  %v6822_v34 = vld [vmem:[%s10095_s28 + $0x7] ss:$0 sm:$0xff] }
 0x2f0   :  { %v7644_v0 = vpop.f32.mrf.mxu0 }
 0x2f1   :  { %v9020_v1 = vadd.f32 %v6815_v62, %v2030_v63 }
 0x2f2   :  { %v1705_v2 = vpop.f32.mrf.mxu0  ;;  %v1748_v3 = vpop.f32.mrf.mxu1 }
 0x2f3   :  { %v2031_v5 = vmul.f32 0.35355338, %v1748_v3  ;;  %v2094_v6 = vsel %vm1661_vm2, %v9020_v1, -inf }
 0x2f4   :  { %2095 = vmax.xlane.f32.xlu0 %v2094_v6  ;;  %v7645_v7 = vpop.f32.mrf.mxu0  ;;  %v7650_v39 = vpop.f32.mrf.mxu1 }
 0x2f5   :  { %v9027_v8 = vadd.f32 %v6816_v4, %v2031_v5 }
 0x2f6   :  { %v1751_v9 = vpop.f32.mrf.mxu1  ;;  %v1794_v10 = vpop.f32.mrf.mxu0 }
 0x2f7   :  { %v2032_v12 = vmul.f32 0.35355338, %v1794_v10  ;;  %v2097_v13 = vsel %vm1661_vm2, %v9027_v8, -inf }
 0x2f8   :  { %v7656_v14 = vpop.f32.mrf.mxu0  ;;  %2098 = vmax.xlane.f32.xlu1 %v2097_v13  ;;  %v7651_v16 = vpop.f32.mrf.mxu1 }
 0x2f9   :  { %v2088_v17 = vadd.f32 %v6817_v11, %v2032_v12 }
 0x2fa   :  { %v1797_v18 = vpop.f32.mrf.mxu0  ;;  %v1840_v43 = vpop.f32.mrf.mxu1 }
 0x2fb   :  { %v2033_v20 = vmul.f32 0.35355338, %v1840_v43  ;;  %v2100_v22 = vsel %vm1661_vm2, %v2088_v17, -inf }
 0x2fc   :  { %2101 = vmax.xlane.f32.xlu0 %v2100_v22  ;;  %v7657_v23 = vpop.f32.mrf.mxu0  ;;  %v7662_v21 = vpop.f32.mrf.mxu1 }
 0x2fd   :  { %v2089_v24 = vadd.f32 %v6818_v19, %v2033_v20 }
 0x2fe   :  { %v1843_v26 = vpop.f32.mrf.mxu1  ;;  %v1886_v27 = vpop.f32.mrf.mxu0 }
 0x2ff   :  { %v2034_v30 = vmul.f32 0.35355338, %v1886_v27  ;;  %v2103_v32 = vsel %vm1661_vm2, %v2089_v24, -inf }
 0x300   :  { %v7668_v47 = vpop.f32.mrf.mxu0  ;;  %2104 = vmax.xlane.f32.xlu1 %v2103_v32  ;;  %v7663_v35 = vpop.f32.mrf.mxu1 }
 0x301   :  { %v2090_v37 = vadd.f32 %v6819_v28, %v2034_v30 }
 0x302   :  { %v1889_v38 = vpop.f32.mrf.mxu0  ;;  %v1932_v25 = vpop.f32.mrf.mxu1 }
 0x303   :  { %v2035_v42 = vmul.f32 0.35355338, %v1932_v25  ;;  %v2106_v44 = vsel %vm1661_vm2, %v2090_v37, -inf }
 0x304   :  { %2107 = vmax.xlane.f32.xlu0 %v2106_v44  ;;  %v7669_v46 = vpop.f32.mrf.mxu0  ;;  %v7674_v48 = vpop.f32.mrf.mxu1 }
 0x305   :  { %v2091_v49 = vadd.f32 %v6820_v41, %v2035_v42 }
 0x306   :  { %v1935_v51 = vpop.f32.mrf.mxu1  ;;  %v1978_v29 = vpop.f32.mrf.mxu0 }
 0x307   :  { %v2036_v54 = vmul.f32 0.35355338, %v1978_v29  ;;  %v2109_v55 = vsel %vm1661_vm2, %v2091_v49, -inf }
 0x308   :  { %v7680_v56 = vpop.f32.mrf.mxu0  ;;  %2110 = vmax.xlane.f32.xlu1 %v2109_v55  ;;  %v7675_v58 = vpop.f32.mrf.mxu1 }
 0x309   :  { %v2092_v59 = vadd.f32 %v6821_v52, %v2036_v54  ;;  %v6729_v58 = vld [vmem:[%s10074_s5 + $0x12] ss:$0 sm:$0xff] }
 0x30a   :  { %v1981_v60 = vpop.f32.mrf.mxu0  ;;  %v2024_v61 = vpop.f32.mrf.mxu1 }
 0x30b   :  { %v2037_v62 = vmul.f32 0.35355338, %v2024_v61  ;;  %v2112_v63 = vsel %vm1661_vm2, %v2092_v59, -inf  ;;  %v1372_v60 = vadd.f32 %v6729_v58, %v9000_v33  ;;  %v6730_v61 = vld [vmem:[%s10074_s5 + $0x13] ss:$0 sm:$0xff] }
 0x30c   :  { %2113 = vmax.xlane.f32.xlu0 %v2112_v63  ;;  %v7681_v0 = vpop.f32.mrf.mxu0  ;;  %v7686_v2 = vpop.f32.mrf.mxu1 }
 0x30d   :  { %v2093_v3 = vadd.f32 %v6822_v34, %v2037_v62  ;;  %v1655_v63 = vpack.c.bf16 %v1372_v60, %v1372_v60  ;;  %v1424_v0 = vadd.f32 %v6730_v61, %v9007_v40  ;;  %v6732_v40 = vld [vmem:[%s10074_s5 + $0x15] ss:$0 sm:$0xff]  ;;  %v2562_v60 = vld [vmem:[%s10075_s6 + $0xc] sm:$0xf] }
 0x30e   :  { %v2027_v4 = vpop.f32.mrf.mxu1 }
 0x30f   :  { %v2115_v5 = vsel %vm1661_vm2, %v2093_v3, -inf  ;;  %v2287_v33 = vsel %vm2193_vm3, %v1655_v63, 0  ;;  %v2717_v63 = vsel %vm2193_vm3, %v2562_v60, 0 }
 0x310   :  { %2116 = vmax.xlane.f32.xlu1 %v2115_v5  ;;  %v7687_v6 = vpop.f32.mrf.mxu1 }
 0x37d   :  { %v2096_v7 = vpop.xlane.xlu0 %2095 }
 0x37e   :  { %v2118_v39 = vsub.f32 %v9020_v1, %v2096_v7  ;;  %v1656_v7 = vpack.c.bf16 %v1424_v0, %v1424_v0 }
 0x380   :  { %v2126_v9 = vmul.f32 1.442695, %v2118_v39 }
 0x381   :  { %v2099_v10 = vpop.xlane.xlu1 %2098 }
 0x382   :  { %8349 = vpow2.f32 %v2126_v9  ;;  %v2119_v11 = vsub.f32 %v9027_v8, %v2099_v10 }
 0x384   :  { %v2128_v12 = vmul.f32 1.442695, %v2119_v11 }
 0x385   :  { %v2102_v13 = vpop.xlane.xlu0 %2101 }
 0x386   :  { %8351 = vpow2.f32 %v2128_v12  ;;  %v2120_v14 = vsub.f32 %v2088_v17, %v2102_v13  ;;  %v2333_v13 = vsel %vm2193_vm3, %v1656_v7, 0 }
 0x388   :  { %v2130_v16 = vmul.f32 1.442695, %v2120_v14  ;;  %v1528_v14 = vadd.f32 %v6732_v40, %v9011_v50 }
 0x389   :  { %v2105_v18 = vpop.xlane.xlu1 %2104 }
 0x38a   :  { %8353 = vpow2.f32 %v2130_v16  ;;  %v2121_v43 = vsub.f32 %v2089_v24, %v2105_v18  ;;  %v6733_v18 = vld [vmem:[%s10074_s5 + $0x16] ss:$0 sm:$0xff]  ;;  %v1658_v50 = vpack.c.bf16 %v1528_v14, %v1528_v14  ;;  %v2565_v14 = vld [vmem:[%s10075_s6 + $0x18] sm:$0xf] }
 0x38c   :  { %v2132_v19 = vmul.f32 1.442695, %v2121_v43 }
 0x38d   :  { %v2108_v20 = vpop.xlane.xlu0 %2107 }
 0x38e   :  { %8355 = vpow2.f32 %v2132_v19  ;;  %v2122_v22 = vsub.f32 %v2090_v37, %v2108_v20 }
 0x38f   :  { %v8350_v23 = vpop.eup %8349 }
 0x390   :  { %v2134_v21 = vmul.f32 1.442695, %v2122_v22  ;;  %v2142_v1 = vsel %vm1661_vm2, %v8350_v23, 0.0 }
 0x391   :  { %v2111_v26 = vpop.xlane.xlu1 %2110  ;;  %2143 = vadd.xlane.f32.xlu0 %v2142_v1  ;;  %v6734_v1 = vld [vmem:[%s10074_s5 + $0x17] ss:$0 sm:$0xff] }
 0x392   :  { %8357 = vpow2.f32 %v2134_v21  ;;  %v2123_v8 = vsub.f32 %v2091_v49, %v2111_v26 }
 0x393   :  { %v8352_v27 = vpop.eup %8351 }
 0x394   :  { %v2136_v28 = vmul.f32 1.442695, %v2123_v8  ;;  %v2145_v17 = vsel %vm1661_vm2, %v8352_v27, 0.0 }
 0x395   :  { %2146 = vadd.xlane.f32.xlu1 %v2145_v17  ;;  %v2114_v30 = vpop.xlane.xlu0 %2113  ;;  %v1632_v17 = vadd.f32 %v6734_v1, %v9015_v57 }
 0x396   :  { %8359 = vpow2.f32 %v2136_v28  ;;  %v2124_v24 = vsub.f32 %v2092_v59, %v2114_v30 }
 0x397   :  { %v8354_v32 = vpop.eup %8353 }
 0x398   :  { %v2138_v47 = vmul.f32 1.442695, %v2124_v24  ;;  %v2148_v35 = vsel %vm1661_vm2, %v8354_v32, 0.0 }
 0x399   :  { %v2117_v37 = vpop.xlane.xlu1 %2116  ;;  %2149 = vadd.xlane.f32.xlu0 %v2148_v35  ;;  %v1660_v35 = vpack.c.bf16 %v1632_v17, %v1632_v17 }
 0x39a   :  { %8361 = vpow2.f32 %v2138_v47  ;;  %v2125_v38 = vsub.f32 %v2093_v3, %v2117_v37  ;;  %v6731_v3 = vld [vmem:[%s10074_s5 + $0x14] ss:$0 sm:$0xff] }
 0x39b   :  { %v9060_v25 = vpop.eup %8355  ;;  %v1476_v39 = vadd.f32 %v6731_v3, %v9009_v45  ;;  %v2563_v3 = vld [vmem:[%s10075_s6 + $0x10] sm:$0xf] }
 0x39c   :  { %v2140_v41 = vmul.f32 1.442695, %v2125_v38  ;;  %v2151_v42 = vsel %vm1661_vm2, %v9060_v25, 0.0 }
 0x39d   :  { %2152 = vadd.xlane.f32.xlu1 %v2151_v42  ;;  %v1657_v45 = vpack.c.bf16 %v1476_v39, %v1476_v39 }
 0x39e   :  { %8363 = vpow2.f32 %v2140_v41 }
 0x39f   :  { %v9064_v44 = vpop.eup %8357  ;;  %v2379_v22 = vsel %vm2193_vm3, %v1657_v45, 0 }
 0x3a0   :  { %v2154_v46 = vsel %vm1661_vm2, %v9064_v44, 0.0 }
 0x3a1   :  { %2155 = vadd.xlane.f32.xlu0 %v2154_v46 }
 0x3a3   :  { %v9068_v48 = vpop.eup %8359 }
 0x3a4   :  { %v2157_v49 = vsel %vm1661_vm2, %v9068_v48, 0.0 }
 0x3a5   :  { %2158 = vadd.xlane.f32.xlu1 %v2157_v49  ;;  %v2559_v49 = vld [vmem:[%s10075_s6] sm:$0xf] }
 0x3a7   :  { %v9072_v51 = vpop.eup %8361 }
 0x3a8   :  { %v2160_v29 = vsel %vm1661_vm2, %v9072_v51, 0.0 }
 0x3a9   :  { %2161 = vadd.xlane.f32.xlu0 %v2160_v29  ;;  %v2560_v29 = vld [vmem:[%s10075_s6 + $0x4] sm:$0xf] }
 0x3ab   :  { %v9076_v52 = vpop.eup %8363 }
 0x3ac   :  { %v2163_v54 = vsel %vm1661_vm2, %v9076_v52, 0.0 }
 0x3ad   :  { %2164 = vadd.xlane.f32.xlu1 %v2163_v54  ;;  %v2561_v54 = vld [vmem:[%s10075_s6 + $0x8] sm:$0xf] }
 0x3ae   :  { %v2671_v58 = vsel %vm2193_vm3, %v2561_v54, 0 }
 0x41a   :  { %v2144_v55 = vpop.xlane.xlu0 %2143 }
 0x41b   :  { %8365 = vrcp.f32 %v2144_v55 }
 0x41e   :  { %v2147_v56 = vpop.xlane.xlu1 %2146 }
 0x41f   :  { %8367 = vrcp.f32 %v2147_v56 }
 0x422   :  { %v2150_v59 = vpop.xlane.xlu0 %2149 }
 0x423   :  { %8369 = vrcp.f32 %v2150_v59 }
 0x426   :  { %v2153_v34 = vpop.xlane.xlu1 %2152 }
 0x427   :  { %8371 = vrcp.f32 %v2153_v34 }
 0x428   :  { %v8366_v62 = vpop.eup %8365 }
 0x429   :  { %v2174_v2 = vmul.f32 %v8366_v62, %v8350_v23  ;;  %v1580_v23 = vadd.f32 %v6733_v18, %v9013_v53  ;;  %v2425_v53 = vsel %vm2193_vm3, %v1658_v50, 0  ;;  %v2566_v50 = vld [vmem:[%s10075_s6 + $0x1c] sm:$0xf] }
 0x42a   :  { %v2156_v4 = vpop.xlane.xlu0 %2155 }
 0x42b   :  { %8373 = vrcp.f32 %v2156_v4  ;;  %v2182_v5 = vpack.c.bf16 %v2174_v2, %v2174_v2  ;;  %v1659_v28 = vpack.c.bf16 %v1580_v23, %v1580_v23 }
 0x42c   :  { %v8368_v6 = vpop.eup %8367 }
 0x42d   :  { %7691 = vmatmul.mubr.msk.bf16.vlgmr.msra.gmra.mxu0 %vm1661_vm2, %v2182_v5  ;;  %v2175_v9 = vmul.f32 %v8368_v6, %v8352_v27  ;;  %v2471_v47 = vsel %vm2193_vm3, %v1659_v28, 0 }
 0x42e   :  { %7701 = vmatpush3.bf16.msra.mxu0 %v2287_v33  ;;  %v2159_v10 = vpop.xlane.xlu1 %2158  ;;  %7702 = vmatprep.mubr.msk.bf16.mxu0 %vm8468_vm1, %v8467_v15  ;;  %v2763_v33 = vsel %vm2193_vm3, %v2563_v3, 0 }
 0x42f   :  { %8375 = vrcp.f32 %v2159_v10  ;;  %v2183_v11 = vpack.c.bf16 %v2175_v9, %v2175_v9  ;;  %7712 = vmatprep.subr.bf16.mxu0 %v8467_v15  ;;  %v2564_v9 = vld [vmem:[%s10075_s6 + $0x14] sm:$0xf] }
 0x430   :  { %v8370_v12 = vpop.eup %8369 }
 0x431   :  { %7697 = vmatmul.mubr.msk.bf16.vlgmr.msra.gmra.mxu1 %vm1661_vm2, %v2183_v11  ;;  %v2176_v16 = vmul.f32 %v8370_v12, %v8354_v32  ;;  %v2809_v12 = vsel %vm2193_vm3, %v2564_v9, 0 }
 0x432   :  { %7707 = vmatpush3.bf16.msra.mxu1 %v2333_v13  ;;  %v2162_v43 = vpop.xlane.xlu0 %2161  ;;  %7708 = vmatprep.mubr.msk.bf16.mxu1 %vm8468_vm1, %v8467_v15 }
 0x433   :  { %8377 = vrcp.f32 %v2162_v43  ;;  %v2184_v19 = vpack.c.bf16 %v2176_v16, %v2176_v16  ;;  %7718 = vmatprep.subr.bf16.mxu1 %v8467_v15 }
 0x434   :  { %v8372_v20 = vpop.eup %8371 }
 0x435   :  { %7703 = vmatmul.mubr.msk.bf16.vlgmr.msra.gmra.mxu0 %vm1661_vm2, %v2184_v19  ;;  %v2177_v21 = vmul.f32 %v8372_v20, %v9060_v25  ;;  %v2517_v25 = vsel %vm2193_vm3, %v1660_v35, 0  ;;  %v2855_v19 = vsel %vm2193_vm3, %v2565_v14, 0 }
 0x436   :  { %7713 = vmatpush3.bf16.msra.mxu0 %v2379_v22  ;;  %v2165_v26 = vpop.xlane.xlu1 %2164  ;;  %7714 = vmatprep.mubr.msk.bf16.mxu0 %vm8468_vm1, %v8467_v15 }
 0x437   :  { %8379 = vrcp.f32 %v2165_v26  ;;  %v2185_v8 = vpack.c.bf16 %v2177_v21, %v2177_v21  ;;  %7724 = vmatprep.subr.bf16.mxu0 %v8467_v15  ;;  %v2901_v26 = vsel %vm2193_vm3, %v2566_v50, 0 }
 0x438   :  { %v8374_v27 = vpop.eup %8373 }
 0x439   :  { %7709 = vmatmul.mubr.msk.bf16.vlgmr.msra.gmra.mxu1 %vm1661_vm2, %v2185_v8  ;;  %v2178_v30 = vmul.f32 %v8374_v27, %v9064_v44 }
 0x43a   :  { %7719 = vmatpush3.bf16.msra.mxu1 %v2425_v53  ;;  %7720 = vmatprep.mubr.msk.bf16.mxu1 %vm8468_vm1, %v8467_v15 }
 0x43b   :  { %v2186_v24 = vpack.c.bf16 %v2178_v30, %v2178_v30  ;;  %7730 = vmatprep.subr.bf16.mxu1 %v8467_v15 }
 0x43c   :  { %v8376_v32 = vpop.eup %8375 }
 0x43d   :  { %7715 = vmatmul.mubr.msk.bf16.vlgmr.msra.gmra.mxu0 %vm1661_vm2, %v2186_v24  ;;  %v2179_v37 = vmul.f32 %v8376_v32, %v9068_v48 }
 0x43e   :  { %7725 = vmatpush3.bf16.msra.mxu0 %v2471_v47  ;;  %7726 = vmatprep.mubr.msk.bf16.mxu0 %vm8468_vm1, %v8467_v15 }
 0x43f   :  { %v2187_v57 = vpack.c.bf16 %v2179_v37, %v2179_v37  ;;  %7736 = vmatprep.subr.bf16.mxu0 %v8467_v15 }
 0x440   :  { %v8378_v38 = vpop.eup %8377 }
 0x441   :  { %7721 = vmatmul.mubr.msk.bf16.vlgmr.msra.gmra.mxu1 %vm1661_vm2, %v2187_v57  ;;  %v2180_v41 = vmul.f32 %v8378_v38, %v9072_v51  ;;  %v2579_v51 = vsel %vm2193_vm3, %v2559_v49, 0 }
 0x442   :  { %7731 = vmatpush3.bf16.msra.mxu1 %v2517_v25  ;;  %7732 = vmatprep.mubr.msk.bf16.mxu1 %vm8468_vm1, %v8467_v15 }
 0x443   :  { %v2188_v42 = vpack.c.bf16 %v2180_v41, %v2180_v41  ;;  %7742 = vmatprep.subr.bf16.mxu1 %v8467_v15 }
 0x444   :  { %v8380_v44 = vpop.eup %8379 }
 0x445   :  { %7727 = vmatmul.mubr.msk.bf16.vlgmr.msra.gmra.mxu0 %vm1661_vm2, %v2188_v42  ;;  %v2181_v46 = vmul.f32 %v8380_v44, %v9076_v52  ;;  %v2625_v52 = vsel %vm2193_vm3, %v2560_v29, 0 }
 0x446   :  { %7738 = vmatprep.mubr.msk.bf16.mxu0 %vm8468_vm1, %v8467_v15  ;;  %7737 = vmatpush3.bf16.msra.mxu0 %v2579_v51 }
 0x447   :  { %v2189_v48 = vpack.c.bf16 %v2181_v46, %v2181_v46  ;;  %7748 = vmatprep.subr.bf16.mxu0 %v8467_v15 }
 0x449   :  { %7733 = vmatmul.mubr.msk.bf16.vlgmr.msra.gmra.mxu1 %vm1661_vm2, %v2189_v48 }
 0x44a   :  { %7744 = vmatprep.mubr.msk.bf16.mxu1 %vm8468_vm1, %v8467_v15  ;;  %7743 = vmatpush3.bf16.msra.mxu1 %v2625_v52 }
 0x44b   :  { %7754 = vmatprep.subr.bf16.mxu1 %v8467_v15 }
 0x4ed   :  { %v2231_v55 = vpop.f32.mrf.mxu0 }
 0x4ee   :  { %v2567_v56 = vpack.c.bf16 %v2231_v55, %v2231_v55 }
 0x4ef   :  { %v7692_v59 = vpop.f32.mrf.mxu0 }
 0x4f0   :  { %7739 = vmatmul.mubr.msk.bf16.vlgmr.msra.gmra.mxu0 %vm1661_vm2, %v2567_v56 }
 0x4f1   :  { %v2234_v61 = vpop.f32.mrf.mxu0  ;;  %v2277_v34 = vpop.f32.mrf.mxu1  ;;  %7749 = vmatpush3.bf16.msra.mxu0 %v2671_v58  ;;  %7750 = vmatprep.mubr.msk.bf16.mxu0 %vm8468_vm1, %v8467_v15 }
 0x4f2   :  { %v2568_v62 = vpack.c.bf16 %v2277_v34, %v2277_v34  ;;  %7760 = vmatprep.subr.bf16.mxu0 %v8467_v15 }
 0x4f3   :  { %v7693_v0 = vpop.f32.mrf.mxu0  ;;  %v7698_v2 = vpop.f32.mrf.mxu1 }
 0x4f4   :  { %7745 = vmatmul.mubr.msk.bf16.vlgmr.msra.gmra.mxu1 %vm1661_vm2, %v2568_v62 }
 0x4f5   :  { %v2280_v4 = vpop.f32.mrf.mxu1  ;;  %v2323_v5 = vpop.f32.mrf.mxu0  ;;  %7755 = vmatpush3.bf16.msra.mxu1 %v2717_v63  ;;  %7756 = vmatprep.mubr.msk.bf16.mxu1 %vm8468_vm1, %v8467_v15 }
 0x4f6   :  { %v2569_v6 = vpack.c.bf16 %v2323_v5, %v2323_v5  ;;  %7766 = vmatprep.subr.bf16.mxu1 %v8467_v15 }
 0x4f7   :  { %v7699_v7 = vpop.f32.mrf.mxu1  ;;  %v7704_v39 = vpop.f32.mrf.mxu0 }
 0x4f8   :  { %7751 = vmatmul.mubr.msk.bf16.vlgmr.msra.gmra.mxu0 %vm1661_vm2, %v2569_v6 }
 0x4f9   :  { %v2326_v40 = vpop.f32.mrf.mxu0  ;;  %v2369_v10 = vpop.f32.mrf.mxu1  ;;  %7761 = vmatpush3.bf16.msra.mxu0 %v2763_v33  ;;  %7762 = vmatprep.mubr.msk.bf16.mxu0 %vm8468_vm1, %v8467_v15 }
 0x4fa   :  { %v2570_v11 = vpack.c.bf16 %v2369_v10, %v2369_v10  ;;  %7772 = vmatprep.subr.bf16.mxu0 %v8467_v15 }
 0x4fb   :  { %v7705_v13 = vpop.f32.mrf.mxu0  ;;  %v7710_v45 = vpop.f32.mrf.mxu1 }
 0x4fc   :  { %7757 = vmatmul.mubr.msk.bf16.vlgmr.msra.gmra.mxu1 %vm1661_vm2, %v2570_v11  ;;  %v6839_v13 = vld [vmem:[%s10076_s7] ss:$0 sm:$0xff] }
 0x4fd   :  { %v2372_v16 = vpop.f32.mrf.mxu1  ;;  %v2415_v18 = vpop.f32.mrf.mxu0  ;;  %7767 = vmatpush3.bf16.msra.mxu1 %v2809_v12  ;;  %7768 = vmatprep.mubr.msk.bf16.mxu1 %vm8468_vm1, %v8467_v15 }
 0x4fe   :  { %v2571_v43 = vpack.c.bf16 %v2415_v18, %v2415_v18  ;;  %7778 = vmatprep.subr.bf16.mxu1 %v8467_v15 }
 0x4ff   :  { %v7711_v20 = vpop.f32.mrf.mxu1  ;;  %v7716_v22 = vpop.f32.mrf.mxu0 }
 0x500   :  { %7763 = vmatmul.mubr.msk.bf16.vlgmr.msra.gmra.mxu0 %vm1661_vm2, %v2571_v43 }
 0x501   :  { %v2418_v23 = vpop.f32.mrf.mxu0  ;;  %v2461_v21 = vpop.f32.mrf.mxu1  ;;  %7773 = vmatpush3.bf16.msra.mxu0 %v2855_v19  ;;  %7774 = vmatprep.mubr.msk.bf16.mxu0 %vm8468_vm1, %v8467_v15 }
 0x502   :  { %v2572_v1 = vpack.c.bf16 %v2461_v21, %v2461_v21  ;;  %7784 = vmatprep.subr.bf16.mxu0 %v8467_v15 }
 0x503   :  { %v7717_v8 = vpop.f32.mrf.mxu0  ;;  %v7722_v27 = vpop.f32.mrf.mxu1 }
 0x504   :  { %7769 = vmatmul.mubr.msk.bf16.vlgmr.msra.gmra.mxu1 %vm1661_vm2, %v2572_v1 }
 0x505   :  { %v2464_v53 = vpop.f32.mrf.mxu1  ;;  %v2507_v28 = vpop.f32.mrf.mxu0  ;;  %7779 = vmatpush3.bf16.msra.mxu1 %v2901_v26  ;;  %7780 = vmatprep.mubr.msk.bf16.mxu1 %vm8468_vm1, %v8467_v15 }
 0x506   :  { %v2573_v17 = vpack.c.bf16 %v2507_v28, %v2507_v28  ;;  %7792 = vmatprep.subr.bf16.mxu1 %v8467_v15 }
 0x507   :  { %v7723_v30 = vpop.f32.mrf.mxu1  ;;  %v7728_v24 = vpop.f32.mrf.mxu0 }
 0x508   :  { %7775 = vmatmul.mubr.msk.bf16.vlgmr.msra.gmra.mxu0 %vm1661_vm2, %v2573_v17 }
 0x509   :  { %v2510_v32 = vpop.f32.mrf.mxu0  ;;  %v2553_v47 = vpop.f32.mrf.mxu1  ;;  %7788 = vmatprep.mubr.msk.bf16.mxu0 %vm8468_vm1, %v8467_v15 }
 0x50a   :  { %v2574_v35 = vpack.c.bf16 %v2553_v47, %v2553_v47 }
 0x50b   :  { %v7729_v37 = vpop.f32.mrf.mxu0  ;;  %v7734_v57 = vpop.f32.mrf.mxu1 }
 0x50c   :  { %7781 = vmatmul.mubr.msk.bf16.vlgmr.msra.gmra.mxu1 %vm1661_vm2, %v2574_v35 }
 0x50d   :  { %v2556_v38 = vpop.f32.mrf.mxu1  ;;  %7796 = vmatprep.mubr.msk.bf16.mxu1 %vm8468_vm1, %v8467_v15 }
 0x50f   :  { %v7735_v25 = vpop.f32.mrf.mxu1 }
 0x5b0   :  { %v2615_v41 = vpop.f32.mrf.mxu0 }
 0x5b1   :  { %v2943_v3 = vsel %vm65_vm0, %v2615_v41, 0.0 }
 0x5b2   :  { %v7740_v42 = vpop.f32.mrf.mxu0 }
 0x5b3   :  { %v8270_v42 = vld [vmem:[%s10079_s10] sm:$0xff]  }
 0x5b4   :  { %v2618_v44 = vpop.f32.mrf.mxu0  ;;  %v2661_v46 = vpop.f32.mrf.mxu1 }
 0x5b5   :  { %v2950_v10 = vsel %vm65_vm0, %v2661_v46, 0.0  ;;  %v8271_v44 = vld [vmem:[%s10079_s10 + $0x18] sm:$0xff]   ;;  %v8272_v46 = vld [vmem:[%s10079_s10 + $0x10] sm:$0xff]  }
 0x5b6   :  { %v7741_v48 = vpop.f32.mrf.mxu0  ;;  %v7746_v49 = vpop.f32.mrf.mxu1  ;;  %7793 = vmatpush3.bf16.msra.mxu1 %v8271_v44 }
 0x5b7   :  { %7794 = vmatprep.subr.bf16.mxu1 %v8467_v15 }
 0x5b8   :  { %v2664_v51 = vpop.f32.mrf.mxu1  ;;  %v2707_v29 = vpop.f32.mrf.mxu0 }
 0x5b9   :  { %v2944_v63 = vsel %vm65_vm0, %v2707_v29, 0.0 }
 0x5ba   :  { %v7747_v52 = vpop.f32.mrf.mxu1  ;;  %v7752_v54 = vpop.f32.mrf.mxu0  ;;  %v2945_v5 = vadd.f32 %v2944_v63, %v2943_v3  ;;  %7795 = vmatpush3.bf16.msra.mxu1 %v8272_v46 }
 0x5bb   :  { %7812 = vmatprep.subr.bf16.mxu1 %v8467_v15 }
 0x5bc   :  { %v2710_v55 = vpop.f32.mrf.mxu0  ;;  %v2753_v56 = vpop.f32.mrf.mxu1 }
 0x5bd   :  { %v2951_v7 = vsel %vm65_vm0, %v2753_v56, 0.0  ;;  %v6840_v56 = vld [vmem:[%s10077_s8] ss:$0 sm:$0xff] }
 0x5be   :  { %v7753_v58 = vpop.f32.mrf.mxu0  ;;  %v7758_v59 = vpop.f32.mrf.mxu1  ;;  %v2952_v45 = vadd.f32 %v2951_v7, %v2950_v10  ;;  %v8276_v7 = vld [vmem:[%s10081_s12 + $0x8] sm:$0xff]   ;;  %v6842_v10 = vld [vmem:[%s10080_s11] ss:$0 sm:$0xff] }
 0x5bf   :  { %v6841_v59 = vld [vmem:[%s10078_s9] ss:$0 sm:$0xff] }
 0x5c0   :  { %v2756_v60 = vpop.f32.mrf.mxu1  ;;  %v2799_v61 = vpop.f32.mrf.mxu0 }
 0x5c1   :  { %v2946_v4 = vsel %vm65_vm0, %v2799_v61, 0.0 }
 0x5c2   :  { %v7759_v34 = vpop.f32.mrf.mxu1  ;;  %v7764_v62 = vpop.f32.mrf.mxu0  ;;  %v2947_v39 = vadd.f32 %v2946_v4, %v2945_v5  ;;  %v8273_v4 = vld [vmem:[%s10081_s12 + $0x18] sm:$0xff]  }
 0x5c3   :  { %v8275_v5 = vld [vmem:[%s10081_s12 + $0x38] sm:$0xff]  }
 0x5c4   :  { %v2802_v0 = vpop.f32.mrf.mxu0  ;;  %v2845_v2 = vpop.f32.mrf.mxu1 }
 0x5c5   :  { %v2953_v11 = vsel %vm65_vm0, %v2845_v2, 0.0 }
 0x5c6   :  { %v7765_v6 = vpop.f32.mrf.mxu0  ;;  %v7770_v33 = vpop.f32.mrf.mxu1  ;;  %v2954_v43 = vadd.f32 %v2953_v11, %v2952_v45 }
 0x5c7   :  { %v8274_v6 = vld [vmem:[%s10081_s12 + $0x10] sm:$0xff]  }
 0x5c8   :  { %v2848_v9 = vpop.f32.mrf.mxu1  ;;  %v2891_v40 = vpop.f32.mrf.mxu0  ;;  %v8277_v33 = vld [vmem:[%s10081_s12 + $0x30] sm:$0xff]  }
 0x5c9   :  { %v2948_v12 = vsel %vm65_vm0, %v2891_v40, 0.0  ;;  %v8278_v9 = vld [vmem:[%s10081_s12] sm:$0xff]  }
 0x5ca   :  { %v2949_v14 = vadd.f32 %v2948_v12, %v2947_v39  ;;  %v7771_v16 = vpop.f32.mrf.mxu1  ;;  %v7776_v18 = vpop.f32.mrf.mxu0  ;;  %v8279_v39 = vld [vmem:[%s10081_s12 + $0x28] sm:$0xff]   ;;  %v8280_v40 = vld [vmem:[%s10081_s12 + $0x20] sm:$0xff]  }
 0x5cc   :  { %v2964_v19 = vadd.f32 %v6839_v13, %v2949_v14  ;;  %v2894_v20 = vpop.f32.mrf.mxu0  ;;  %v2937_v22 = vpop.f32.mrf.mxu1 }
 0x5cd   :  { %v2955_v50 = vsel %vm65_vm0, %v2937_v22, 0.0 }
 0x5ce   :  { %v2956_v23 = vadd.f32 %v2955_v50, %v2954_v43  ;;  %v7777_v21 = vpop.f32.mrf.mxu0  ;;  %v7782_v1 = vpop.f32.mrf.mxu1  ;;  %v2966_v26 = vadd.f32 %v2964_v19, %v8605_v31 }
 0x5d0   :  { %v2965_v8 = vadd.f32 %v6839_v13, %v2956_v23  ;;  %v2940_v27 = vpop.f32.mrf.mxu1  ;;  %v2970_v53 = vsel %vm65_vm0, %v2966_v26, 0.0 }
 0x5d1   :  { %2971 = vadd.xlane.f32.xlu0 %v2970_v53 }
 0x5d2   :  { %v7783_v28 = vpop.f32.mrf.mxu1  ;;  %v2967_v17 = vadd.f32 %v2965_v8, %v8614_v36  ;;  %v8269_v36 = vld [vmem:[%s10079_s10 + $0x8] sm:$0xff]  }
 0x5d3   :  { %7785 = vmatpush3.bf16.msra.mxu0 %v8269_v36 }
 0x5d4   :  { %v2973_v30 = vsel %vm65_vm0, %v2967_v17, 0.0  ;;  %7786 = vmatprep.subr.bf16.mxu0 %v8467_v15 }
 0x5d5   :  { %2974 = vadd.xlane.f32.xlu1 %v2973_v30 }
 0x5d7   :  { %7787 = vmatpush3.bf16.msra.mxu0 %v8270_v42 }
 0x5d8   :  { %7800 = vmatprep.subr.bf16.mxu0 %v8467_v15 }
 0x65a   :  { %v2972_v24 = vpop.xlane.xlu0 %2971 }
 0x65b   :  { %v2976_v32 = vmul.f32 0.03125, %v2972_v24 }
 0x65d   :  { %v2978_v47 = vsub.f32 %v2966_v26, %v2976_v32 }
 0x65e   :  { %v2975_v35 = vpop.xlane.xlu1 %2974 }
 0x65f   :  { %v2977_v37 = vmul.f32 0.03125, %v2975_v35  ;;  %v2980_v57 = vmul.f32 %v2978_v47, %v2978_v47 }
 0x661   :  { %v2979_v38 = vsub.f32 %v2967_v17, %v2977_v37  ;;  %v2982_v31 = vsel %vm65_vm0, %v2980_v57, 0.0 }
 0x662   :  { %2983 = vadd.xlane.f32.xlu0 %v2982_v31 }
 0x663   :  { %v2981_v25 = vmul.f32 %v2979_v38, %v2979_v38 }
 0x665   :  { %v2985_v41 = vsel %vm65_vm0, %v2981_v25, 0.0  ;;  %v6849_v25 = vld [vmem:[%s10082_s13] ss:$0 sm:$0xff] }
 0x666   :  { %2986 = vadd.xlane.f32.xlu1 %v2985_v41 }
 0x6eb   :  { %v2984_v48 = vpop.xlane.xlu0 %2983 }
 0x6ec   :  { %v2988_v49 = vmul.f32 0.03125, %v2984_v48 }
 0x6ee   :  { %v2990_v51 = vadd.f32 1e-12, %v2988_v49 }
 0x6ef   :  { %v2987_v29 = vpop.xlane.xlu1 %2986 }
 0x6f0   :  { %8381 = vrsqrt.f32 %v2990_v51  ;;  %v2989_v52 = vmul.f32 0.03125, %v2987_v29 }
 0x6f2   :  { %v2991_v54 = vadd.f32 1e-12, %v2989_v52 }
 0x6f4   :  { %8383 = vrsqrt.f32 %v2991_v54 }
 0x6fd   :  { %v8382_v55 = vpop.eup %8381 }
 0x6fe   :  { %v2994_v58 = vmul.f32 %v8382_v55, %v2978_v47 }
 0x700   :  { %v3002_v60 = vmul.f32 %v6840_v56, %v2994_v58 }
 0x701   :  { %v8384_v61 = vpop.eup %8383 }
 0x702   :  { %v2995_v34 = vmul.f32 %v8384_v61, %v2979_v38  ;;  %v9248_v62 = vadd.f32 %v6841_v59, %v3002_v60 }
 0x704   :  { %v3020_v63 = vpack.c.bf16 %v9248_v62, %v9248_v62  ;;  %v3003_v0 = vmul.f32 %v6840_v56, %v2995_v34 }
 0x706   :  { %7789 = vmatmul.mubr.msk.bf16.vlgmr.msra.gmra.mxu0 %vm65_vm0, %v3020_v63  ;;  %v9253_v2 = vadd.f32 %v6841_v59, %v3003_v0 }
 0x707   :  { %7808 = vmatprep.mubr.msk.bf16.mxu0 %vm8468_vm1, %v8467_v15  ;;  %7801 = vmatpush3.bf16.msra.mxu0 %v8273_v4 }
 0x708   :  { %v3021_v3 = vpack.c.bf16 %v9253_v2, %v9253_v2  ;;  %7802 = vmatprep.subr.bf16.mxu0 %v8467_v15 }
 0x70a   :  { %7797 = vmatmul.mubr.msk.bf16.vlgmr.msra.gmra.mxu1 %vm65_vm0, %v3021_v3 }
 0x70b   :  { %7820 = vmatprep.mubr.msk.bf16.mxu1 %vm8468_vm1, %v8467_v15  ;;  %7813 = vmatpush3.bf16.msra.mxu1 %v8275_v5 }
 0x70c   :  { %7814 = vmatprep.subr.bf16.mxu1 %v8467_v15  ;;  %7803 = vmatpush3.bf16.msra.mxu0 %v8274_v6  ;;  %v8282_v6 = vld [vmem:[%s10073_s4 + $0x180] sm:$0xff]  }
 0x70d   :  { %7804 = vmatprep.subr.bf16.mxu0 %v8467_v15 }
 0x70f   :  { %7815 = vmatpush3.bf16.msra.mxu1 %v8277_v33  ;;  %v8283_v33 = vld [vmem:[%s10073_s4 + $0x198] sm:$0xff]  }
 0x710   :  { %7816 = vmatprep.subr.bf16.mxu1 %v8467_v15  ;;  %7805 = vmatpush3.bf16.msra.mxu0 %v8276_v7  ;;  %v8284_v7 = vld [vmem:[%s10073_s4 + $0x190] sm:$0xff]  }
 0x711   :  { %7806 = vmatprep.subr.bf16.mxu0 %v8467_v15 }
 0x713   :  { %7817 = vmatpush3.bf16.msra.mxu1 %v8279_v39 }
 0x714   :  { %7818 = vmatprep.subr.bf16.mxu1 %v8467_v15  ;;  %7807 = vmatpush3.bf16.msra.mxu0 %v8278_v9 }
 0x715   :  { %7824 = vmatprep.subr.bf16.mxu0 %v8467_v15 }
 0x717   :  { %7819 = vmatpush3.bf16.msra.mxu1 %v8280_v40 }
 0x718   :  { %7832 = vmatprep.subr.bf16.mxu1 %v8467_v15 }
 0x7c6   :  { %v3078_v11 = vpop.f32.mrf.mxu0 }
 0x7c7   :  { %v3079_v12 = vadd.f32 %v6842_v10, %v3078_v11 }
 0x7c8   :  { %v7790_v13 = vpop.f32.mrf.mxu0 }
 0x7c9   :  { %v3141_v45 = vmul.f32 0.044715, %v3079_v12  ;;  %v3139_v30 = vmul.f32 0.5, %v3079_v12 }
 0x7ca   :  { %v3081_v14 = vpop.f32.mrf.mxu0  ;;  %v3133_v16 = vpop.f32.mrf.mxu1 }
 0x7cb   :  { %v3143_v18 = vmul.f32 %v3141_v45, %v3079_v12  ;;  %v3134_v43 = vadd.f32 %v6842_v10, %v3133_v16  ;;  %v6860_v45 = vld [vmem:[%s10083_s14] ss:$0 sm:$0xff] }
 0x7cc   :  { %v7791_v19 = vpop.f32.mrf.mxu0  ;;  %v7798_v20 = vpop.f32.mrf.mxu1  ;;  %v6861_v16 = vld [vmem:[%s10084_s15] ss:$0 sm:$0xff] }
 0x7cd   :  { %v3145_v22 = vmul.f32 %v3143_v18, %v3079_v12  ;;  %v3142_v50 = vmul.f32 0.044715, %v3134_v43  ;;  %v3140_v35 = vmul.f32 0.5, %v3134_v43 }
 0x7ce   :  { %v3136_v23 = vpop.f32.mrf.mxu1 }
 0x7cf   :  { %v3147_v21 = vadd.f32 %v3145_v22, %v3079_v12  ;;  %v3144_v1 = vmul.f32 %v3142_v50, %v3134_v43  ;;  %v8285_v22 = vld [vmem:[%s10073_s4 + $0x1a8] sm:$0xff]  }
 0x7d0   :  { %v7799_v26 = vpop.f32.mrf.mxu1 }
 0x7d1   :  { %v3149_v8 = vmul.f32 0.7978846, %v3147_v21  ;;  %v3146_v27 = vmul.f32 %v3144_v1, %v3134_v43  ;;  %v8286_v1 = vld [vmem:[%s10073_s4 + $0x1a0] sm:$0xff]   ;;  %v8287_v26 = vld [vmem:[%s10073_s4 + $0x1b8] sm:$0xff]  }
 0x7d3   :  { %8385 = vtanh.f32 %v3149_v8  ;;  %v3148_v53 = vadd.f32 %v3146_v27, %v3134_v43  ;;  %v8288_v27 = vld [vmem:[%s10073_s4 + $0x1b0] sm:$0xff]  }
 0x7d5   :  { %v3150_v28 = vmul.f32 0.7978846, %v3148_v53  ;;  %v8289_v53 = vld [vmem:[%s10073_s4 + $0x1c8] sm:$0xff]  }
 0x7d7   :  { %8387 = vtanh.f32 %v3150_v28  ;;  %v8290_v28 = vld [vmem:[%s10073_s4 + $0x1c0] sm:$0xff]  }
 0x7e0   :  { %v8386_v17 = vpop.eup %8385 }
 0x7e1   :  { %v3153_v24 = vadd.f32 1.0, %v8386_v17  ;;  %v8291_v17 = vld [vmem:[%s10073_s4 + $0x1d8] sm:$0xff]  }
 0x7e3   :  { %v3155_v32 = vmul.f32 %v3153_v24, %v3139_v30  ;;  %v8292_v30 = vld [vmem:[%s10073_s4 + $0x1d0] sm:$0xff]   ;;  %v8293_v24 = vld [vmem:[%s10073_s4 + $0x1e8] sm:$0xff]  }
 0x7e4   :  { %v8388_v47 = vpop.eup %8387 }
 0x7e5   :  { %v3173_v37 = vpack.c.bf16 %v3155_v32, %v3155_v32  ;;  %v3154_v57 = vadd.f32 1.0, %v8388_v47  ;;  %v8294_v32 = vld [vmem:[%s10073_s4 + $0x1e0] sm:$0xff]   ;;  %v8295_v47 = vld [vmem:[%s10073_s4 + $0x1f8] sm:$0xff]  }
 0x7e7   :  { %7809 = vmatmul.mubr.msk.bf16.vlgmr.msra.gmra.mxu0 %vm3206_vm4, %v3173_v37  ;;  %v3156_v38 = vmul.f32 %v3154_v57, %v3140_v35  ;;  %v8296_v35 = vld [vmem:[%s10073_s4 + $0x1f0] sm:$0xff]   ;;  %v8297_v37 = vld [vmem:[%s10073_s4 + $0x208] sm:$0xff]   ;;  %v8298_v57 = vld [vmem:[%s10073_s4 + $0x200] sm:$0xff]  }
 0x7e8   :  { %7828 = vmatprep.mubr.msk.bf16.mxu0 %vm8468_vm1, %v8467_v15 }
 0x7e9   :  { %v3174_v31 = vpack.c.bf16 %v3156_v38, %v3156_v38  ;;  %v8299_v38 = vld [vmem:[%s10073_s4 + $0x218] sm:$0xff]  }
 0x7eb   :  { %7821 = vmatmul.mubr.msk.bf16.vlgmr.msra.gmra.mxu1 %vm3206_vm4, %v3174_v31  ;;  %v8300_v31 = vld [vmem:[%s10073_s4 + $0x210] sm:$0xff]  }
 0x7ec   :  { %7836 = vmatprep.mubr.msk.bf16.mxu1 %vm8468_vm1, %v8467_v15  ;;  %7833 = vmatpush3.bf16.msra.mxu1 %v8283_v33  ;;  %v8328_v33 = vld [vmem:[%s10073_s4 + $0x2f0] sm:$0xff]  }
 0x7ed   :  { %7834 = vmatprep.subr.bf16.mxu1 %v8467_v15 }
 0x7f0   :  { %7835 = vmatpush3.bf16.msra.mxu1 %v8284_v7 }
 0x7f1   :  { %7848 = vmatprep.subr.bf16.mxu1 %v8467_v15 }
 0x8a7   :  { %v3244_v41 = vpop.f32.mrf.mxu0 }
 0x8a8   :  { %v3245_v36 = vadd.f32 %v6849_v25, %v3244_v41  ;;  %v8302_v41 = vld [vmem:[%s10073_s4 + $0x220] sm:$0xff]  }
 0x8a9   :  { %v7810_v42 = vpop.f32.mrf.mxu0 }
 0x8aa   :  { %v3317_v44 = vadd.f32 %v3245_v36, %v9248_v62  ;;  %v8303_v36 = vld [vmem:[%s10073_s4 + $0x238] sm:$0xff]   ;;  %v8304_v42 = vld [vmem:[%s10073_s4 + $0x230] sm:$0xff]  }
 0x8ab   :  { %v3247_v46 = vpop.f32.mrf.mxu0  ;;  %v3311_v48 = vpop.f32.mrf.mxu1 }
 0x8ac   :  { %v3312_v49 = vadd.f32 %v6849_v25, %v3311_v48  ;;  %v3321_v51 = vsel %vm65_vm0, %v3317_v44, 0.0  ;;  %v8301_v25 = vld [vmem:[%s10073_s4 + $0x228] sm:$0xff]   ;;  %v8306_v46 = vld [vmem:[%s10073_s4 + $0x240] sm:$0xff]   ;;  %v8307_v48 = vld [vmem:[%s10073_s4 + $0x258] sm:$0xff]  }
 0x8ad   :  { %v7822_v29 = vpop.f32.mrf.mxu1  ;;  %3322 = vadd.xlane.f32.xlu0 %v3321_v51  ;;  %v7811_v52 = vpop.f32.mrf.mxu0  ;;  %v8309_v51 = vld [vmem:[%s10073_s4 + $0x268] sm:$0xff]  }
 0x8ae   :  { %v3318_v54 = vadd.f32 %v3312_v49, %v9253_v2  ;;  %v8281_v2 = vld [vmem:[%s10073_s4 + $0x188] sm:$0xff]   ;;  %v8308_v49 = vld [vmem:[%s10073_s4 + $0x250] sm:$0xff]   ;;  %v8310_v29 = vld [vmem:[%s10073_s4 + $0x260] sm:$0xff]  }
 0x8af   :  { %v3314_v55 = vpop.f32.mrf.mxu1  ;;  %7825 = vmatpush3.bf16.msra.mxu0 %v8281_v2  ;;  %v8311_v52 = vld [vmem:[%s10073_s4 + $0x278] sm:$0xff]   ;;  %v8326_v2 = vld [vmem:[%s10073_s4 + $0x2e0] sm:$0xff]  }
 0x8b0   :  { %v3324_v56 = vsel %vm65_vm0, %v3318_v54, 0.0  ;;  %7826 = vmatprep.subr.bf16.mxu0 %v8467_v15  ;;  %v8313_v55 = vld [vmem:[%s10073_s4 + $0x288] sm:$0xff]  }
 0x8b1   :  { %3325 = vadd.xlane.f32.xlu1 %v3324_v56  ;;  %v7823_v58 = vpop.f32.mrf.mxu1  ;;  %v8314_v56 = vld [vmem:[%s10073_s4 + $0x280] sm:$0xff]  }
 0x8b2   :  { %v8315_v58 = vld [vmem:[%s10073_s4 + $0x298] sm:$0xff]  }
 0x8b3   :  { %7827 = vmatpush3.bf16.msra.mxu0 %v8282_v6  ;;  %v8327_v6 = vld [vmem:[%s10073_s4 + $0x2f8] sm:$0xff]  }
 0x8b4   :  { %7840 = vmatprep.subr.bf16.mxu0 %v8467_v15 }
 0x936   :  { %v3323_v59 = vpop.xlane.xlu0 %3322 }
 0x937   :  { %v3327_v60 = vmul.f32 0.03125, %v3323_v59  ;;  %v8316_v59 = vld [vmem:[%s10073_s4 + $0x290] sm:$0xff]  }
 0x939   :  { %v3329_v61 = vsub.f32 %v3317_v44, %v3327_v60  ;;  %v8305_v44 = vld [vmem:[%s10073_s4 + $0x248] sm:$0xff]  }
 0x93a   :  { %v3326_v34 = vpop.xlane.xlu1 %3325  ;;  %v8317_v60 = vld [vmem:[%s10073_s4 + $0x2a8] sm:$0xff]  }
 0x93b   :  { %v3328_v62 = vmul.f32 0.03125, %v3326_v34  ;;  %v3331_v63 = vmul.f32 %v3329_v61, %v3329_v61  ;;  %v8319_v34 = vld [vmem:[%s10073_s4 + $0x2b8] sm:$0xff]  }
 0x93d   :  { %v3330_v0 = vsub.f32 %v3318_v54, %v3328_v62  ;;  %v3333_v3 = vsel %vm65_vm0, %v3331_v63, 0.0  ;;  %v8312_v54 = vld [vmem:[%s10073_s4 + $0x270] sm:$0xff]   ;;  %v8321_v63 = vld [vmem:[%s10073_s4 + $0x2c8] sm:$0xff]  }
 0x93e   :  { %3334 = vadd.xlane.f32.xlu0 %v3333_v3  ;;  %v8320_v62 = vld [vmem:[%s10073_s4 + $0x2b0] sm:$0xff]   ;;  %v8323_v3 = vld [vmem:[%s10073_s4 + $0x2d8] sm:$0xff]  }
 0x93f   :  { %v3332_v4 = vmul.f32 %v3330_v0, %v3330_v0 }
 0x941   :  { %v3336_v5 = vsel %vm65_vm0, %v3332_v4, 0.0  ;;  %v8324_v4 = vld [vmem:[%s10073_s4 + $0x2d0] sm:$0xff]  }
 0x942   :  { %3337 = vadd.xlane.f32.xlu1 %v3336_v5  ;;  %v8325_v5 = vld [vmem:[%s10073_s4 + $0x2e8] sm:$0xff]  }
 0x9c7   :  { %v3335_v39 = vpop.xlane.xlu0 %3334 }
 0x9c8   :  { %v3339_v9 = vmul.f32 0.03125, %v3335_v39 }
 0x9ca   :  { %v3341_v40 = vadd.f32 1e-12, %v3339_v9 }
 0x9cb   :  { %v3338_v10 = vpop.xlane.xlu1 %3337 }
 0x9cc   :  { %8389 = vrsqrt.f32 %v3341_v40  ;;  %v3340_v11 = vmul.f32 0.03125, %v3338_v10 }
 0x9ce   :  { %v3342_v12 = vadd.f32 1e-12, %v3340_v11 }
 0x9d0   :  { %8391 = vrsqrt.f32 %v3342_v12 }
 0x9d9   :  { %v8390_v13 = vpop.eup %8389 }
 0x9da   :  { %v3345_v14 = vmul.f32 %v8390_v13, %v3329_v61  ;;  %v8318_v61 = vld [vmem:[%s10073_s4 + $0x2a0] sm:$0xff]  }
 0x9dc   :  { %v3353_v18 = vmul.f32 %v6860_v45, %v3345_v14 }
 0x9dd   :  { %v8392_v43 = vpop.eup %8391 }
 0x9de   :  { %v9334_v19 = vadd.f32 %v6861_v16, %v3353_v18  ;;  %v3346_v20 = vmul.f32 %v8392_v43, %v3330_v0  ;;  %v8322_v0 = vld [vmem:[%s10073_s4 + $0x2c0] sm:$0xff]  }
 0x9e0   :  { %v9341_v50 = vpack.c.bf16 %v9334_v19, %v9334_v19  ;;  %v3354_v23 = vmul.f32 %v6860_v45, %v3346_v20 }
 0x9e2   :  { %v9343_v21 = vadd.f32 %v6861_v16, %v3354_v23  ;;  %7829 = vmatmul.mubr.msk.bf16.vlgmr.msra.gmra.mxu0 %vm65_vm0, %v9341_v50 }
 0x9e3   :  { %7841 = vmatpush3.bf16.msra.mxu0 %v8285_v22  ;;  %7844 = vmatprep.mubr.msk.bf16.mxu0 %vm8468_vm1, %v8467_v15 }
 0x9e4   :  { %v9357_v8 = vpack.c.bf16 %v9343_v21, %v9343_v21  ;;  %7842 = vmatprep.subr.bf16.mxu0 %v8467_v15 }
 0x9e6   :  { %7837 = vmatmul.mubr.msk.bf16.vlgmr.msra.gmra.mxu1 %vm65_vm0, %v9357_v8 }
 0x9e7   :  { %7843 = vmatpush3.bf16.msra.mxu0 %v8286_v1  ;;  %7849 = vmatpush3.bf16.msra.mxu1 %v8287_v26 }
 0x9e8   :  { %7850 = vmatprep.subr.bf16.mxu1 %v8467_v15  ;;  %7856 = vmatprep.subr.bf16.mxu0 %v8467_v15 }
 0x9e9   :  { %7852 = vmatprep.mubr.msk.bf16.mxu1 %vm8468_vm1, %v8467_v15 }
 0x9ea   :  { %7845 = vmatmul.mubr.msk.bf16.vlgmr.msra.gmra.mxu0 %vm65_vm0, %v9341_v50 }
 0x9eb   :  { %7851 = vmatpush3.bf16.msra.mxu1 %v8288_v27  ;;  %7857 = vmatpush3.bf16.msra.mxu0 %v8289_v53 }
 0x9ec   :  { %7858 = vmatprep.subr.bf16.mxu0 %v8467_v15  ;;  %7864 = vmatprep.subr.bf16.mxu1 %v8467_v15 }
 0x9ed   :  { %7860 = vmatprep.mubr.msk.bf16.mxu0 %vm8468_vm1, %v8467_v15 }
 0x9ee   :  { %7853 = vmatmul.mubr.msk.bf16.vlgmr.msra.gmra.mxu1 %vm65_vm0, %v9357_v8 }
 0x9ef   :  { %7859 = vmatpush3.bf16.msra.mxu0 %v8290_v28  ;;  %7865 = vmatpush3.bf16.msra.mxu1 %v8291_v17 }
 0x9f0   :  { %7866 = vmatprep.subr.bf16.mxu1 %v8467_v15  ;;  %7872 = vmatprep.subr.bf16.mxu0 %v8467_v15 }
 0x9f1   :  { %7868 = vmatprep.mubr.msk.bf16.mxu1 %vm8468_vm1, %v8467_v15 }
 0x9f2   :  { %7861 = vmatmul.mubr.msk.bf16.vlgmr.msra.gmra.mxu0 %vm65_vm0, %v9341_v50 }
 0x9f3   :  { %7867 = vmatpush3.bf16.msra.mxu1 %v8292_v30  ;;  %7873 = vmatpush3.bf16.msra.mxu0 %v8293_v24 }
 0x9f4   :  { %7874 = vmatprep.subr.bf16.mxu0 %v8467_v15  ;;  %7880 = vmatprep.subr.bf16.mxu1 %v8467_v15 }
 0x9f5   :  { %7876 = vmatprep.mubr.msk.bf16.mxu0 %vm8468_vm1, %v8467_v15 }
 0x9f6   :  { %7869 = vmatmul.mubr.msk.bf16.vlgmr.msra.gmra.mxu1 %vm65_vm0, %v9357_v8 }
 0x9f7   :  { %7875 = vmatpush3.bf16.msra.mxu0 %v8294_v32  ;;  %7881 = vmatpush3.bf16.msra.mxu1 %v8295_v47 }
 0x9f8   :  { %7882 = vmatprep.subr.bf16.mxu1 %v8467_v15  ;;  %7888 = vmatprep.subr.bf16.mxu0 %v8467_v15 }
 0x9f9   :  { %7884 = vmatprep.mubr.msk.bf16.mxu1 %vm8468_vm1, %v8467_v15 }
 0x9fa   :  { %7877 = vmatmul.mubr.msk.bf16.vlgmr.msra.gmra.mxu0 %vm65_vm0, %v9341_v50 }
 0x9fb   :  { %7883 = vmatpush3.bf16.msra.mxu1 %v8296_v35  ;;  %7889 = vmatpush3.bf16.msra.mxu0 %v8297_v37 }
 0x9fc   :  { %7890 = vmatprep.subr.bf16.mxu0 %v8467_v15  ;;  %7896 = vmatprep.subr.bf16.mxu1 %v8467_v15 }
 0x9fd   :  { %7892 = vmatprep.mubr.msk.bf16.mxu0 %vm8468_vm1, %v8467_v15 }
 0x9fe   :  { %7885 = vmatmul.mubr.msk.bf16.vlgmr.msra.gmra.mxu1 %vm65_vm0, %v9357_v8 }
 0x9ff   :  { %7891 = vmatpush3.bf16.msra.mxu0 %v8298_v57  ;;  %7897 = vmatpush3.bf16.msra.mxu1 %v8299_v38  ;;  %v6990_v57 = vld [vmem:[%s10074_s5 + $0x20] ss:$0 sm:$0xff] }
 0xa00   :  { %7898 = vmatprep.subr.bf16.mxu1 %v8467_v15  ;;  %7904 = vmatprep.subr.bf16.mxu0 %v8467_v15 }
 0xa01   :  { %7900 = vmatprep.mubr.msk.bf16.mxu1 %vm8468_vm1, %v8467_v15 }
 0xa02   :  { %7893 = vmatmul.mubr.msk.bf16.vlgmr.msra.gmra.mxu0 %vm65_vm0, %v9341_v50 }
 0xa03   :  { %7899 = vmatpush3.bf16.msra.mxu1 %v8300_v31  ;;  %7905 = vmatpush3.bf16.msra.mxu0 %v8301_v25 }
 0xa04   :  { %7906 = vmatprep.subr.bf16.mxu0 %v8467_v15  ;;  %7912 = vmatprep.subr.bf16.mxu1 %v8467_v15 }
 0xa05   :  { %7908 = vmatprep.mubr.msk.bf16.mxu0 %vm8468_vm1, %v8467_v15 }
 0xa06   :  { %7901 = vmatmul.mubr.msk.bf16.vlgmr.msra.gmra.mxu1 %vm65_vm0, %v9357_v8 }
 0xa07   :  { %7907 = vmatpush3.bf16.msra.mxu0 %v8302_v41  ;;  %7913 = vmatpush3.bf16.msra.mxu1 %v8303_v36 }
 0xa08   :  { %7914 = vmatprep.subr.bf16.mxu1 %v8467_v15  ;;  %7920 = vmatprep.subr.bf16.mxu0 %v8467_v15 }
 0xa09   :  { %7916 = vmatprep.mubr.msk.bf16.mxu1 %vm8468_vm1, %v8467_v15 }
 0xa0a   :  { %7909 = vmatmul.mubr.msk.bf16.vlgmr.msra.gmra.mxu0 %vm65_vm0, %v9341_v50 }
 0xa0b   :  { %7915 = vmatpush3.bf16.msra.mxu1 %v8304_v42  ;;  %7921 = vmatpush3.bf16.msra.mxu0 %v8305_v44  ;;  %v6991_v42 = vld [vmem:[%s10074_s5 + $0x21] ss:$0 sm:$0xff] }
 0xa0c   :  { %7922 = vmatprep.subr.bf16.mxu0 %v8467_v15  ;;  %7928 = vmatprep.subr.bf16.mxu1 %v8467_v15 }
 0xa0d   :  { %7924 = vmatprep.mubr.msk.bf16.mxu0 %vm8468_vm1, %v8467_v15 }
 0xa0e   :  { %7917 = vmatmul.mubr.msk.bf16.vlgmr.msra.gmra.mxu1 %vm65_vm0, %v9357_v8 }
 0xa0f   :  { %7923 = vmatpush3.bf16.msra.mxu0 %v8306_v46  ;;  %7929 = vmatpush3.bf16.msra.mxu1 %v8307_v48  ;;  %v6982_v46 = vld [vmem:[%s10074_s5 + $0x18] ss:$0 sm:$0xff] }
 0xa10   :  { %7930 = vmatprep.subr.bf16.mxu1 %v8467_v15  ;;  %7936 = vmatprep.subr.bf16.mxu0 %v8467_v15 }
 0xa11   :  { %7932 = vmatprep.mubr.msk.bf16.mxu1 %vm8468_vm1, %v8467_v15 }
 0xa12   :  { %7925 = vmatmul.mubr.msk.bf16.vlgmr.msra.gmra.mxu0 %vm65_vm0, %v9341_v50 }
 0xa13   :  { %7931 = vmatpush3.bf16.msra.mxu1 %v8308_v49  ;;  %7937 = vmatpush3.bf16.msra.mxu0 %v8309_v51 }
 0xa14   :  { %7938 = vmatprep.subr.bf16.mxu0 %v8467_v15  ;;  %7944 = vmatprep.subr.bf16.mxu1 %v8467_v15 }
 0xa15   :  { %7940 = vmatprep.mubr.msk.bf16.mxu0 %vm8468_vm1, %v8467_v15 }
 0xa16   :  { %7933 = vmatmul.mubr.msk.bf16.vlgmr.msra.gmra.mxu1 %vm65_vm0, %v9357_v8 }
 0xa17   :  { %7939 = vmatpush3.bf16.msra.mxu0 %v8310_v29  ;;  %7945 = vmatpush3.bf16.msra.mxu1 %v8311_v52 }
 0xa18   :  { %7946 = vmatprep.subr.bf16.mxu1 %v8467_v15  ;;  %7952 = vmatprep.subr.bf16.mxu0 %v8467_v15 }
 0xa19   :  { %7948 = vmatprep.mubr.msk.bf16.mxu1 %vm8468_vm1, %v8467_v15 }
 0xa1a   :  { %7941 = vmatmul.mubr.msk.bf16.vlgmr.msra.gmra.mxu0 %vm65_vm0, %v9341_v50 }
 0xa1b   :  { %7947 = vmatpush3.bf16.msra.mxu1 %v8312_v54  ;;  %7953 = vmatpush3.bf16.msra.mxu0 %v8313_v55  ;;  %v6992_v55 = vld [vmem:[%s10074_s5 + $0x22] ss:$0 sm:$0xff] }
 0xa1c   :  { %7954 = vmatprep.subr.bf16.mxu0 %v8467_v15  ;;  %7960 = vmatprep.subr.bf16.mxu1 %v8467_v15 }
 0xa1d   :  { %7956 = vmatprep.mubr.msk.bf16.mxu0 %vm8468_vm1, %v8467_v15 }
 0xa1e   :  { %7949 = vmatmul.mubr.msk.bf16.vlgmr.msra.gmra.mxu1 %vm65_vm0, %v9357_v8 }
 0xa1f   :  { %7955 = vmatpush3.bf16.msra.mxu0 %v8314_v56  ;;  %7961 = vmatpush3.bf16.msra.mxu1 %v8315_v58 }
 0xa20   :  { %7962 = vmatprep.subr.bf16.mxu1 %v8467_v15  ;;  %7968 = vmatprep.subr.bf16.mxu0 %v8467_v15 }
 0xa21   :  { %7964 = vmatprep.mubr.msk.bf16.mxu1 %vm8468_vm1, %v8467_v15 }
 0xa22   :  { %7957 = vmatmul.mubr.msk.bf16.vlgmr.msra.gmra.mxu0 %vm65_vm0, %v9341_v50 }
 0xa23   :  { %7963 = vmatpush3.bf16.msra.mxu1 %v8316_v59  ;;  %7969 = vmatpush3.bf16.msra.mxu0 %v8317_v60  ;;  %v6983_v59 = vld [vmem:[%s10074_s5 + $0x19] ss:$0 sm:$0xff] }
 0xa24   :  { %7970 = vmatprep.subr.bf16.mxu0 %v8467_v15  ;;  %7976 = vmatprep.subr.bf16.mxu1 %v8467_v15 }
 0xa25   :  { %7972 = vmatprep.mubr.msk.bf16.mxu0 %vm8468_vm1, %v8467_v15 }
 0xa26   :  { %7965 = vmatmul.mubr.msk.bf16.vlgmr.msra.gmra.mxu1 %vm65_vm0, %v9357_v8 }
 0xa27   :  { %7971 = vmatpush3.bf16.msra.mxu0 %v8318_v61  ;;  %7977 = vmatpush3.bf16.msra.mxu1 %v8319_v34 }
 0xa28   :  { %7978 = vmatprep.subr.bf16.mxu1 %v8467_v15  ;;  %7984 = vmatprep.subr.bf16.mxu0 %v8467_v15 }
 0xa29   :  { %7980 = vmatprep.mubr.msk.bf16.mxu1 %vm8468_vm1, %v8467_v15 }
 0xa2a   :  { %7973 = vmatmul.mubr.msk.bf16.vlgmr.msra.gmra.mxu0 %vm65_vm0, %v9341_v50 }
 0xa2b   :  { %7979 = vmatpush3.bf16.msra.mxu1 %v8320_v62  ;;  %7985 = vmatpush3.bf16.msra.mxu0 %v8321_v63 }
 0xa2c   :  { %7986 = vmatprep.subr.bf16.mxu0 %v8467_v15  ;;  %7992 = vmatprep.subr.bf16.mxu1 %v8467_v15 }
 0xa2d   :  { %7988 = vmatprep.mubr.msk.bf16.mxu0 %vm8468_vm1, %v8467_v15 }
 0xa2e   :  { %7981 = vmatmul.mubr.msk.bf16.vlgmr.msra.gmra.mxu1 %vm65_vm0, %v9357_v8 }
 0xa2f   :  { %7987 = vmatpush3.bf16.msra.mxu0 %v8322_v0  ;;  %7993 = vmatpush3.bf16.msra.mxu1 %v8323_v3  ;;  %v6993_v3 = vld [vmem:[%s10074_s5 + $0x23] ss:$0 sm:$0xff] }
 0xa30   :  { %7994 = vmatprep.subr.bf16.mxu1 %v8467_v15  ;;  %8000 = vmatprep.subr.bf16.mxu0 %v8467_v15 }
 0xa31   :  { %7996 = vmatprep.mubr.msk.bf16.mxu1 %vm8468_vm1, %v8467_v15 }
 0xa32   :  { %7989 = vmatmul.mubr.msk.bf16.vlgmr.msra.gmra.mxu0 %vm65_vm0, %v9341_v50 }
 0xa33   :  { %7995 = vmatpush3.bf16.msra.mxu1 %v8324_v4  ;;  %8001 = vmatpush3.bf16.msra.mxu0 %v8325_v5 }
 0xa34   :  { %8002 = vmatprep.subr.bf16.mxu0 %v8467_v15  ;;  %8008 = vmatprep.subr.bf16.mxu1 %v8467_v15 }
 0xa35   :  { %8004 = vmatprep.mubr.msk.bf16.mxu0 %vm8468_vm1, %v8467_v15 }
 0xa36   :  { %7997 = vmatmul.mubr.msk.bf16.vlgmr.msra.gmra.mxu1 %vm65_vm0, %v9357_v8 }
 0xa37   :  { %8003 = vmatpush3.bf16.msra.mxu0 %v8326_v2  ;;  %8009 = vmatpush3.bf16.msra.mxu1 %v8327_v6  ;;  %v6984_v6 = vld [vmem:[%s10074_s5 + $0x1a] ss:$0 sm:$0xff] }
 0xa38   :  { %8010 = vmatprep.subr.bf16.mxu1 %v8467_v15  ;;  %8012 = vmatprep.mubr.msk.bf16.mxu1 %vm8468_vm1, %v8467_v15 }
 0xa39   :  { %8016 = vmatprep.subr.bf16.mxu0 %v8467_v15 }
 0xa3a   :  { %8005 = vmatmul.mubr.msk.bf16.vlgmr.msra.gmra.mxu0 %vm65_vm0, %v9341_v50 }
 0xa3b   :  { %8011 = vmatpush3.bf16.msra.mxu1 %v8328_v33  ;;  %8018 = vmatprep.mubr.msk.bf16.mxu0 %vm8468_vm1, %v8467_v15 }
 0xa3c   :  { %8022 = vmatprep.subr.bf16.mxu1 %v8467_v15 }
 0xa3e   :  { %8013 = vmatmul.mubr.msk.bf16.vlgmr.msra.gmra.mxu1 %vm65_vm0, %v9357_v8 }
 0xa3f   :  { %8024 = vmatprep.mubr.msk.bf16.mxu1 %vm8468_vm1, %v8467_v15 }
 0xaa2   :  { %v3680_v7 = vpop.f32.mrf.mxu0 }
 0xaa3   :  { %v3681_v56 = vadd.f32 %v6982_v46, %v3680_v7 }
 0xaa4   :  { %v7830_v39 = vpop.f32.mrf.mxu0 }
 0xaa5   :  { %v4885_v4 = vpack.c.bf16 %v3681_v56, %v3681_v56 }
 0xaa6   :  { %v3683_v9 = vpop.f32.mrf.mxu0  ;;  %v3735_v40 = vpop.f32.mrf.mxu1 }
 0xaa7   :  { %v3736_v5 = vadd.f32 %v6983_v59, %v3735_v40  ;;  %v6994_v40 = vld [vmem:[%s10074_s5 + $0x24] ss:$0 sm:$0xff] }
 0xaa8   :  { %v7831_v10 = vpop.f32.mrf.mxu0  ;;  %v7838_v11 = vpop.f32.mrf.mxu1 }
 0xaaa   :  { %v3738_v12 = vpop.f32.mrf.mxu1  ;;  %v9618_v13 = vpop.f32.mrf.mxu0 }
 0xaab   :  { %v4886_v12 = vpack.c.bf16 %v3736_v5, %v3736_v5 }
 0xaac   :  { %v7839_v45 = vpop.f32.mrf.mxu1  ;;  %v7846_v14 = vpop.f32.mrf.mxu0 }
 0xaad   :  { %v3788_v45 = vadd.f32 %v6984_v6, %v9618_v13  ;;  %v6995_v13 = vld [vmem:[%s10074_s5 + $0x25] ss:$0 sm:$0xff] }
 0xaae   :  { %v3790_v16 = vpop.f32.mrf.mxu0  ;;  %v9620_v18 = vpop.f32.mrf.mxu1 }
 0xaaf   :  { %v6985_v16 = vld [vmem:[%s10074_s5 + $0x1b] ss:$0 sm:$0xff] }
 0xab0   :  { %v7847_v43 = vpop.f32.mrf.mxu0  ;;  %v7854_v20 = vpop.f32.mrf.mxu1 }
 0xab2   :  { %v3842_v22 = vpop.f32.mrf.mxu1  ;;  %v9622_v50 = vpop.f32.mrf.mxu0 }
 0xab4   :  { %v7855_v23 = vpop.f32.mrf.mxu1  ;;  %v7862_v1 = vpop.f32.mrf.mxu0 }
 0xab6   :  { %v3894_v26 = vpop.f32.mrf.mxu0  ;;  %v9624_v8 = vpop.f32.mrf.mxu1 }
 0xab8   :  { %v7863_v27 = vpop.f32.mrf.mxu0  ;;  %v7870_v53 = vpop.f32.mrf.mxu1 }
 0xab9   :  { %v4887_v27 = vpack.c.bf16 %v3788_v45, %v3788_v45  ;;  %v3840_v53 = vadd.f32 %v6985_v16, %v9620_v18  ;;  %v6996_v18 = vld [vmem:[%s10074_s5 + $0x26] ss:$0 sm:$0xff] }
 0xaba   :  { %v3946_v28 = vpop.f32.mrf.mxu1  ;;  %v9626_v17 = vpop.f32.mrf.mxu0 }
 0xabc   :  { %v7871_v30 = vpop.f32.mrf.mxu1  ;;  %v7878_v24 = vpop.f32.mrf.mxu0 }
 0xabd   :  { %v6986_v30 = vld [vmem:[%s10074_s5 + $0x1c] ss:$0 sm:$0xff] }
 0xabe   :  { %v3998_v32 = vpop.f32.mrf.mxu0  ;;  %v9628_v47 = vpop.f32.mrf.mxu1 }
 0xac0   :  { %v7879_v35 = vpop.f32.mrf.mxu0  ;;  %v7886_v37 = vpop.f32.mrf.mxu1 }
 0xac2   :  { %v4050_v38 = vpop.f32.mrf.mxu1  ;;  %v4099_v31 = vpop.f32.mrf.mxu0 }
 0xac3   :  { %v4100_v25 = vadd.f32 %v6990_v57, %v4099_v31  ;;  %v4888_v31 = vpack.c.bf16 %v3840_v53, %v3840_v53 }
 0xac4   :  { %v7887_v41 = vpop.f32.mrf.mxu1  ;;  %v7894_v36 = vpop.f32.mrf.mxu0 }
 0xac5   :  { %v4893_v44 = vpack.c.bf16 %v4100_v25, %v4100_v25  ;;  %v3892_v25 = vadd.f32 %v6986_v30, %v9622_v50  ;;  %v6987_v36 = vld [vmem:[%s10074_s5 + $0x1d] ss:$0 sm:$0xff]  ;;  %v6997_v50 = vld [vmem:[%s10074_s5 + $0x27] ss:$0 sm:$0xff] }
 0xac6   :  { %v4102_v48 = vpop.f32.mrf.mxu0  ;;  %v4151_v49 = vpop.f32.mrf.mxu1 }
 0xac7   :  { %v4913_v51 = vsel %vm1661_vm2, %v4893_v44, 0  ;;  %v4152_v29 = vadd.f32 %v6991_v42, %v4151_v49 }
 0xac8   :  { %v7895_v52 = vpop.f32.mrf.mxu0  ;;  %v7902_v54 = vpop.f32.mrf.mxu1  ;;  %8017 = vmatpush3.bf16.xpose.msra.mxu0 %v4913_v51 }
 0xac9   :  { %v4894_v58 = vpack.c.bf16 %v4152_v29, %v4152_v29  ;;  %8028 = vmatprep.subr.bf16.mxu0 %v8467_v15  ;;  %v4889_v29 = vpack.c.bf16 %v3892_v25, %v3892_v25  ;;  %v3944_v52 = vadd.f32 %v6987_v36, %v9624_v8  ;;  %v6998_v8 = vld [vmem:[%s10074_s5 + $0x28] ss:$0 sm:$0xff] }
 0xaca   :  { %v4154_v60 = vpop.f32.mrf.mxu1  ;;  %v4203_v61 = vpop.f32.mrf.mxu0 }
 0xacb   :  { %v4959_v34 = vsel %vm1661_vm2, %v4894_v58, 0  ;;  %v4204_v62 = vadd.f32 %v6992_v55, %v4203_v61  ;;  %v6988_v55 = vld [vmem:[%s10074_s5 + $0x1e] ss:$0 sm:$0xff] }
 0xacc   :  { %v7903_v63 = vpop.f32.mrf.mxu1  ;;  %v7910_v0 = vpop.f32.mrf.mxu0  ;;  %8023 = vmatpush3.bf16.xpose.msra.mxu1 %v4959_v34 }
 0xacd   :  { %v4895_v2 = vpack.c.bf16 %v4204_v62, %v4204_v62  ;;  %8034 = vmatprep.subr.bf16.mxu1 %v8467_v15  ;;  %v4890_v62 = vpack.c.bf16 %v3944_v52, %v3944_v52  ;;  %v3996_v63 = vadd.f32 %v6988_v55, %v9626_v17  ;;  %v6999_v17 = vld [vmem:[%s10074_s5 + $0x29] ss:$0 sm:$0xff] }
 0xace   :  { %v4206_v33 = vpop.f32.mrf.mxu0  ;;  %v4255_v7 = vpop.f32.mrf.mxu1 }
 0xacf   :  { %v5005_v39 = vsel %vm1661_vm2, %v4895_v2, 0  ;;  %v4256_v9 = vadd.f32 %v6993_v3, %v4255_v7  ;;  %8019 = vmatmul.mubr.msk.bf16.vlgmr.msra.gmra.mxu0 %vm1661_vm2, %v4885_v4  ;;  %v6989_v3 = vld [vmem:[%s10074_s5 + $0x1f] ss:$0 sm:$0xff] }
 0xad0   :  { %v7911_v10 = vpop.f32.mrf.mxu0  ;;  %v7918_v11 = vpop.f32.mrf.mxu1  ;;  %8029 = vmatpush3.bf16.xpose.msra.mxu0 %v5005_v39  ;;  %8030 = vmatprep.mubr.msk.bf16.mxu0 %vm8468_vm1, %v8467_v15  ;;  %v4891_v39 = vpack.c.bf16 %v3996_v63, %v3996_v63 }
 0xad1   :  { %v4896_v14 = vpack.c.bf16 %v4256_v9, %v4256_v9  ;;  %8040 = vmatprep.subr.bf16.mxu0 %v8467_v15  ;;  %v4048_v9 = vadd.f32 %v6989_v3, %v9628_v47 }
 0xad2   :  { %v4258_v43 = vpop.f32.mrf.mxu1  ;;  %v4307_v20 = vpop.f32.mrf.mxu0 }
 0xad3   :  { %v5051_v22 = vsel %vm1661_vm2, %v4896_v14, 0  ;;  %v4308_v23 = vadd.f32 %v6994_v40, %v4307_v20  ;;  %8025 = vmatmul.mubr.msk.bf16.vlgmr.msra.gmra.mxu1 %vm1661_vm2, %v4886_v12  ;;  %v4892_v43 = vpack.c.bf16 %v4048_v9, %v4048_v9 }
 0xad4   :  { %v7919_v1 = vpop.f32.mrf.mxu1  ;;  %v7926_v26 = vpop.f32.mrf.mxu0  ;;  %8035 = vmatpush3.bf16.xpose.msra.mxu1 %v5051_v22  ;;  %8036 = vmatprep.mubr.msk.bf16.mxu1 %vm8468_vm1, %v8467_v15 }
 0xad5   :  { %v4897_v28 = vpack.c.bf16 %v4308_v23, %v4308_v23  ;;  %8046 = vmatprep.subr.bf16.mxu1 %v8467_v15 }
 0xad6   :  { %v4310_v24 = vpop.f32.mrf.mxu0  ;;  %v4359_v32 = vpop.f32.mrf.mxu1 }
 0xad7   :  { %v5097_v35 = vsel %vm1661_vm2, %v4897_v28, 0  ;;  %v4360_v37 = vadd.f32 %v6995_v13, %v4359_v32  ;;  %8031 = vmatmul.mubr.msk.bf16.vlgmr.msra.gmra.mxu0 %vm1661_vm2, %v4887_v27 }
 0xad8   :  { %v7927_v57 = vpop.f32.mrf.mxu0  ;;  %v7934_v38 = vpop.f32.mrf.mxu1  ;;  %8041 = vmatpush3.bf16.xpose.msra.mxu0 %v5097_v35  ;;  %8042 = vmatprep.mubr.msk.bf16.mxu0 %vm8468_vm1, %v8467_v15 }
 0xad9   :  { %v4898_v41 = vpack.c.bf16 %v4360_v37, %v4360_v37  ;;  %8052 = vmatprep.subr.bf16.mxu0 %v8467_v15 }
 0xada   :  { %v4362_v42 = vpop.f32.mrf.mxu1  ;;  %v4411_v44 = vpop.f32.mrf.mxu0 }
 0xadb   :  { %v5143_v46 = vsel %vm1661_vm2, %v4898_v41, 0  ;;  %v4412_v48 = vadd.f32 %v6996_v18, %v4411_v44  ;;  %8037 = vmatmul.mubr.msk.bf16.vlgmr.msra.gmra.mxu1 %vm1661_vm2, %v4888_v31 }
 0xadc   :  { %v7935_v49 = vpop.f32.mrf.mxu1  ;;  %v7942_v51 = vpop.f32.mrf.mxu0  ;;  %8047 = vmatpush3.bf16.xpose.msra.mxu1 %v5143_v46  ;;  %8048 = vmatprep.mubr.msk.bf16.mxu1 %vm8468_vm1, %v8467_v15 }
 0xadd   :  { %v4899_v54 = vpack.c.bf16 %v4412_v48, %v4412_v48  ;;  %8058 = vmatprep.subr.bf16.mxu1 %v8467_v15 }
 0xade   :  { %v4414_v56 = vpop.f32.mrf.mxu0  ;;  %v4463_v58 = vpop.f32.mrf.mxu1 }
 0xadf   :  { %v5189_v59 = vsel %vm1661_vm2, %v4899_v54, 0  ;;  %v4464_v60 = vadd.f32 %v6997_v50, %v4463_v58  ;;  %8043 = vmatmul.mubr.msk.bf16.vlgmr.msra.gmra.mxu0 %vm1661_vm2, %v4889_v29  ;;  %v8437_v54 = vld [vmem:[%s10095_s28] ss:$0 sm:$0xff] }
 0xae0   :  { %v7943_v61 = vpop.f32.mrf.mxu0  ;;  %v7950_v34 = vpop.f32.mrf.mxu1  ;;  %8053 = vmatpush3.bf16.xpose.msra.mxu0 %v5189_v59  ;;  %8054 = vmatprep.mubr.msk.bf16.mxu0 %vm8468_vm1, %v8467_v15 }
 0xae1   :  { %v4900_v0 = vpack.c.bf16 %v4464_v60, %v4464_v60  ;;  %8064 = vmatprep.subr.bf16.mxu0 %v8467_v15 }
 0xae2   :  { %v4466_v4 = vpop.f32.mrf.mxu1  ;;  %v4515_v5 = vpop.f32.mrf.mxu0 }
 0xae3   :  { %v5235_v2 = vsel %vm1661_vm2, %v4900_v0, 0  ;;  %v4516_v6 = vadd.f32 %v6998_v8, %v4515_v5  ;;  %8049 = vmatmul.mubr.msk.bf16.vlgmr.msra.gmra.mxu1 %vm1661_vm2, %v4890_v62  ;;  %v8438_v8 = vld [vmem:[%s10095_s28 + $0x1] ss:$0 sm:$0xff] }
 0xae4   :  { %v7951_v33 = vpop.f32.mrf.mxu1  ;;  %v7958_v7 = vpop.f32.mrf.mxu0  ;;  %8059 = vmatpush3.bf16.xpose.msra.mxu1 %v5235_v2  ;;  %8060 = vmatprep.mubr.msk.bf16.mxu1 %vm8468_vm1, %v8467_v15 }
 0xae5   :  { %v4901_v10 = vpack.c.bf16 %v4516_v6, %v4516_v6  ;;  %8070 = vmatprep.subr.bf16.mxu1 %v8467_v15  ;;  %v8439_v6 = vld [vmem:[%s10095_s28 + $0x2] ss:$0 sm:$0xff] }
 0xae6   :  { %v4518_v11 = vpop.f32.mrf.mxu0  ;;  %v4567_v40 = vpop.f32.mrf.mxu1 }
 0xae7   :  { %v5393_v12 = vsel %vm2193_vm3, %v4901_v10, 0  ;;  %v4568_v45 = vadd.f32 %v6999_v17, %v4567_v40  ;;  %8055 = vmatmul.mubr.msk.bf16.vlgmr.msra.gmra.mxu0 %vm1661_vm2, %v4891_v39  ;;  %v8440_v40 = vld [vmem:[%s10095_s28 + $0x3] ss:$0 sm:$0xff] }
 0xae8   :  { %v7959_v14 = vpop.f32.mrf.mxu0  ;;  %v7966_v16 = vpop.f32.mrf.mxu1  ;;  %8065 = vmatpush3.bf16.msra.mxu0 %v5393_v12  ;;  %8066 = vmatprep.mubr.msk.bf16.mxu0 %vm8468_vm1, %v8467_v15 }
 0xae9   :  { %v4902_v20 = vpack.c.bf16 %v4568_v45, %v4568_v45  ;;  %8076 = vmatprep.subr.bf16.mxu0 %v8467_v15 }
 0xaea   :  { %v4570_v47 = vpop.f32.mrf.mxu1  ;;  %v9729_v22 = vpop.f32.mrf.mxu0 }
 0xaeb   :  { %v5439_v23 = vsel %vm2193_vm3, %v4902_v20, 0  ;;  %8061 = vmatmul.mubr.msk.bf16.vlgmr.msra.gmra.mxu1 %vm1661_vm2, %v4892_v43 }
 0xaec   :  { %v7967_v1 = vpop.f32.mrf.mxu1  ;;  %v7974_v26 = vpop.f32.mrf.mxu0  ;;  %8071 = vmatpush3.bf16.msra.mxu1 %v5439_v23  ;;  %8072 = vmatprep.mubr.msk.bf16.mxu1 %vm8468_vm1, %v8467_v15  ;;  %v8441_v23 = vld [vmem:[%s10095_s28 + $0x4] ss:$0 sm:$0xff] }
 0xaed   :  { %8082 = vmatprep.subr.bf16.mxu1 %v8467_v15 }
 0xaee   :  { %v4622_v13 = vpop.f32.mrf.mxu0  ;;  %v9736_v27 = vpop.f32.mrf.mxu1 }
 0xaf0   :  { %v7975_v53 = vpop.f32.mrf.mxu0  ;;  %v7982_v28 = vpop.f32.mrf.mxu1 }
 0xaf2   :  { %v4674_v30 = vpop.f32.mrf.mxu1  ;;  %v9738_v24 = vpop.f32.mrf.mxu0 }
 0xaf4   :  { %v7983_v32 = vpop.f32.mrf.mxu1  ;;  %v7990_v35 = vpop.f32.mrf.mxu0 }
 0xaf5   :  { %v8442_v35 = vld [vmem:[%s10095_s28 + $0x5] ss:$0 sm:$0xff] }
 0xaf6   :  { %v4726_v37 = vpop.f32.mrf.mxu0  ;;  %v9740_v57 = vpop.f32.mrf.mxu1 }
 0xaf8   :  { %v7991_v38 = vpop.f32.mrf.mxu0  ;;  %v7998_v18 = vpop.f32.mrf.mxu1 }
 0xafa   :  { %v4778_v31 = vpop.f32.mrf.mxu1  ;;  %v9742_v25 = vpop.f32.mrf.mxu0 }
 0xafc   :  { %v7999_v41 = vpop.f32.mrf.mxu1  ;;  %v8006_v36 = vpop.f32.mrf.mxu0 }
 0xafe   :  { %v4830_v42 = vpop.f32.mrf.mxu0  ;;  %v9744_v44 = vpop.f32.mrf.mxu1 }
 0xb00   :  { %v8007_v46 = vpop.f32.mrf.mxu0  ;;  %v8014_v48 = vpop.f32.mrf.mxu1 }
 0xb01   :  { %v8443_v46 = vld [vmem:[%s10095_s28 + $0x6] ss:$0 sm:$0xff] }
 0xb02   :  { %v4882_v49 = vpop.f32.mrf.mxu1 }
 0xb04   :  { %v8015_v51 = vpop.f32.mrf.mxu1 }
 0xb8f   :  { %v4949_v50 = vpop.f32.mrf.mxu0 }
 0xb90   :  { %v5277_v29 = vmul.f32 0.35355338, %v4949_v50 }
 0xb91   :  { %v8020_v52 = vpop.f32.mrf.mxu0 }
 0xb92   :  { %v9749_v55 = vadd.f32 %v8437_v54, %v5277_v29 }
 0xb93   :  { %v4952_v56 = vpop.f32.mrf.mxu0  ;;  %v4995_v58 = vpop.f32.mrf.mxu1 }
 0xb94   :  { %v5278_v59 = vmul.f32 0.35355338, %v4995_v58  ;;  %v5293_v60 = vsel %vm1661_vm2, %v9749_v55, -inf  ;;  %v8444_v56 = vld [vmem:[%s10095_s28 + $0x7] ss:$0 sm:$0xff] }
 0xb95   :  { %v8026_v61 = vpop.f32.mrf.mxu1  ;;  %5294 = vmax.xlane.f32.xlu0 %v5293_v60  ;;  %v8021_v34 = vpop.f32.mrf.mxu0 }
 0xb96   :  { %v9756_v62 = vadd.f32 %v8438_v8, %v5278_v59 }
 0xb97   :  { %v4998_v63 = vpop.f32.mrf.mxu1  ;;  %v5041_v0 = vpop.f32.mrf.mxu0 }
 0xb98   :  { %v5279_v3 = vmul.f32 0.35355338, %v5041_v0  ;;  %v5296_v4 = vsel %vm1661_vm2, %v9756_v62, -inf }
 0xb99   :  { %5297 = vmax.xlane.f32.xlu1 %v5296_v4  ;;  %v8027_v5 = vpop.f32.mrf.mxu1  ;;  %v8032_v2 = vpop.f32.mrf.mxu0 }
 0xb9a   :  { %v5287_v33 = vadd.f32 %v8439_v6, %v5279_v3 }
 0xb9b   :  { %v5044_v7 = vpop.f32.mrf.mxu0  ;;  %v5087_v17 = vpop.f32.mrf.mxu1 }
 0xb9c   :  { %v5280_v39 = vmul.f32 0.35355338, %v5087_v17  ;;  %v5299_v9 = vsel %vm1661_vm2, %v5287_v33, -inf }
 0xb9d   :  { %v8038_v10 = vpop.f32.mrf.mxu1  ;;  %5300 = vmax.xlane.f32.xlu0 %v5299_v9  ;;  %v8033_v11 = vpop.f32.mrf.mxu0 }
 0xb9e   :  { %v5288_v12 = vadd.f32 %v8440_v40, %v5280_v39 }
 0xb9f   :  { %v5090_v45 = vpop.f32.mrf.mxu1  ;;  %v5133_v14 = vpop.f32.mrf.mxu0 }
 0xba0   :  { %v5281_v16 = vmul.f32 0.35355338, %v5133_v14  ;;  %v5302_v43 = vsel %vm1661_vm2, %v5288_v12, -inf }
 0xba1   :  { %5303 = vmax.xlane.f32.xlu1 %v5302_v43  ;;  %v8039_v20 = vpop.f32.mrf.mxu1  ;;  %v8044_v47 = vpop.f32.mrf.mxu0 }
 0xba2   :  { %v5289_v1 = vadd.f32 %v8441_v23, %v5281_v16 }
 0xba3   :  { %v5136_v26 = vpop.f32.mrf.mxu0  ;;  %v5179_v13 = vpop.f32.mrf.mxu1 }
 0xba4   :  { %v5282_v53 = vmul.f32 0.35355338, %v5179_v13  ;;  %v5305_v28 = vsel %vm1661_vm2, %v5289_v1, -inf }
 0xba5   :  { %v8050_v30 = vpop.f32.mrf.mxu1  ;;  %5306 = vmax.xlane.f32.xlu0 %v5305_v28  ;;  %v8045_v32 = vpop.f32.mrf.mxu0 }
 0xba6   :  { %v5290_v37 = vadd.f32 %v8442_v35, %v5282_v53 }
 0xba7   :  { %v5182_v38 = vpop.f32.mrf.mxu1  ;;  %v5225_v18 = vpop.f32.mrf.mxu0 }
 0xba8   :  { %v5283_v31 = vmul.f32 0.35355338, %v5225_v18  ;;  %v5308_v41 = vsel %vm1661_vm2, %v5290_v37, -inf }
 0xba9   :  { %5309 = vmax.xlane.f32.xlu1 %v5308_v41  ;;  %v8051_v36 = vpop.f32.mrf.mxu1  ;;  %v8056_v42 = vpop.f32.mrf.mxu0 }
 0xbaa   :  { %v5291_v48 = vadd.f32 %v8443_v46, %v5283_v31  ;;  %v7000_v46 = vld [vmem:[%s10074_s5 + $0x2a] ss:$0 sm:$0xff] }
 0xbab   :  { %v5228_v49 = vpop.f32.mrf.mxu0  ;;  %v5271_v51 = vpop.f32.mrf.mxu1 }
 0xbac   :  { %v5284_v50 = vmul.f32 0.35355338, %v5271_v51  ;;  %v5311_v29 = vsel %vm1661_vm2, %v5291_v48, -inf  ;;  %v4620_v49 = vadd.f32 %v7000_v46, %v9729_v22  ;;  %v7001_v51 = vld [vmem:[%s10074_s5 + $0x2b] ss:$0 sm:$0xff] }
 0xbad   :  { %v8062_v52 = vpop.f32.mrf.mxu1  ;;  %5312 = vmax.xlane.f32.xlu0 %v5311_v29  ;;  %v8057_v54 = vpop.f32.mrf.mxu0 }
 0xbae   :  { %v5292_v58 = vadd.f32 %v8444_v56, %v5284_v50  ;;  %v4903_v52 = vpack.c.bf16 %v4620_v49, %v4620_v49  ;;  %v4672_v54 = vadd.f32 %v7001_v51, %v9736_v27  ;;  %v7003_v27 = vld [vmem:[%s10074_s5 + $0x2d] ss:$0 sm:$0xff] }
 0xbaf   :  { %v5274_v59 = vpop.f32.mrf.mxu1  ;;  %v7097_v49 = vld [vmem:[%s10075_s6 + $0x2c] sm:$0xf] }
 0xbb0   :  { %v5314_v60 = vsel %vm1661_vm2, %v5292_v58, -inf  ;;  %v5485_v22 = vsel %vm2193_vm3, %v4903_v52, 0  ;;  %v5916_v52 = vsel %vm2193_vm3, %v7097_v49, 0 }
 0xbb1   :  { %5315 = vmax.xlane.f32.xlu1 %v5314_v60  ;;  %v8063_v61 = vpop.f32.mrf.mxu1 }
 0xc1e   :  { %v5295_v34 = vpop.xlane.xlu0 %5294 }
 0xc1f   :  { %v5317_v8 = vsub.f32 %v9749_v55, %v5295_v34  ;;  %v4904_v34 = vpack.c.bf16 %v4672_v54, %v4672_v54 }
 0xc21   :  { %v5325_v63 = vmul.f32 1.442695, %v5317_v8 }
 0xc22   :  { %v5298_v0 = vpop.xlane.xlu1 %5297 }
 0xc23   :  { %8393 = vpow2.f32 %v5325_v63  ;;  %v5318_v3 = vsub.f32 %v9756_v62, %v5298_v0 }
 0xc25   :  { %v5327_v4 = vmul.f32 1.442695, %v5318_v3 }
 0xc26   :  { %v5301_v5 = vpop.xlane.xlu0 %5300 }
 0xc27   :  { %8395 = vpow2.f32 %v5327_v4  ;;  %v5319_v2 = vsub.f32 %v5287_v33, %v5301_v5  ;;  %v5531_v5 = vsel %vm2193_vm3, %v4904_v34, 0 }
 0xc29   :  { %v5329_v6 = vmul.f32 1.442695, %v5319_v2  ;;  %v4776_v2 = vadd.f32 %v7003_v27, %v9740_v57 }
 0xc2a   :  { %v5304_v7 = vpop.xlane.xlu1 %5303 }
 0xc2b   :  { %8397 = vpow2.f32 %v5329_v6  ;;  %v5320_v17 = vsub.f32 %v5288_v12, %v5304_v7  ;;  %v7004_v7 = vld [vmem:[%s10074_s5 + $0x2e] ss:$0 sm:$0xff]  ;;  %v4906_v57 = vpack.c.bf16 %v4776_v2, %v4776_v2  ;;  %v7100_v2 = vld [vmem:[%s10075_s6 + $0x38] sm:$0xf] }
 0xc2d   :  { %v5331_v39 = vmul.f32 1.442695, %v5320_v17 }
 0xc2e   :  { %v5307_v9 = vpop.xlane.xlu0 %5306 }
 0xc2f   :  { %8399 = vpow2.f32 %v5331_v39  ;;  %v5321_v10 = vsub.f32 %v5289_v1, %v5307_v9 }
 0xc30   :  { %v8394_v11 = vpop.eup %8393 }
 0xc31   :  { %v5333_v40 = vmul.f32 1.442695, %v5321_v10  ;;  %v5341_v55 = vsel %vm1661_vm2, %v8394_v11, 0.0 }
 0xc32   :  { %v5310_v45 = vpop.xlane.xlu1 %5309  ;;  %5342 = vadd.xlane.f32.xlu0 %v5341_v55  ;;  %v7005_v55 = vld [vmem:[%s10074_s5 + $0x2f] ss:$0 sm:$0xff] }
 0xc33   :  { %8401 = vpow2.f32 %v5333_v40  ;;  %v5322_v62 = vsub.f32 %v5290_v37, %v5310_v45 }
 0xc34   :  { %v8396_v14 = vpop.eup %8395 }
 0xc35   :  { %v5335_v16 = vmul.f32 1.442695, %v5322_v62  ;;  %v5344_v33 = vsel %vm1661_vm2, %v8396_v14, 0.0 }
 0xc36   :  { %5345 = vadd.xlane.f32.xlu1 %v5344_v33  ;;  %v5313_v43 = vpop.xlane.xlu0 %5312  ;;  %v4880_v33 = vadd.f32 %v7005_v55, %v9744_v44 }
 0xc37   :  { %8403 = vpow2.f32 %v5335_v16  ;;  %v5323_v12 = vsub.f32 %v5291_v48, %v5313_v43 }
 0xc38   :  { %v8398_v20 = vpop.eup %8397 }
 0xc39   :  { %v5337_v47 = vmul.f32 1.442695, %v5323_v12  ;;  %v5347_v23 = vsel %vm1661_vm2, %v8398_v20, 0.0 }
 0xc3a   :  { %v5316_v1 = vpop.xlane.xlu1 %5315  ;;  %5348 = vadd.xlane.f32.xlu0 %v5347_v23  ;;  %v4908_v23 = vpack.c.bf16 %v4880_v33, %v4880_v33 }
 0xc3b   :  { %8405 = vpow2.f32 %v5337_v47  ;;  %v5324_v26 = vsub.f32 %v5292_v58, %v5316_v1  ;;  %v7002_v58 = vld [vmem:[%s10074_s5 + $0x2c] ss:$0 sm:$0xff] }
 0xc3c   :  { %v9789_v13 = vpop.eup %8399  ;;  %v4724_v8 = vadd.f32 %v7002_v58, %v9738_v24  ;;  %v7098_v58 = vld [vmem:[%s10075_s6 + $0x30] sm:$0xf] }
 0xc3d   :  { %v5339_v53 = vmul.f32 1.442695, %v5324_v26  ;;  %v5350_v28 = vsel %vm1661_vm2, %v9789_v13, 0.0 }
 0xc3e   :  { %5351 = vadd.xlane.f32.xlu1 %v5350_v28  ;;  %v4905_v24 = vpack.c.bf16 %v4724_v8, %v4724_v8 }
 0xc3f   :  { %8407 = vpow2.f32 %v5339_v53 }
 0xc40   :  { %v9793_v30 = vpop.eup %8401  ;;  %v5577_v10 = vsel %vm2193_vm3, %v4905_v24, 0 }
 0xc41   :  { %v5353_v32 = vsel %vm1661_vm2, %v9793_v30, 0.0 }
 0xc42   :  { %5354 = vadd.xlane.f32.xlu0 %v5353_v32 }
 0xc44   :  { %v9797_v35 = vpop.eup %8403 }
 0xc45   :  { %v5356_v37 = vsel %vm1661_vm2, %v9797_v35, 0.0 }
 0xc46   :  { %5357 = vadd.xlane.f32.xlu1 %v5356_v37  ;;  %v7094_v37 = vld [vmem:[%s10075_s6 + $0x20] sm:$0xf] }
 0xc48   :  { %v9801_v38 = vpop.eup %8405 }
 0xc49   :  { %v5359_v18 = vsel %vm1661_vm2, %v9801_v38, 0.0 }
 0xc4a   :  { %5360 = vadd.xlane.f32.xlu0 %v5359_v18  ;;  %v7095_v18 = vld [vmem:[%s10075_s6 + $0x24] sm:$0xf] }
 0xc4c   :  { %v9805_v31 = vpop.eup %8407 }
 0xc4d   :  { %v5362_v41 = vsel %vm1661_vm2, %v9805_v31, 0.0 }
 0xc4e   :  { %5363 = vadd.xlane.f32.xlu1 %v5362_v41  ;;  %v7096_v41 = vld [vmem:[%s10075_s6 + $0x28] sm:$0xf] }
 0xc4f   :  { %v5870_v46 = vsel %vm2193_vm3, %v7096_v41, 0 }
 0xcbb   :  { %v5343_v36 = vpop.xlane.xlu0 %5342 }
 0xcbc   :  { %8409 = vrcp.f32 %v5343_v36 }
 0xcbf   :  { %v5346_v42 = vpop.xlane.xlu1 %5345 }
 0xcc0   :  { %8411 = vrcp.f32 %v5346_v42 }
 0xcc3   :  { %v5349_v48 = vpop.xlane.xlu0 %5348 }
 0xcc4   :  { %8413 = vrcp.f32 %v5349_v48 }
 0xcc7   :  { %v5352_v50 = vpop.xlane.xlu1 %5351 }
 0xcc8   :  { %8415 = vrcp.f32 %v5352_v50 }
 0xcc9   :  { %v8410_v29 = vpop.eup %8409 }
 0xcca   :  { %v5373_v56 = vmul.f32 %v8410_v29, %v8394_v11  ;;  %v4828_v11 = vadd.f32 %v7004_v7, %v9742_v25  ;;  %v5623_v25 = vsel %vm2193_vm3, %v4906_v57, 0  ;;  %v7101_v57 = vld [vmem:[%s10075_s6 + $0x3c] sm:$0xf] }
 0xccb   :  { %v5355_v59 = vpop.xlane.xlu0 %5354 }
 0xccc   :  { %v5381_v60 = vpack.c.bf16 %v5373_v56, %v5373_v56  ;;  %8417 = vrcp.f32 %v5355_v59  ;;  %v4907_v16 = vpack.c.bf16 %v4828_v11, %v4828_v11 }
 0xccd   :  { %v8412_v61 = vpop.eup %8411 }
 0xcce   :  { %v5374_v63 = vmul.f32 %v8412_v61, %v8396_v14  ;;  %8067 = vmatmul.mubr.msk.bf16.vlgmr.msra.gmra.mxu0 %vm1661_vm2, %v5381_v60  ;;  %v5669_v47 = vsel %vm2193_vm3, %v4907_v16, 0 }
 0xccf   :  { %8077 = vmatpush3.bf16.msra.mxu0 %v5485_v22  ;;  %v5358_v0 = vpop.xlane.xlu1 %5357  ;;  %8078 = vmatprep.mubr.msk.bf16.mxu0 %vm8468_vm1, %v8467_v15  ;;  %v5962_v22 = vsel %vm2193_vm3, %v7098_v58, 0 }
 0xcd0   :  { %v5382_v3 = vpack.c.bf16 %v5374_v63, %v5374_v63  ;;  %8419 = vrcp.f32 %v5358_v0  ;;  %8088 = vmatprep.subr.bf16.mxu0 %v8467_v15  ;;  %v7099_v63 = vld [vmem:[%s10075_s6 + $0x34] sm:$0xf] }
 0xcd1   :  { %v8414_v4 = vpop.eup %8413 }
 0xcd2   :  { %v5375_v6 = vmul.f32 %v8414_v4, %v8398_v20  ;;  %8073 = vmatmul.mubr.msk.bf16.vlgmr.msra.gmra.mxu1 %vm1661_vm2, %v5382_v3  ;;  %v6008_v4 = vsel %vm2193_vm3, %v7099_v63, 0 }
 0xcd3   :  { %8083 = vmatpush3.bf16.msra.mxu1 %v5531_v5  ;;  %v5361_v17 = vpop.xlane.xlu0 %5360  ;;  %8084 = vmatprep.mubr.msk.bf16.mxu1 %vm8468_vm1, %v8467_v15 }
 0xcd4   :  { %v5383_v39 = vpack.c.bf16 %v5375_v6, %v5375_v6  ;;  %8421 = vrcp.f32 %v5361_v17  ;;  %8094 = vmatprep.subr.bf16.mxu1 %v8467_v15 }
 0xcd5   :  { %v8416_v9 = vpop.eup %8415 }
 0xcd6   :  { %v5376_v40 = vmul.f32 %v8416_v9, %v9789_v13  ;;  %8079 = vmatmul.mubr.msk.bf16.vlgmr.msra.gmra.mxu0 %vm1661_vm2, %v5383_v39  ;;  %v5715_v13 = vsel %vm2193_vm3, %v4908_v23, 0  ;;  %v6054_v39 = vsel %vm2193_vm3, %v7100_v2, 0 }
 0xcd7   :  { %8089 = vmatpush3.bf16.msra.mxu0 %v5577_v10  ;;  %v5364_v45 = vpop.xlane.xlu1 %5363  ;;  %8090 = vmatprep.mubr.msk.bf16.mxu0 %vm8468_vm1, %v8467_v15 }
 0xcd8   :  { %v5384_v62 = vpack.c.bf16 %v5376_v40, %v5376_v40  ;;  %8423 = vrcp.f32 %v5364_v45  ;;  %8100 = vmatprep.subr.bf16.mxu0 %v8467_v15  ;;  %v6100_v45 = vsel %vm2193_vm3, %v7101_v57, 0 }
 0xcd9   :  { %v8418_v14 = vpop.eup %8417 }
 0xcda   :  { %v5377_v43 = vmul.f32 %v8418_v14, %v9793_v30  ;;  %8085 = vmatmul.mubr.msk.bf16.vlgmr.msra.gmra.mxu1 %vm1661_vm2, %v5384_v62 }
 0xcdb   :  { %8095 = vmatpush3.bf16.msra.mxu1 %v5623_v25  ;;  %8096 = vmatprep.mubr.msk.bf16.mxu1 %vm8468_vm1, %v8467_v15 }
 0xcdc   :  { %v5385_v12 = vpack.c.bf16 %v5377_v43, %v5377_v43  ;;  %8106 = vmatprep.subr.bf16.mxu1 %v8467_v15 }
 0xcdd   :  { %v8420_v20 = vpop.eup %8419 }
 0xcde   :  { %v5378_v1 = vmul.f32 %v8420_v20, %v9797_v35  ;;  %8091 = vmatmul.mubr.msk.bf16.vlgmr.msra.gmra.mxu0 %vm1661_vm2, %v5385_v12 }
 0xcdf   :  { %8101 = vmatpush3.bf16.msra.mxu0 %v5669_v47  ;;  %8102 = vmatprep.mubr.msk.bf16.mxu0 %vm8468_vm1, %v8467_v15 }
 0xce0   :  { %v5386_v44 = vpack.c.bf16 %v5378_v1, %v5378_v1  ;;  %8112 = vmatprep.subr.bf16.mxu0 %v8467_v15 }
 0xce1   :  { %v8422_v26 = vpop.eup %8421 }
 0xce2   :  { %v5379_v53 = vmul.f32 %v8422_v26, %v9801_v38  ;;  %8097 = vmatmul.mubr.msk.bf16.vlgmr.msra.gmra.mxu1 %vm1661_vm2, %v5386_v44  ;;  %v5778_v38 = vsel %vm2193_vm3, %v7094_v37, 0 }
 0xce3   :  { %8107 = vmatpush3.bf16.msra.mxu1 %v5715_v13  ;;  %8108 = vmatprep.mubr.msk.bf16.mxu1 %vm8468_vm1, %v8467_v15 }
 0xce4   :  { %v5387_v28 = vpack.c.bf16 %v5379_v53, %v5379_v53  ;;  %8118 = vmatprep.subr.bf16.mxu1 %v8467_v15 }
 0xce5   :  { %v8424_v30 = vpop.eup %8423 }
 0xce6   :  { %v5380_v32 = vmul.f32 %v8424_v30, %v9805_v31  ;;  %8103 = vmatmul.mubr.msk.bf16.vlgmr.msra.gmra.mxu0 %vm1661_vm2, %v5387_v28  ;;  %v5824_v31 = vsel %vm2193_vm3, %v7095_v18, 0 }
 0xce7   :  { %8114 = vmatprep.mubr.msk.bf16.mxu0 %vm8468_vm1, %v8467_v15  ;;  %8113 = vmatpush3.bf16.msra.mxu0 %v5778_v38 }
 0xce8   :  { %v5388_v35 = vpack.c.bf16 %v5380_v32, %v5380_v32  ;;  %8124 = vmatprep.subr.bf16.mxu0 %v8467_v15 }
 0xcea   :  { %8109 = vmatmul.mubr.msk.bf16.vlgmr.msra.gmra.mxu1 %vm1661_vm2, %v5388_v35 }
 0xceb   :  { %8120 = vmatprep.mubr.msk.bf16.mxu1 %vm8468_vm1, %v8467_v15  ;;  %8119 = vmatpush3.bf16.msra.mxu1 %v5824_v31 }
 0xcec   :  { %8130 = vmatprep.subr.bf16.mxu1 %v8467_v15 }
 0xd8e   :  { %v5429_v36 = vpop.f32.mrf.mxu0 }
 0xd8f   :  { %v5766_v42 = vpack.c.bf16 %v5429_v36, %v5429_v36 }
 0xd90   :  { %v8068_v48 = vpop.f32.mrf.mxu0 }
 0xd91   :  { %8115 = vmatmul.mubr.msk.bf16.vlgmr.msra.gmra.mxu0 %vm1661_vm2, %v5766_v42 }
 0xd92   :  { %v5432_v51 = vpop.f32.mrf.mxu0  ;;  %v5475_v50 = vpop.f32.mrf.mxu1  ;;  %8125 = vmatpush3.bf16.msra.mxu0 %v5870_v46  ;;  %8126 = vmatprep.mubr.msk.bf16.mxu0 %vm8468_vm1, %v8467_v15 }
 0xd93   :  { %v5767_v29 = vpack.c.bf16 %v5475_v50, %v5475_v50  ;;  %8136 = vmatprep.subr.bf16.mxu0 %v8467_v15 }
 0xd94   :  { %v8069_v54 = vpop.f32.mrf.mxu0  ;;  %v8074_v56 = vpop.f32.mrf.mxu1 }
 0xd95   :  { %8121 = vmatmul.mubr.msk.bf16.vlgmr.msra.gmra.mxu1 %vm1661_vm2, %v5767_v29 }
 0xd96   :  { %v5478_v59 = vpop.f32.mrf.mxu1  ;;  %v5521_v60 = vpop.f32.mrf.mxu0  ;;  %8131 = vmatpush3.bf16.msra.mxu1 %v5916_v52  ;;  %8132 = vmatprep.mubr.msk.bf16.mxu1 %vm8468_vm1, %v8467_v15 }
 0xd97   :  { %v5768_v61 = vpack.c.bf16 %v5521_v60, %v5521_v60  ;;  %8142 = vmatprep.subr.bf16.mxu1 %v8467_v15 }
 0xd98   :  { %v8075_v34 = vpop.f32.mrf.mxu1  ;;  %v8080_v8 = vpop.f32.mrf.mxu0 }
 0xd99   :  { %8127 = vmatmul.mubr.msk.bf16.vlgmr.msra.gmra.mxu0 %vm1661_vm2, %v5768_v61 }
 0xd9a   :  { %v5524_v27 = vpop.f32.mrf.mxu0  ;;  %v5567_v0 = vpop.f32.mrf.mxu1  ;;  %8137 = vmatpush3.bf16.msra.mxu0 %v5962_v22  ;;  %8138 = vmatprep.mubr.msk.bf16.mxu0 %vm8468_vm1, %v8467_v15 }
 0xd9b   :  { %v5769_v3 = vpack.c.bf16 %v5567_v0, %v5567_v0  ;;  %8148 = vmatprep.subr.bf16.mxu0 %v8467_v15 }
 0xd9c   :  { %v8081_v5 = vpop.f32.mrf.mxu0  ;;  %v8086_v24 = vpop.f32.mrf.mxu1 }
 0xd9d   :  { %8133 = vmatmul.mubr.msk.bf16.vlgmr.msra.gmra.mxu1 %vm1661_vm2, %v5769_v3  ;;  %v7111_v5 = vld [vmem:[%s10076_s7 + $0x1] ss:$0 sm:$0xff] }
 0xd9e   :  { %v5570_v6 = vpop.f32.mrf.mxu1  ;;  %v5613_v7 = vpop.f32.mrf.mxu0  ;;  %8143 = vmatpush3.bf16.msra.mxu1 %v6008_v4  ;;  %8144 = vmatprep.mubr.msk.bf16.mxu1 %vm8468_vm1, %v8467_v15 }
 0xd9f   :  { %v5770_v17 = vpack.c.bf16 %v5613_v7, %v5613_v7  ;;  %8154 = vmatprep.subr.bf16.mxu1 %v8467_v15 }
 0xda0   :  { %v8087_v9 = vpop.f32.mrf.mxu1  ;;  %v8092_v10 = vpop.f32.mrf.mxu0 }
 0xda1   :  { %8139 = vmatmul.mubr.msk.bf16.vlgmr.msra.gmra.mxu0 %vm1661_vm2, %v5770_v17 }
 0xda2   :  { %v5616_v11 = vpop.f32.mrf.mxu0  ;;  %v5659_v40 = vpop.f32.mrf.mxu1  ;;  %8149 = vmatpush3.bf16.msra.mxu0 %v6054_v39  ;;  %8150 = vmatprep.mubr.msk.bf16.mxu0 %vm8468_vm1, %v8467_v15 }
 0xda3   :  { %v5771_v55 = vpack.c.bf16 %v5659_v40, %v5659_v40  ;;  %8160 = vmatprep.subr.bf16.mxu0 %v8467_v15 }
 0xda4   :  { %v8093_v62 = vpop.f32.mrf.mxu0  ;;  %v8098_v14 = vpop.f32.mrf.mxu1 }
 0xda5   :  { %8145 = vmatmul.mubr.msk.bf16.vlgmr.msra.gmra.mxu1 %vm1661_vm2, %v5771_v55 }
 0xda6   :  { %v5662_v25 = vpop.f32.mrf.mxu1  ;;  %v5705_v16 = vpop.f32.mrf.mxu0  ;;  %8155 = vmatpush3.bf16.msra.mxu1 %v6100_v45  ;;  %8156 = vmatprep.mubr.msk.bf16.mxu1 %vm8468_vm1, %v8467_v15 }
 0xda7   :  { %v5772_v33 = vpack.c.bf16 %v5705_v16, %v5705_v16  ;;  %8168 = vmatprep.subr.bf16.mxu1 %v8467_v15 }
 0xda8   :  { %v8099_v43 = vpop.f32.mrf.mxu1  ;;  %v8104_v12 = vpop.f32.mrf.mxu0 }
 0xda9   :  { %8151 = vmatmul.mubr.msk.bf16.vlgmr.msra.gmra.mxu0 %vm1661_vm2, %v5772_v33 }
 0xdaa   :  { %v5708_v20 = vpop.f32.mrf.mxu0  ;;  %v5751_v47 = vpop.f32.mrf.mxu1  ;;  %8164 = vmatprep.mubr.msk.bf16.mxu0 %vm8468_vm1, %v8467_v15 }
 0xdab   :  { %v5773_v23 = vpack.c.bf16 %v5751_v47, %v5751_v47 }
 0xdac   :  { %v8105_v1 = vpop.f32.mrf.mxu0  ;;  %v8110_v44 = vpop.f32.mrf.mxu1 }
 0xdad   :  { %8157 = vmatmul.mubr.msk.bf16.vlgmr.msra.gmra.mxu1 %vm1661_vm2, %v5773_v23 }
 0xdae   :  { %v5754_v26 = vpop.f32.mrf.mxu1  ;;  %8172 = vmatprep.mubr.msk.bf16.mxu1 %vm8468_vm1, %v8467_v15 }
 0xdb0   :  { %v8111_v13 = vpop.f32.mrf.mxu1 }
 0xe51   :  { %v5814_v53 = vpop.f32.mrf.mxu0 }
 0xe52   :  { %v6142_v58 = vsel %vm65_vm0, %v5814_v53, 0.0 }
 0xe53   :  { %v8116_v28 = vpop.f32.mrf.mxu0 }
 0xe54   :  { %v8330_v28 = vld [vmem:[%s10079_s10 + $0x20] sm:$0xff]  }
 0xe55   :  { %v5817_v30 = vpop.f32.mrf.mxu0  ;;  %v5860_v32 = vpop.f32.mrf.mxu1 }
 0xe56   :  { %v6149_v0 = vsel %vm65_vm0, %v5860_v32, 0.0  ;;  %v8331_v30 = vld [vmem:[%s10079_s10 + $0x38] sm:$0xff]   ;;  %v8332_v32 = vld [vmem:[%s10079_s10 + $0x30] sm:$0xff]  }
 0xe57   :  { %v8117_v35 = vpop.f32.mrf.mxu0  ;;  %v8122_v37 = vpop.f32.mrf.mxu1  ;;  %8169 = vmatpush3.bf16.msra.mxu1 %v8331_v30 }
 0xe58   :  { %8170 = vmatprep.subr.bf16.mxu1 %v8467_v15 }
 0xe59   :  { %v5863_v38 = vpop.f32.mrf.mxu1  ;;  %v5906_v18 = vpop.f32.mrf.mxu0 }
 0xe5a   :  { %v6143_v52 = vsel %vm65_vm0, %v5906_v18, 0.0 }
 0xe5b   :  { %v8123_v31 = vpop.f32.mrf.mxu1  ;;  %v8128_v41 = vpop.f32.mrf.mxu0  ;;  %v6144_v60 = vadd.f32 %v6143_v52, %v6142_v58  ;;  %8171 = vmatpush3.bf16.msra.mxu1 %v8332_v32 }
 0xe5c   :  { %8188 = vmatprep.subr.bf16.mxu1 %v8467_v15 }
 0xe5d   :  { %v5909_v36 = vpop.f32.mrf.mxu0  ;;  %v5952_v42 = vpop.f32.mrf.mxu1 }
 0xe5e   :  { %v6150_v34 = vsel %vm65_vm0, %v5952_v42, 0.0  ;;  %v7114_v42 = vld [vmem:[%s10077_s8 + $0x1] ss:$0 sm:$0xff] }
 0xe5f   :  { %v8129_v46 = vpop.f32.mrf.mxu0  ;;  %v8134_v48 = vpop.f32.mrf.mxu1  ;;  %v6151_v24 = vadd.f32 %v6150_v34, %v6149_v0  ;;  %v8337_v34 = vld [vmem:[%s10081_s12 + $0x70] sm:$0xff]   ;;  %v7125_v0 = vld [vmem:[%s10080_s11 + $0x1] ss:$0 sm:$0xff] }
 0xe60   :  { %v7115_v48 = vld [vmem:[%s10078_s9 + $0x1] ss:$0 sm:$0xff] }
 0xe61   :  { %v5955_v49 = vpop.f32.mrf.mxu1  ;;  %v5998_v51 = vpop.f32.mrf.mxu0 }
 0xe62   :  { %v6145_v59 = vsel %vm65_vm0, %v5998_v51, 0.0 }
 0xe63   :  { %v8135_v50 = vpop.f32.mrf.mxu1  ;;  %v8140_v29 = vpop.f32.mrf.mxu0  ;;  %v6146_v8 = vadd.f32 %v6145_v59, %v6144_v60  ;;  %v8333_v59 = vld [vmem:[%s10081_s12 + $0x58] sm:$0xff]   ;;  %v8334_v60 = vld [vmem:[%s10081_s12 + $0x50] sm:$0xff]  }
 0xe65   :  { %v6001_v54 = vpop.f32.mrf.mxu0  ;;  %v6044_v56 = vpop.f32.mrf.mxu1 }
 0xe66   :  { %v6152_v3 = vsel %vm65_vm0, %v6044_v56, 0.0 }
 0xe67   :  { %v8141_v61 = vpop.f32.mrf.mxu0  ;;  %v8146_v22 = vpop.f32.mrf.mxu1  ;;  %v6153_v17 = vadd.f32 %v6152_v3, %v6151_v24 }
 0xe68   :  { %v8335_v61 = vld [vmem:[%s10081_s12 + $0x78] sm:$0xff]   ;;  %v8336_v22 = vld [vmem:[%s10081_s12 + $0x48] sm:$0xff]  }
 0xe69   :  { %v6047_v63 = vpop.f32.mrf.mxu1  ;;  %v6090_v27 = vpop.f32.mrf.mxu0 }
 0xe6a   :  { %v6147_v4 = vsel %vm65_vm0, %v6090_v27, 0.0  ;;  %v8339_v63 = vld [vmem:[%s10081_s12 + $0x68] sm:$0xff]   ;;  %v8340_v27 = vld [vmem:[%s10081_s12 + $0x60] sm:$0xff]  }
 0xe6b   :  { %v6148_v2 = vadd.f32 %v6147_v4, %v6146_v8  ;;  %v8147_v6 = vpop.f32.mrf.mxu1  ;;  %v8152_v7 = vpop.f32.mrf.mxu0  ;;  %v8338_v8 = vld [vmem:[%s10081_s12 + $0x40] sm:$0xff]  }
 0xe6d   :  { %v6164_v39 = vadd.f32 %v7111_v5, %v6148_v2  ;;  %v6093_v9 = vpop.f32.mrf.mxu0  ;;  %v6136_v10 = vpop.f32.mrf.mxu1 }
 0xe6e   :  { %v6154_v57 = vsel %vm65_vm0, %v6136_v10, 0.0 }
 0xe6f   :  { %v6155_v11 = vadd.f32 %v6154_v57, %v6153_v17  ;;  %v8153_v40 = vpop.f32.mrf.mxu0  ;;  %v8158_v55 = vpop.f32.mrf.mxu1  ;;  %v6166_v45 = vadd.f32 %v6164_v39, %v9334_v19 }
 0xe71   :  { %v6165_v62 = vadd.f32 %v7111_v5, %v6155_v11  ;;  %v6139_v14 = vpop.f32.mrf.mxu1  ;;  %v6172_v25 = vsel %vm65_vm0, %v6166_v45, 0.0 }
 0xe72   :  { %6173 = vadd.xlane.f32.xlu0 %v6172_v25 }
 0xe73   :  { %v8159_v16 = vpop.f32.mrf.mxu1  ;;  %v6167_v33 = vadd.f32 %v6165_v62, %v9343_v21  ;;  %v8329_v21 = vld [vmem:[%s10079_s10 + $0x28] sm:$0xff]  }
 0xe74   :  { %8161 = vmatpush3.bf16.msra.mxu0 %v8329_v21 }
 0xe75   :  { %v6175_v43 = vsel %vm65_vm0, %v6167_v33, 0.0  ;;  %8162 = vmatprep.subr.bf16.mxu0 %v8467_v15 }
 0xe76   :  { %6176 = vadd.xlane.f32.xlu1 %v6175_v43 }
 0xe78   :  { %8163 = vmatpush3.bf16.msra.mxu0 %v8330_v28 }
 0xe79   :  { %8176 = vmatprep.subr.bf16.mxu0 %v8467_v15 }
 0xefb   :  { %v6174_v12 = vpop.xlane.xlu0 %6173 }
 0xefc   :  { %v6178_v20 = vmul.f32 0.03125, %v6174_v12 }
 0xefe   :  { %v6180_v47 = vsub.f32 %v6166_v45, %v6178_v20 }
 0xeff   :  { %v6177_v23 = vpop.xlane.xlu1 %6176 }
 0xf00   :  { %v6179_v1 = vmul.f32 0.03125, %v6177_v23  ;;  %v6182_v44 = vmul.f32 %v6180_v47, %v6180_v47 }
 0xf02   :  { %v6181_v26 = vsub.f32 %v6167_v33, %v6179_v1  ;;  %v6184_v19 = vsel %vm65_vm0, %v6182_v44, 0.0 }
 0xf03   :  { %6185 = vadd.xlane.f32.xlu0 %v6184_v19 }
 0xf04   :  { %v6183_v13 = vmul.f32 %v6181_v26, %v6181_v26 }
 0xf06   :  { %v6187_v53 = vsel %vm65_vm0, %v6183_v13, 0.0  ;;  %v7149_v13 = vld [vmem:[%s10082_s13 + $0x1] ss:$0 sm:$0xff] }
 0xf07   :  { %6188 = vadd.xlane.f32.xlu1 %v6187_v53 }
 0xf8c   :  { %v6186_v35 = vpop.xlane.xlu0 %6185 }
 0xf8d   :  { %v6190_v37 = vmul.f32 0.03125, %v6186_v35 }
 0xf8f   :  { %v6192_v38 = vadd.f32 1e-12, %v6190_v37 }
 0xf90   :  { %v6189_v18 = vpop.xlane.xlu1 %6188 }
 0xf91   :  { %8425 = vrsqrt.f32 %v6192_v38  ;;  %v6191_v31 = vmul.f32 0.03125, %v6189_v18 }
 0xf93   :  { %v6193_v41 = vadd.f32 1e-12, %v6191_v31 }
 0xf95   :  { %8427 = vrsqrt.f32 %v6193_v41 }
 0xf9e   :  { %v8426_v36 = vpop.eup %8425 }
 0xf9f   :  { %v6196_v46 = vmul.f32 %v8426_v36, %v6180_v47 }
 0xfa1   :  { %v6204_v49 = vmul.f32 %v7114_v42, %v6196_v46 }
 0xfa2   :  { %v8428_v51 = vpop.eup %8427 }
 0xfa3   :  { %v6197_v50 = vmul.f32 %v8428_v51, %v6181_v26  ;;  %v9977_v29 = vadd.f32 %v7115_v48, %v6204_v49 }
 0xfa5   :  { %v6205_v52 = vmul.f32 %v7114_v42, %v6197_v50  ;;  %v6223_v54 = vpack.c.bf16 %v9977_v29, %v9977_v29 }
 0xfa7   :  { %8165 = vmatmul.mubr.msk.bf16.vlgmr.msra.gmra.mxu0 %vm65_vm0, %v6223_v54  ;;  %v9982_v56 = vadd.f32 %v7115_v48, %v6205_v52 }
 0xfa8   :  { %8184 = vmatprep.mubr.msk.bf16.mxu0 %vm8468_vm1, %v8467_v15  ;;  %8177 = vmatpush3.bf16.msra.mxu0 %v8333_v59 }
 0xfa9   :  { %v6224_v58 = vpack.c.bf16 %v9982_v56, %v9982_v56  ;;  %8178 = vmatprep.subr.bf16.mxu0 %v8467_v15 }
 0xfab   :  { %8173 = vmatmul.mubr.msk.bf16.vlgmr.msra.gmra.mxu1 %vm65_vm0, %v6224_v58 }
 0xfac   :  { %8196 = vmatprep.mubr.msk.bf16.mxu1 %vm8468_vm1, %v8467_v15  ;;  %8179 = vmatpush3.bf16.msra.mxu0 %v8334_v60 }
 0xfad   :  { %8189 = vmatpush3.bf16.msra.mxu1 %v8335_v61  ;;  %8180 = vmatprep.subr.bf16.mxu0 %v8467_v15  ;;  %v8342_v61 = vld [vmem:[%s10085_s16] sm:$0xff]  }
 0xfae   :  { %8190 = vmatprep.subr.bf16.mxu1 %v8467_v15 }
 0xfb0   :  { %8181 = vmatpush3.bf16.msra.mxu0 %v8336_v22  ;;  %v8343_v22 = vld [vmem:[%s10085_s16 + $0x18] sm:$0xff]  }
 0xfb1   :  { %8191 = vmatpush3.bf16.msra.mxu1 %v8337_v34  ;;  %8182 = vmatprep.subr.bf16.mxu0 %v8467_v15  ;;  %v8344_v34 = vld [vmem:[%s10085_s16 + $0x10] sm:$0xff]  }
 0xfb2   :  { %8192 = vmatprep.subr.bf16.mxu1 %v8467_v15 }
 0xfb4   :  { %8183 = vmatpush3.bf16.msra.mxu0 %v8338_v8 }
 0xfb5   :  { %8193 = vmatpush3.bf16.msra.mxu1 %v8339_v63  ;;  %8200 = vmatprep.subr.bf16.mxu0 %v8467_v15 }
 0xfb6   :  { %8194 = vmatprep.subr.bf16.mxu1 %v8467_v15 }
 0xfb9   :  { %8195 = vmatpush3.bf16.msra.mxu1 %v8340_v27 }
 0xfba   :  { %8208 = vmatprep.subr.bf16.mxu1 %v8467_v15 }
0x1067   :  { %v6282_v3 = vpop.f32.mrf.mxu0 }
0x1068   :  { %v6283_v4 = vadd.f32 %v7125_v0, %v6282_v3 }
0x1069   :  { %v8166_v5 = vpop.f32.mrf.mxu0 }
0x106a   :  { %v6345_v24 = vmul.f32 0.044715, %v6283_v4  ;;  %v6343_v43 = vmul.f32 0.5, %v6283_v4 }
0x106b   :  { %v6285_v2 = vpop.f32.mrf.mxu0  ;;  %v6337_v6 = vpop.f32.mrf.mxu1 }
0x106c   :  { %v6347_v7 = vmul.f32 %v6345_v24, %v6283_v4  ;;  %v6338_v17 = vadd.f32 %v7125_v0, %v6337_v6  ;;  %v7162_v24 = vld [vmem:[%s10083_s14 + $0x1] ss:$0 sm:$0xff]  ;;  %s8469_s14 = smov [#allocation2]  }
0x106d   :  { %v8167_v39 = vpop.f32.mrf.mxu0  ;;  %v8174_v9 = vpop.f32.mrf.mxu1 }
0x106e   :  { %v6349_v10 = vmul.f32 %v6347_v7, %v6283_v4  ;;  %v6346_v57 = vmul.f32 0.044715, %v6338_v17  ;;  %v6344_v1 = vmul.f32 0.5, %v6338_v17 }
0x106f   :  { %v6340_v11 = vpop.f32.mrf.mxu1 }
0x1070   :  { %v6351_v40 = vadd.f32 %v6349_v10, %v6283_v4  ;;  %v6348_v55 = vmul.f32 %v6346_v57, %v6338_v17 }
0x1071   :  { %v8175_v45 = vpop.f32.mrf.mxu1 }
0x1072   :  { %v6353_v62 = vmul.f32 0.7978846, %v6351_v40  ;;  %v6350_v14 = vmul.f32 %v6348_v55, %v6338_v17  ;;  %v6580_v40 = vld [vmem:[%s10086_s17] sm:$0x1] }
0x1074   :  { %8429 = vtanh.f32 %v6353_v62  ;;  %v6352_v25 = vadd.f32 %v6350_v14, %v6338_v17 }
0x1076   :  { %v6354_v16 = vmul.f32 0.7978846, %v6352_v25 }
0x1078   :  { %8431 = vtanh.f32 %v6354_v16 }
0x1081   :  { %v8430_v33 = vpop.eup %8429 }
0x1082   :  { %v6357_v12 = vadd.f32 1.0, %v8430_v33 }
0x1084   :  { %v6359_v20 = vmul.f32 %v6357_v12, %v6343_v43 }
0x1085   :  { %v8432_v47 = vpop.eup %8431 }
0x1086   :  { %v6378_v23 = vpack.c.bf16 %v6359_v20, %v6359_v20  ;;  %v6358_v44 = vadd.f32 1.0, %v8432_v47 }
0x1088   :  { %v6360_v26 = vmul.f32 %v6358_v44, %v6344_v1  ;;  %8185 = vmatmul.mubr.msk.bf16.vlgmr.msra.gmra.mxu0 %vm3206_vm4, %v6378_v23 }
0x1089   :  { %8204 = vmatprep.mubr.msk.bf16.mxu0 %vm8468_vm1, %v8467_v15 }
0x108a   :  { %v6379_v19 = vpack.c.bf16 %v6360_v26, %v6360_v26 }
0x108c   :  { %8197 = vmatmul.mubr.msk.bf16.vlgmr.msra.gmra.mxu1 %vm3206_vm4, %v6379_v19 }
0x108d   :  { %8212 = vmatprep.mubr.msk.bf16.mxu1 %vm8468_vm1, %v8467_v15  ;;  %8209 = vmatpush3.bf16.msra.mxu1 %v8343_v22 }
0x108e   :  { %8210 = vmatprep.subr.bf16.mxu1 %v8467_v15 }
0x1091   :  { %8211 = vmatpush3.bf16.msra.mxu1 %v8344_v34 }
0x1148   :  { %v6449_v53 = vpop.f32.mrf.mxu0 }
0x1149   :  { %v6450_v21 = vadd.f32 %v7149_v13, %v6449_v53 }
0x114a   :  { %v8186_v28 = vpop.f32.mrf.mxu0 }
0x114b   :  { %v6522_v30 = vadd.f32 %v6450_v21, %v9977_v29 }
0x114c   :  { %v6452_v32 = vpop.f32.mrf.mxu0  ;;  %v6516_v35 = vpop.f32.mrf.mxu1 }
0x114d   :  { %v6517_v37 = vadd.f32 %v7149_v13, %v6516_v35  ;;  %v6528_v38 = vsel %vm65_vm0, %v6522_v30, 0.0 }
0x114e   :  { %v8198_v18 = vpop.f32.mrf.mxu1  ;;  %6529 = vadd.xlane.f32.xlu0 %v6528_v38  ;;  %v8187_v31 = vpop.f32.mrf.mxu0 }
0x114f   :  { %v6523_v41 = vadd.f32 %v6517_v37, %v9982_v56  ;;  %v8341_v56 = vld [vmem:[%s10085_s16 + $0x8] sm:$0xff]  }
0x1150   :  { %v6519_v36 = vpop.f32.mrf.mxu1  ;;  %8201 = vmatpush3.bf16.msra.mxu0 %v8341_v56 }
0x1151   :  { %v6531_v42 = vsel %vm65_vm0, %v6523_v41, 0.0  ;;  %8202 = vmatprep.subr.bf16.mxu0 %v8467_v15  ;;  %v7163_v15 = vld [vmem:[%s10084_s15 + $0x1] ss:$0 sm:$0xff]  ;;  %s6698_s15 = sshll.u32 %s8469_s14, 4  ;;  %s6699_s15 = int_to_ptr.vmem [resolvable:$true] %s6698_s15 }
0x1152   :  { %6532 = vadd.xlane.f32.xlu1 %v6531_v42  ;;  %v8199_v46 = vpop.f32.mrf.mxu1  ;;  %s8445_s20 = scalar_lea.vmem %s6699_s15, 32  ;;  %p8450_p1 = scmp.lt.s32.totalorder %s6699_s15, %s6699_s15 }
0x1153   :  { %p8446_p0 = scmp.ne.s32.totalorder %s6699_s15, %s8445_s20  ;;  %p8451_p2 = scmp.lt.s32.totalorder %s8445_s20, %s8445_s20 }
0x1154   :  { %8203 = vmatpush3.bf16.msra.mxu0 %v8342_v61 }
0x1155   :  { %p8452_p3 = por %p8451_p2, %p8450_p1 }
0x1157   :  { %p8453_p4 = pnand %p8452_p3, %p8446_p0 }
0x11d7   :  { %v6530_v48 = vpop.xlane.xlu0 %6529 }
0x11d8   :  { %v6534_v49 = vmul.f32 0.03125, %v6530_v48 }
0x11da   :  { %v6536_v51 = vsub.f32 %v6522_v30, %v6534_v49 }
0x11db   :  { %v6533_v50 = vpop.xlane.xlu1 %6532 }
0x11dc   :  { %v6535_v29 = vmul.f32 0.03125, %v6533_v50  ;;  %v6538_v52 = vmul.f32 %v6536_v51, %v6536_v51 }
0x11de   :  { %v6537_v54 = vsub.f32 %v6523_v41, %v6535_v29  ;;  %v6540_v58 = vsel %vm65_vm0, %v6538_v52, 0.0 }
0x11df   :  { %6541 = vadd.xlane.f32.xlu0 %v6540_v58 }
0x11e0   :  { %v6539_v59 = vmul.f32 %v6537_v54, %v6537_v54 }
0x11e2   :  { %v6543_v60 = vsel %vm65_vm0, %v6539_v59, 0.0 }
0x11e3   :  { %6544 = vadd.xlane.f32.xlu1 %v6543_v60 }
0x1268   :  { %v6542_v8 = vpop.xlane.xlu0 %6541 }
0x1269   :  { %v6546_v63 = vmul.f32 0.03125, %v6542_v8 }
0x126b   :  { %v6548_v27 = vadd.f32 1e-12, %v6546_v63 }
0x126c   :  { %v6545_v0 = vpop.xlane.xlu1 %6544 }
0x126d   :  { %8433 = vrsqrt.f32 %v6548_v27  ;;  %v6547_v3 = vmul.f32 0.03125, %v6545_v0 }
0x126f   :  { %v6549_v4 = vadd.f32 1e-12, %v6547_v3 }
0x1271   :  { %8435 = vrsqrt.f32 %v6549_v4 }
0x127a   :  { %v8434_v5 = vpop.eup %8433 }
0x127b   :  { %v6552_v2 = vmul.f32 %v8434_v5, %v6536_v51 }
0x127d   :  { %v6560_v6 = vmul.f32 %v7162_v24, %v6552_v2 }
0x127e   :  { %v8436_v7 = vpop.eup %8435 }
0x127f   :  { %v6553_v17 = vmul.f32 %v8436_v7, %v6537_v54  ;;  %v6568_v39 = vadd.f32 %v7163_v15, %v6560_v6 }
0x1281   :  { %v6561_v9 = vmul.f32 %v7162_v24, %v6553_v17  ;;  %v6578_v10 = vpack.c.bf16 %v6568_v39, %v6568_v39 }
0x1283   :  { %8205 = vmatmul.mubr.msk.bf16.vlgmr.msra.gmra.mxu0 %vm65_vm0, %v6578_v10  ;;  %v6569_v57 = vadd.f32 %v7163_v15, %v6561_v9 }
0x1285   :  { %v6579_v11 = vpack.c.bf16 %v6569_v57, %v6569_v57 }
0x1287   :  { %8213 = vmatmul.mubr.msk.bf16.vlgmr.msra.gmra.mxu1 %vm65_vm0, %v6579_v11 }
0x1343   :  { %v6630_v55 = vpop.f32.mrf.mxu0 }
0x1344   :  { %v6631_v45 = vadd.f32 %v6630_v55, %v6580_v40 }
0x1345   :  { %v8206_v62 = vpop.f32.mrf.mxu0 }
0x1346   :  { %6691 = vst [vmem:[#allocation2] sm:$0x1] %v6631_v45 }
0x1347   :  { %v6633_v14 = vpop.f32.mrf.mxu0  ;;  %v6685_v25 = vpop.f32.mrf.mxu1 }
0x1348   :  { %v6686_v16 = vadd.f32 %v6685_v25, %v6580_v40 }
0x1349   :  { %v8207_v33 = vpop.f32.mrf.mxu0  ;;  %v8214_v43 = vpop.f32.mrf.mxu1 }
0x134a   :  { %6692 = vst [vmem:[#allocation2 + $0x1] sm:$0x1] %v6686_v16 }
0x134b   :  { %v6688_v12 = vpop.f32.mrf.mxu1 }
0x134c   :  { %8456 = shalt.err (!%p8453_p4)
}
0x134d   :  { %s8470_s17 = smov 16   ;;  %s8471_s21 = smov 1   ;;  %v8215_v20 = vpop.f32.mrf.mxu1 }
0x134e   :  { %6704 = dma.vmem_to_hbm [thread:$0]  %s6699_s15, 32, %s10087_s18, [#allocation3], %s8470_s17, %s8470_s17, %s8471_s21  }
0x134f   :  { %8465 = dma.done.wait [#allocation3], 32  }
0x1350   :  { %8466 = vsyncadd [#allocation3], 4294967264 }
0x1351   :  { %6708 = vsyncpa [#allocation3], 1 }

</bundles_post_ra>
